<compile_context>
chip_gen: v7x
topology: tpu7x:2x2x1
jax: 0.10.0
libtpu: 0.0.40
codegen_flags: <defaults>
</compile_context>

<pallas_src>
import functools

import jax
import jax.numpy as jnp
from jax.experimental import pallas as pl
from jax.experimental.pallas import tpu as pltpu


def _round_up(x, m):
    return (x + m - 1) // m * m


def _tpu_config():
    """Generation-aware limits: (vmem_capacity_bytes, batch_tile_cap, multi_tc)."""
    kind = ""
    try:
        kind = jax.devices()[0].device_kind.lower()
    except Exception:
        pass
    vmem_cap = None
    try:
        vmem_cap = int(pltpu.get_tpu_info().vmem_capacity_bytes)
    except Exception:
        vmem_cap = None
    if not vmem_cap:
        # v7x has 64 MiB VMEM per TensorCore; v5e/v6e have 128 MiB.
        vmem_cap = 64 * 2**20 if "v7" in kind else 128 * 2**20
    # v6e/v7x MXUs are 256 wide -> 256-row batch tiles amortize fill/drain;
    # v5e's 128x128 MXUs gain nothing above 128.
    bt_cap = 256 if ("v6" in kind or "v7" in kind) else 128
    # Chips with 2 TensorCores sharing the grid ("megacore" style sharding of
    # the parallel axis): make sure both cores get a batch tile.
    multi_tc = any(tag in kind for tag in ("v4", "v5p", "v7"))
    return vmem_cap, bt_cap, multi_tc


def lstm_kernel(x_ref, wih_ref, whh_ref, b_ref, wfc_ref, bfc_ref,
                out_ref, gx_sc, h_sc, c_sc, *, seq_len, unroll, needs_mask):
    tc, bt, ep = x_ref.shape           # time-chunk, batch-tile, padded emb
    hp = whh_ref.shape[0]              # padded hidden size (multiple of 128)
    t_chunk = pl.program_id(1)
    n_chunks = pl.num_programs(1)

    # ---- Reset recurrent state at the first time chunk of each batch tile.
    @pl.when(t_chunk == 0)
    def _():
        h_sc[...] = jnp.zeros_like(h_sc)
        c_sc[...] = jnp.zeros_like(c_sc)

    # ---- Phase 1: hoisted input projection for this time chunk.
    # One (tc*bt, ep) @ (ep, 4*hp) MXU matmul instead of tc tiny ones; the
    # result is stored in the compute dtype (bf16 by default) so the largest
    # scratch buffer is half-size.
    x_all = x_ref[...].reshape(tc * bt, ep)
    gx = (jnp.dot(x_all, wih_ref[...], preferred_element_type=jnp.float32)
          + b_ref[...])                                   # (tc*bt, 4*hp) f32
    gx_sc[...] = gx.reshape(tc, bt, 4 * hp).astype(gx_sc.dtype)

    # ---- Phase 2: recurrence; only h @ W_hh per step.  h/c ride the
    # fori_loop carry (vregs where they fit); VMEM state scratch is read /
    # written once per chunk, not once per step.
    def step(t, carry):
        h, c = carry                                      # h: compute dtype, c: f32
        gates = (gx_sc[t].astype(jnp.float32)
                 + jnp.dot(h, whh_ref[...], preferred_element_type=jnp.float32))
        # Gate layout [i, f, o, g] (reordered in the wrapper): one contiguous
        # sigmoid over 3*hp lanes and one tanh block per step (single EUP
        # stream).  hp is a multiple of 128 -> lane-aligned slices.
        sig = jax.nn.sigmoid(gates[:, :3 * hp])
        i_g = sig[:, 0 * hp:1 * hp]
        f_g = sig[:, 1 * hp:2 * hp]
        o_g = sig[:, 2 * hp:3 * hp]
        g_g = jnp.tanh(gates[:, 3 * hp:])
        c_next = f_g * c + i_g * g_g
        h_next = o_g * jnp.tanh(c_next)
        if needs_mask:
            # Zero-padded tail time steps must not advance the state.
            valid = (t_chunk * tc + t) < seq_len
            c_next = jnp.where(valid, c_next, c)
            h_next = jnp.where(valid, h_next, h.astype(jnp.float32))
        return h_next.astype(h_sc.dtype), c_next

    h_fin, c_fin = jax.lax.fori_loop(0, tc, step, (h_sc[...], c_sc[...]),
                                     unroll=unroll)
    h_sc[...] = h_fin
    c_sc[...] = c_fin

    # ---- Phase 3: final FC projection of h_T (lane-dense output store), only
    # on the last time chunk; the output block is VMEM-resident across t.
    @pl.when(t_chunk == n_chunks - 1)
    def _():
        logits = (jnp.dot(h_fin, wfc_ref[...], preferred_element_type=jnp.float32)
                  + bfc_ref[...])
        out_ref[...] = logits.astype(out_ref.dtype)


def lstm_forward(embedded, w_ih, w_hh, b, w_fc, b_fc, *,
                 compute_dtype=jnp.bfloat16):
    """embedded: (seq_len, batch, emb) f32 -> (batch, output_dim) f32."""
    seq_len, batch, emb = embedded.shape
    hidden = w_hh.shape[0]
    out_dim = w_fc.shape[1]

    vmem_cap, bt_cap, multi_tc = _tpu_config()

    # ---- (8,128)-friendly padded sizes -------------------------------------
    hp = _round_up(hidden, 128)          # lane-aligned gate / h / c blocks
    ep = _round_up(emb, 128)             # lane-dense x tile, aligned K
    op = _round_up(out_dim, 128)         # lane-dense output store

    bt = min(bt_cap, _round_up(batch, 8))            # batch tile (sublane mult.)
    if multi_tc and batch >= 16:
        # At least 2 batch tiles so both TensorCores get work.
        bt = min(bt, max(8, _round_up((batch + 1) // 2, 8)))
    bp = _round_up(batch, bt)
    n_btiles = bp // bt

    # ---- Time-chunk size: bound O(seq) residency (x chunk double-buffered,
    # gates_x scratch, f32 phase-1 intermediate) to ~8 MiB, cap at 128 steps,
    # then balance chunks to minimize padded tail steps.
    isz = jnp.dtype(compute_dtype).itemsize
    per_step_bytes = bt * (2 * ep * isz + 4 * hp * isz + 4 * hp * 4)
    tc_max = int(max(1, min(seq_len, 128, (8 * 2**20) // max(per_step_bytes, 1))))
    n_tchunks = -(-seq_len // tc_max)
    tc = -(-seq_len // n_tchunks)
    sp = tc * n_tchunks
    needs_mask = sp != seq_len

    # ---- Pad operands; gate columns reordered [i,f,g,o] -> [i,f,o,g] so the
    # kernel can sigmoid one contiguous 3*hp block.  Padded rows/columns are
    # zero, so padded lanes never contaminate valid outputs.
    def pad_gate_cols(w, rows_pad):
        in_dim = w.shape[0]
        w4 = w.reshape(in_dim, 4, hidden)[:, jnp.array([0, 1, 3, 2]), :]
        w4 = jnp.pad(w4, ((0, rows_pad - in_dim), (0, 0), (0, hp - hidden)))
        return w4.reshape(rows_pad, 4 * hp)

    x_p = jnp.pad(embedded,
                  ((0, sp - seq_len), (0, bp - batch), (0, ep - emb)))
    x_p = x_p.astype(compute_dtype)
    wih_p = pad_gate_cols(w_ih, ep).astype(compute_dtype)
    whh_p = pad_gate_cols(w_hh, hp).astype(compute_dtype)
    b_p = pad_gate_cols(b.reshape(1, 4 * hidden), 1).astype(jnp.float32)
    wfc_p = jnp.pad(w_fc, ((0, hp - hidden), (0, op - out_dim))).astype(compute_dtype)
    bfc_p = jnp.pad(b_fc.reshape(1, out_dim),
                    ((0, 0), (0, op - out_dim))).astype(jnp.float32)

    # ---- VMEM budget: only the x chunk and the output tile are
    # double-buffered; grid-invariant weights (Buffered(1)) and scratch are
    # single-resident.  Clamp to <= 90% of this generation's VMEM capacity.
    need = (2 * tc * bt * ep * isz                  # x chunk (double-buffered)
            + 2 * bt * op * 4                       # out tile (double-buffered)
            + ep * 4 * hp * isz                     # w_ih
            + hp * 4 * hp * isz                     # w_hh
            + 4 * hp * 4                            # combined bias (f32)
            + hp * op * isz + op * 4                # fc weight + bias
            + tc * bt * 4 * hp * isz                # gates_x scratch
            + bt * hp * isz + bt * hp * 4)          # h, c state scratch
    vmem_limit = int(min(0.9 * vmem_cap, max(32 * 2**20, 1.5 * need)))

    unroll = True if tc <= 16 else 8
    kernel = functools.partial(lstm_kernel, seq_len=seq_len, unroll=unroll,
                               needs_mask=needs_mask)

    def invariant_spec(shape, use_buffered):
        idx_map = lambda i, t: (0,) * len(shape)
        if use_buffered:
            return pl.BlockSpec(shape, idx_map, pipeline_mode=pl.Buffered(1))
        return pl.BlockSpec(shape, idx_map)

    def run(use_buffered):
        grid_spec = pltpu.PrefetchScalarGridSpec(
            num_scalar_prefetch=0,
            grid=(n_btiles, n_tchunks),           # batch parallel, time serial
            in_specs=[
                pl.BlockSpec((tc, bt, ep), lambda i, t: (t, i, 0)),
                invariant_spec((ep, 4 * hp), use_buffered),
                invariant_spec((hp, 4 * hp), use_buffered),
                invariant_spec((1, 4 * hp), use_buffered),
                invariant_spec((hp, op), use_buffered),
                invariant_spec((1, op), use_buffered),
            ],
            out_specs=pl.BlockSpec((bt, op), lambda i, t: (i, 0)),
            scratch_shapes=[
                pltpu.VMEM((tc, bt, 4 * hp), compute_dtype),   # gates_x chunk
                pltpu.VMEM((bt, hp), compute_dtype),           # h state
                pltpu.VMEM((bt, hp), jnp.float32),             # c state
            ],
        )
        out = pl.pallas_call(
            kernel,
            out_shape=jax.ShapeDtypeStruct((bp, op), jnp.float32),
            grid_spec=grid_spec,
            compiler_params=pltpu.CompilerParams(
                dimension_semantics=("parallel", "arbitrary"),
                vmem_limit_bytes=vmem_limit),
        )(x_p, wih_p, whh_p, b_p, wfc_p, bfc_p)
        return jax.block_until_ready(out)

    try:
        out_p = run(True)
    except Exception:
        # pipeline_mode=pl.Buffered(1) not supported by this jax build ->
        # fall back to default double-buffered weight blocks.
        out_p = run(False)

    return out_p[:batch, :out_dim]


def torch_lstm_forward(text, params, *, compute_dtype=jnp.bfloat16):
    """text: (seq_len, batch) int32 token ids -> (batch, output_dim) f32."""
    # Embedding lookup (data-dependent gather) stays plain-JAX glue.
    embedded = jnp.take(params["embedding"], text, axis=0)  # (seq, batch, emb)
    return lstm_forward(embedded, params["w_ih"], params["w_hh"], params["b"],
                        params["w_fc"], params["b_fc"],
                        compute_dtype=compute_dtype)


def jax_reference(text, params):
    """Pure-JAX f32 reference (lax.scan LSTM) for correctness checking."""
    embedded = jnp.take(params["embedding"], text, axis=0)
    H = params["w_hh"].shape[0]
    batch = text.shape[1]

    def step(carry, x_t):
        h, c = carry
        gates = x_t @ params["w_ih"] + h @ params["w_hh"] + params["b"][0]
        i_g = jax.nn.sigmoid(gates[:, 0 * H:1 * H])
        f_g = jax.nn.sigmoid(gates[:, 1 * H:2 * H])
        g_g = jnp.tanh(gates[:, 2 * H:3 * H])
        o_g = jax.nn.sigmoid(gates[:, 3 * H:4 * H])
        c = f_g * c + i_g * g_g
        h = o_g * jnp.tanh(c)
        return (h, c), None

    h0 = jnp.zeros((batch, H), jnp.float32)
    c0 = jnp.zeros((batch, H), jnp.float32)
    (h, _), _ = jax.lax.scan(step, (h0, c0), embedded)
    return h @ params["w_fc"] + params["b_fc"][0]


def init_params(key, input_dim, embedding_dim, hidden_dim, output_dim):
    ks = jax.random.split(key, 6)
    scale = 0.1
    return {
        # nn.Embedding(input_dim, embedding_dim)
        "embedding": scale * jax.random.normal(ks[0], (input_dim, embedding_dim), jnp.float32),
        # nn.LSTM(embedding_dim, hidden_dim), gate order [i, f, g, o],
        # stored transposed as (in, 4H) so the kernel does x @ W.
        "w_ih": scale * jax.random.normal(ks[1], (embedding_dim, 4 * hidden_dim), jnp.float32),
        "w_hh": scale * jax.random.normal(ks[2], (hidden_dim, 4 * hidden_dim), jnp.float32),
        # combined bias b_ih + b_hh, shape (1, 4H)
        "b": scale * jax.random.normal(ks[3], (1, 4 * hidden_dim), jnp.float32),
        # nn.Linear(hidden_dim, output_dim), stored as (H, O)
        "w_fc": scale * jax.random.normal(ks[4], (hidden_dim, output_dim), jnp.float32),
        "b_fc": scale * jax.random.normal(ks[5], (1, output_dim), jnp.float32),
    }


if __name__ == "__main__":
    # Small shapes consistent with the module: vocab=64, emb=16, hidden=32, out=8
    input_dim, embedding_dim, hidden_dim, output_dim = 64, 16, 32, 8
    seq_len, batch = 8, 2

    key = jax.random.PRNGKey(0)
    pkey, tkey = jax.random.split(key)
    params = init_params(pkey, input_dim, embedding_dim, hidden_dim, output_dim)

    # text: (seq_len, batch) integer token ids (PyTorch LongTensor -> int32 here)
    text = jax.random.randint(tkey, (seq_len, batch), 0, input_dim, dtype=jnp.int32)

    ref = jax_reference(text, params)

    # f32 matmul path: tight check vs. the pure-JAX reference.
    out_f32 = jax.block_until_ready(
        torch_lstm_forward(text, params, compute_dtype=jnp.float32))
    assert out_f32.shape == (batch, output_dim)
    assert jnp.allclose(out_f32, ref, atol=1e-4, rtol=1e-4), "f32 mismatch vs JAX reference"

    # bf16 default path (f32 accumulation / gate math): loose check.
    out_bf16 = jax.block_until_ready(torch_lstm_forward(text, params))
    assert out_bf16.shape == (batch, output_dim)
    assert jnp.allclose(out_bf16, ref, atol=1e-1), "bf16 mismatch vs JAX reference"

    print("KERNEL_OK")
</pallas_src>

<mosaic_0001>
module attributes {stable_mosaic.version = 11 : i64} {
  func.func @lstm_kernel(%arg0: i32, %arg1: i32, %arg2: memref<8x8x128xf32, #tpu.memory_space<vmem>>, %arg3: memref<128x512xf32, #tpu.memory_space<vmem>>, %arg4: memref<128x512xf32, #tpu.memory_space<vmem>>, %arg5: memref<1x512xf32, #tpu.memory_space<vmem>>, %arg6: memref<128x128xf32, #tpu.memory_space<vmem>>, %arg7: memref<1x128xf32, #tpu.memory_space<vmem>>, %arg8: memref<8x128xf32, #tpu.memory_space<vmem>>, %arg9: memref<8x8x512xf32, #tpu.memory_space<vmem>>, %arg10: memref<8x128xf32, #tpu.memory_space<vmem>>, %arg11: memref<8x128xf32, #tpu.memory_space<vmem>>) attributes {dimension_semantics = [#tpu.dimension_semantics<parallel>, #tpu.dimension_semantics<arbitrary>], iteration_bounds = array<i64: 1, 1>, scalar_prefetch = 0 : i64, scratch_operands = 3 : i64, tpu.core_type = #tpu.core_type<tc>, window_params = [{transform_indices = @transform_0, window_bounds = array<i64: 8, 8, 128>}, {pipeline_mode = #tpu.pipeline_mode<synchronous>, transform_indices = @transform_1, window_bounds = array<i64: 128, 512>}, {pipeline_mode = #tpu.pipeline_mode<synchronous>, transform_indices = @transform_2, window_bounds = array<i64: 128, 512>}, {pipeline_mode = #tpu.pipeline_mode<synchronous>, transform_indices = @transform_3, window_bounds = array<i64: 1, 512>}, {pipeline_mode = #tpu.pipeline_mode<synchronous>, transform_indices = @transform_4, window_bounds = array<i64: 128, 128>}, {pipeline_mode = #tpu.pipeline_mode<synchronous>, transform_indices = @transform_5, window_bounds = array<i64: 1, 128>}, {transform_indices = @transform_6, window_bounds = array<i64: 8, 128>}]} {
    %c0_i32 = arith.constant 0 : i32
    %0 = arith.cmpi eq, %arg1, %c0_i32 : i32
    %1 = arith.extui %0 : i1 to i32
    %c0_i32_0 = arith.constant 0 : i32
    %2 = arith.cmpi ne, %1, %c0_i32_0 : i32
    scf.if %2 {
      %cst_69 = arith.constant 0.000000e+00 : f32
      %195 = vector.broadcast %cst_69 : f32 to vector<8x128xf32>
      %c0_70 = arith.constant 0 : index
      %c0_71 = arith.constant 0 : index
      %196 = vector.load %arg10[%c0_70, %c0_71] : memref<8x128xf32, #tpu.memory_space<vmem>>, vector<8x128xf32>
      tpu.vector_store %arg10[%c0_70, %c0_71], %195 {strides = array<i32>} : memref<8x128xf32, #tpu.memory_space<vmem>>, vector<8x128xf32>,
      %cst_72 = arith.constant 0.000000e+00 : f32
      %197 = vector.broadcast %cst_72 : f32 to vector<8x128xf32>
      %c0_73 = arith.constant 0 : index
      %c0_74 = arith.constant 0 : index
      %198 = vector.load %arg11[%c0_73, %c0_74] : memref<8x128xf32, #tpu.memory_space<vmem>>, vector<8x128xf32>
      tpu.vector_store %arg11[%c0_73, %c0_74], %197 {strides = array<i32>} : memref<8x128xf32, #tpu.memory_space<vmem>>, vector<8x128xf32>,
    } else {
    }
    %c0 = arith.constant 0 : index
    %c0_1 = arith.constant 0 : index
    %c0_2 = arith.constant 0 : index
    %3 = vector.load %arg2[%c0, %c0_1, %c0_2] : memref<8x8x128xf32, #tpu.memory_space<vmem>>, vector<8x8x128xf32>
    %4 = vector.shape_cast %3 : vector<8x8x128xf32> to vector<64x128xf32>
    %c0_3 = arith.constant 0 : index
    %c0_4 = arith.constant 0 : index
    %5 = vector.load %arg3[%c0_3, %c0_4] : memref<128x512xf32, #tpu.memory_space<vmem>>, vector<128x512xf32>
    %cst = arith.constant dense<0.000000e+00> : vector<64x512xf32>
    %6 = tpu.matmul %4, %5, %cst {dimension_numbers = #tpu.dot_dimension_numbers<[1], [0], [0], [1], [0, 0, 1, 1], [], []>} : vector<64x128xf32>, vector<128x512xf32>, vector<64x512xf32> -> vector<64x512xf32>
    %c0_5 = arith.constant 0 : index
    %c0_6 = arith.constant 0 : index
    %7 = vector.load %arg5[%c0_5, %c0_6] : memref<1x512xf32, #tpu.memory_space<vmem>>, vector<1x512xf32>
    %8 = vector.broadcast %7 : vector<1x512xf32> to vector<64x512xf32>
    %9 = arith.addf %6, %8 : vector<64x512xf32>
    %10 = vector.shape_cast %9 : vector<64x512xf32> to vector<8x8x512xf32>
    %c0_7 = arith.constant 0 : index
    %c0_8 = arith.constant 0 : index
    %c0_9 = arith.constant 0 : index
    %11 = vector.load %arg9[%c0_7, %c0_8, %c0_9] : memref<8x8x512xf32, #tpu.memory_space<vmem>>, vector<8x8x512xf32>
    tpu.vector_store %arg9[%c0_7, %c0_8, %c0_9], %10 {strides = array<i32>} : memref<8x8x512xf32, #tpu.memory_space<vmem>>, vector<8x8x512xf32>,
    %c0_10 = arith.constant 0 : index
    %c0_11 = arith.constant 0 : index
    %12 = vector.load %arg10[%c0_10, %c0_11] : memref<8x128xf32, #tpu.memory_space<vmem>>, vector<8x128xf32>
    %c0_12 = arith.constant 0 : index
    %c0_13 = arith.constant 0 : index
    %13 = vector.load %arg11[%c0_12, %c0_13] : memref<8x128xf32, #tpu.memory_space<vmem>>, vector<8x128xf32>
    %c0_i32_14 = arith.constant 0 : i32
    %14 = arith.index_cast %c0_i32_14 : i32 to index
    %c0_15 = arith.constant 0 : index
    %c0_16 = arith.constant 0 : index
    %15 = vector.load %arg9[%14, %c0_15, %c0_16] : memref<8x8x512xf32, #tpu.memory_space<vmem>>, vector<1x8x512xf32>
    %16 = vector.shape_cast %15 : vector<1x8x512xf32> to vector<8x512xf32>
    %c0_17 = arith.constant 0 : index
    %c0_18 = arith.constant 0 : index
    %17 = vector.load %arg4[%c0_17, %c0_18] : memref<128x512xf32, #tpu.memory_space<vmem>>, vector<128x512xf32>
    %cst_19 = arith.constant dense<0.000000e+00> : vector<8x512xf32>
    %18 = tpu.matmul %12, %17, %cst_19 {dimension_numbers = #tpu.dot_dimension_numbers<[1], [0], [0], [1], [0, 0, 1, 1], [], []>} : vector<8x128xf32>, vector<128x512xf32>, vector<8x512xf32> -> vector<8x512xf32>
    %19 = arith.addf %16, %18 : vector<8x512xf32>
    %20 = vector.extract_strided_slice %19 {offsets = [0, 0], sizes = [8, 384], strides = [1, 1]} : vector<8x512xf32> to vector<8x384xf32>
    %21 = arith.negf %20 : vector<8x384xf32>
    %22 = math.exp %21 : vector<8x384xf32>
    %cst_20 = arith.constant 1.000000e+00 : f32
    %23 = vector.broadcast %cst_20 : f32 to vector<8x384xf32>
    %24 = arith.addf %23, %22 : vector<8x384xf32>
    %25 = arith.divf %23, %24 : vector<8x384xf32>
    %26 = vector.extract_strided_slice %25 {offsets = [0, 0], sizes = [8, 128], strides = [1, 1]} : vector<8x384xf32> to vector<8x128xf32>
    %27 = vector.extract_strided_slice %25 {offsets = [0, 128], sizes = [8, 128], strides = [1, 1]} : vector<8x384xf32> to vector<8x128xf32>
    %28 = vector.extract_strided_slice %25 {offsets = [0, 256], sizes = [8, 128], strides = [1, 1]} : vector<8x384xf32> to vector<8x128xf32>
    %29 = vector.extract_strided_slice %19 {offsets = [0, 384], sizes = [8, 128], strides = [1, 1]} : vector<8x512xf32> to vector<8x128xf32>
    %30 = math.tanh %29 : vector<8x128xf32>
    %31 = arith.mulf %27, %13 : vector<8x128xf32>
    %32 = arith.mulf %26, %30 : vector<8x128xf32>
    %33 = arith.addf %31, %32 : vector<8x128xf32>
    %34 = math.tanh %33 : vector<8x128xf32>
    %35 = arith.mulf %28, %34 : vector<8x128xf32>
    %c1_i32 = arith.constant 1 : i32
    %36 = arith.index_cast %c1_i32 : i32 to index
    %c0_21 = arith.constant 0 : index
    %c0_22 = arith.constant 0 : index
    %37 = vector.load %arg9[%36, %c0_21, %c0_22] : memref<8x8x512xf32, #tpu.memory_space<vmem>>, vector<1x8x512xf32>
    %38 = vector.shape_cast %37 : vector<1x8x512xf32> to vector<8x512xf32>
    %c0_23 = arith.constant 0 : index
    %c0_24 = arith.constant 0 : index
    %39 = vector.load %arg4[%c0_23, %c0_24] : memref<128x512xf32, #tpu.memory_space<vmem>>, vector<128x512xf32>
    %cst_25 = arith.constant dense<0.000000e+00> : vector<8x512xf32>
    %40 = tpu.matmul %35, %39, %cst_25 {dimension_numbers = #tpu.dot_dimension_numbers<[1], [0], [0], [1], [0, 0, 1, 1], [], []>} : vector<8x128xf32>, vector<128x512xf32>, vector<8x512xf32> -> vector<8x512xf32>
    %41 = arith.addf %38, %40 : vector<8x512xf32>
    %42 = vector.extract_strided_slice %41 {offsets = [0, 0], sizes = [8, 384], strides = [1, 1]} : vector<8x512xf32> to vector<8x384xf32>
    %43 = arith.negf %42 : vector<8x384xf32>
    %44 = math.exp %43 : vector<8x384xf32>
    %cst_26 = arith.constant 1.000000e+00 : f32
    %45 = vector.broadcast %cst_26 : f32 to vector<8x384xf32>
    %46 = arith.addf %45, %44 : vector<8x384xf32>
    %47 = arith.divf %45, %46 : vector<8x384xf32>
    %48 = vector.extract_strided_slice %47 {offsets = [0, 0], sizes = [8, 128], strides = [1, 1]} : vector<8x384xf32> to vector<8x128xf32>
    %49 = vector.extract_strided_slice %47 {offsets = [0, 128], sizes = [8, 128], strides = [1, 1]} : vector<8x384xf32> to vector<8x128xf32>
    %50 = vector.extract_strided_slice %47 {offsets = [0, 256], sizes = [8, 128], strides = [1, 1]} : vector<8x384xf32> to vector<8x128xf32>
    %51 = vector.extract_strided_slice %41 {offsets = [0, 384], sizes = [8, 128], strides = [1, 1]} : vector<8x512xf32> to vector<8x128xf32>
    %52 = math.tanh %51 : vector<8x128xf32>
    %53 = arith.mulf %49, %33 : vector<8x128xf32>
    %54 = arith.mulf %48, %52 : vector<8x128xf32>
    %55 = arith.addf %53, %54 : vector<8x128xf32>
    %56 = math.tanh %55 : vector<8x128xf32>
    %57 = arith.mulf %50, %56 : vector<8x128xf32>
    %c2_i32 = arith.constant 2 : i32
    %58 = arith.index_cast %c2_i32 : i32 to index
    %c0_27 = arith.constant 0 : index
    %c0_28 = arith.constant 0 : index
    %59 = vector.load %arg9[%58, %c0_27, %c0_28] : memref<8x8x512xf32, #tpu.memory_space<vmem>>, vector<1x8x512xf32>
    %60 = vector.shape_cast %59 : vector<1x8x512xf32> to vector<8x512xf32>
    %c0_29 = arith.constant 0 : index
    %c0_30 = arith.constant 0 : index
    %61 = vector.load %arg4[%c0_29, %c0_30] : memref<128x512xf32, #tpu.memory_space<vmem>>, vector<128x512xf32>
    %cst_31 = arith.constant dense<0.000000e+00> : vector<8x512xf32>
    %62 = tpu.matmul %57, %61, %cst_31 {dimension_numbers = #tpu.dot_dimension_numbers<[1], [0], [0], [1], [0, 0, 1, 1], [], []>} : vector<8x128xf32>, vector<128x512xf32>, vector<8x512xf32> -> vector<8x512xf32>
    %63 = arith.addf %60, %62 : vector<8x512xf32>
    %64 = vector.extract_strided_slice %63 {offsets = [0, 0], sizes = [8, 384], strides = [1, 1]} : vector<8x512xf32> to vector<8x384xf32>
    %65 = arith.negf %64 : vector<8x384xf32>
    %66 = math.exp %65 : vector<8x384xf32>
    %cst_32 = arith.constant 1.000000e+00 : f32
    %67 = vector.broadcast %cst_32 : f32 to vector<8x384xf32>
    %68 = arith.addf %67, %66 : vector<8x384xf32>
    %69 = arith.divf %67, %68 : vector<8x384xf32>
    %70 = vector.extract_strided_slice %69 {offsets = [0, 0], sizes = [8, 128], strides = [1, 1]} : vector<8x384xf32> to vector<8x128xf32>
    %71 = vector.extract_strided_slice %69 {offsets = [0, 128], sizes = [8, 128], strides = [1, 1]} : vector<8x384xf32> to vector<8x128xf32>
    %72 = vector.extract_strided_slice %69 {offsets = [0, 256], sizes = [8, 128], strides = [1, 1]} : vector<8x384xf32> to vector<8x128xf32>
    %73 = vector.extract_strided_slice %63 {offsets = [0, 384], sizes = [8, 128], strides = [1, 1]} : vector<8x512xf32> to vector<8x128xf32>
    %74 = math.tanh %73 : vector<8x128xf32>
    %75 = arith.mulf %71, %55 : vector<8x128xf32>
    %76 = arith.mulf %70, %74 : vector<8x128xf32>
    %77 = arith.addf %75, %76 : vector<8x128xf32>
    %78 = math.tanh %77 : vector<8x128xf32>
    %79 = arith.mulf %72, %78 : vector<8x128xf32>
    %c3_i32 = arith.constant 3 : i32
    %80 = arith.index_cast %c3_i32 : i32 to index
    %c0_33 = arith.constant 0 : index
    %c0_34 = arith.constant 0 : index
    %81 = vector.load %arg9[%80, %c0_33, %c0_34] : memref<8x8x512xf32, #tpu.memory_space<vmem>>, vector<1x8x512xf32>
    %82 = vector.shape_cast %81 : vector<1x8x512xf32> to vector<8x512xf32>
    %c0_35 = arith.constant 0 : index
    %c0_36 = arith.constant 0 : index
    %83 = vector.load %arg4[%c0_35, %c0_36] : memref<128x512xf32, #tpu.memory_space<vmem>>, vector<128x512xf32>
    %cst_37 = arith.constant dense<0.000000e+00> : vector<8x512xf32>
    %84 = tpu.matmul %79, %83, %cst_37 {dimension_numbers = #tpu.dot_dimension_numbers<[1], [0], [0], [1], [0, 0, 1, 1], [], []>} : vector<8x128xf32>, vector<128x512xf32>, vector<8x512xf32> -> vector<8x512xf32>
    %85 = arith.addf %82, %84 : vector<8x512xf32>
    %86 = vector.extract_strided_slice %85 {offsets = [0, 0], sizes = [8, 384], strides = [1, 1]} : vector<8x512xf32> to vector<8x384xf32>
    %87 = arith.negf %86 : vector<8x384xf32>
    %88 = math.exp %87 : vector<8x384xf32>
    %cst_38 = arith.constant 1.000000e+00 : f32
    %89 = vector.broadcast %cst_38 : f32 to vector<8x384xf32>
    %90 = arith.addf %89, %88 : vector<8x384xf32>
    %91 = arith.divf %89, %90 : vector<8x384xf32>
    %92 = vector.extract_strided_slice %91 {offsets = [0, 0], sizes = [8, 128], strides = [1, 1]} : vector<8x384xf32> to vector<8x128xf32>
    %93 = vector.extract_strided_slice %91 {offsets = [0, 128], sizes = [8, 128], strides = [1, 1]} : vector<8x384xf32> to vector<8x128xf32>
    %94 = vector.extract_strided_slice %91 {offsets = [0, 256], sizes = [8, 128], strides = [1, 1]} : vector<8x384xf32> to vector<8x128xf32>
    %95 = vector.extract_strided_slice %85 {offsets = [0, 384], sizes = [8, 128], strides = [1, 1]} : vector<8x512xf32> to vector<8x128xf32>
    %96 = math.tanh %95 : vector<8x128xf32>
    %97 = arith.mulf %93, %77 : vector<8x128xf32>
    %98 = arith.mulf %92, %96 : vector<8x128xf32>
    %99 = arith.addf %97, %98 : vector<8x128xf32>
    %100 = math.tanh %99 : vector<8x128xf32>
    %101 = arith.mulf %94, %100 : vector<8x128xf32>
    %c4_i32 = arith.constant 4 : i32
    %102 = arith.index_cast %c4_i32 : i32 to index
    %c0_39 = arith.constant 0 : index
    %c0_40 = arith.constant 0 : index
    %103 = vector.load %arg9[%102, %c0_39, %c0_40] : memref<8x8x512xf32, #tpu.memory_space<vmem>>, vector<1x8x512xf32>
    %104 = vector.shape_cast %103 : vector<1x8x512xf32> to vector<8x512xf32>
    %c0_41 = arith.constant 0 : index
    %c0_42 = arith.constant 0 : index
    %105 = vector.load %arg4[%c0_41, %c0_42] : memref<128x512xf32, #tpu.memory_space<vmem>>, vector<128x512xf32>
    %cst_43 = arith.constant dense<0.000000e+00> : vector<8x512xf32>
    %106 = tpu.matmul %101, %105, %cst_43 {dimension_numbers = #tpu.dot_dimension_numbers<[1], [0], [0], [1], [0, 0, 1, 1], [], []>} : vector<8x128xf32>, vector<128x512xf32>, vector<8x512xf32> -> vector<8x512xf32>
    %107 = arith.addf %104, %106 : vector<8x512xf32>
    %108 = vector.extract_strided_slice %107 {offsets = [0, 0], sizes = [8, 384], strides = [1, 1]} : vector<8x512xf32> to vector<8x384xf32>
    %109 = arith.negf %108 : vector<8x384xf32>
    %110 = math.exp %109 : vector<8x384xf32>
    %cst_44 = arith.constant 1.000000e+00 : f32
    %111 = vector.broadcast %cst_44 : f32 to vector<8x384xf32>
    %112 = arith.addf %111, %110 : vector<8x384xf32>
    %113 = arith.divf %111, %112 : vector<8x384xf32>
    %114 = vector.extract_strided_slice %113 {offsets = [0, 0], sizes = [8, 128], strides = [1, 1]} : vector<8x384xf32> to vector<8x128xf32>
    %115 = vector.extract_strided_slice %113 {offsets = [0, 128], sizes = [8, 128], strides = [1, 1]} : vector<8x384xf32> to vector<8x128xf32>
    %116 = vector.extract_strided_slice %113 {offsets = [0, 256], sizes = [8, 128], strides = [1, 1]} : vector<8x384xf32> to vector<8x128xf32>
    %117 = vector.extract_strided_slice %107 {offsets = [0, 384], sizes = [8, 128], strides = [1, 1]} : vector<8x512xf32> to vector<8x128xf32>
    %118 = math.tanh %117 : vector<8x128xf32>
    %119 = arith.mulf %115, %99 : vector<8x128xf32>
    %120 = arith.mulf %114, %118 : vector<8x128xf32>
    %121 = arith.addf %119, %120 : vector<8x128xf32>
    %122 = math.tanh %121 : vector<8x128xf32>
    %123 = arith.mulf %116, %122 : vector<8x128xf32>
    %c5_i32 = arith.constant 5 : i32
    %124 = arith.index_cast %c5_i32 : i32 to index
    %c0_45 = arith.constant 0 : index
    %c0_46 = arith.constant 0 : index
    %125 = vector.load %arg9[%124, %c0_45, %c0_46] : memref<8x8x512xf32, #tpu.memory_space<vmem>>, vector<1x8x512xf32>
    %126 = vector.shape_cast %125 : vector<1x8x512xf32> to vector<8x512xf32>
    %c0_47 = arith.constant 0 : index
    %c0_48 = arith.constant 0 : index
    %127 = vector.load %arg4[%c0_47, %c0_48] : memref<128x512xf32, #tpu.memory_space<vmem>>, vector<128x512xf32>
    %cst_49 = arith.constant dense<0.000000e+00> : vector<8x512xf32>
    %128 = tpu.matmul %123, %127, %cst_49 {dimension_numbers = #tpu.dot_dimension_numbers<[1], [0], [0], [1], [0, 0, 1, 1], [], []>} : vector<8x128xf32>, vector<128x512xf32>, vector<8x512xf32> -> vector<8x512xf32>
    %129 = arith.addf %126, %128 : vector<8x512xf32>
    %130 = vector.extract_strided_slice %129 {offsets = [0, 0], sizes = [8, 384], strides = [1, 1]} : vector<8x512xf32> to vector<8x384xf32>
    %131 = arith.negf %130 : vector<8x384xf32>
    %132 = math.exp %131 : vector<8x384xf32>
    %cst_50 = arith.constant 1.000000e+00 : f32
    %133 = vector.broadcast %cst_50 : f32 to vector<8x384xf32>
    %134 = arith.addf %133, %132 : vector<8x384xf32>
    %135 = arith.divf %133, %134 : vector<8x384xf32>
    %136 = vector.extract_strided_slice %135 {offsets = [0, 0], sizes = [8, 128], strides = [1, 1]} : vector<8x384xf32> to vector<8x128xf32>
    %137 = vector.extract_strided_slice %135 {offsets = [0, 128], sizes = [8, 128], strides = [1, 1]} : vector<8x384xf32> to vector<8x128xf32>
    %138 = vector.extract_strided_slice %135 {offsets = [0, 256], sizes = [8, 128], strides = [1, 1]} : vector<8x384xf32> to vector<8x128xf32>
    %139 = vector.extract_strided_slice %129 {offsets = [0, 384], sizes = [8, 128], strides = [1, 1]} : vector<8x512xf32> to vector<8x128xf32>
    %140 = math.tanh %139 : vector<8x128xf32>
    %141 = arith.mulf %137, %121 : vector<8x128xf32>
    %142 = arith.mulf %136, %140 : vector<8x128xf32>
    %143 = arith.addf %141, %142 : vector<8x128xf32>
    %144 = math.tanh %143 : vector<8x128xf32>
    %145 = arith.mulf %138, %144 : vector<8x128xf32>
    %c6_i32 = arith.constant 6 : i32
    %146 = arith.index_cast %c6_i32 : i32 to index
    %c0_51 = arith.constant 0 : index
    %c0_52 = arith.constant 0 : index
    %147 = vector.load %arg9[%146, %c0_51, %c0_52] : memref<8x8x512xf32, #tpu.memory_space<vmem>>, vector<1x8x512xf32>
    %148 = vector.shape_cast %147 : vector<1x8x512xf32> to vector<8x512xf32>
    %c0_53 = arith.constant 0 : index
    %c0_54 = arith.constant 0 : index
    %149 = vector.load %arg4[%c0_53, %c0_54] : memref<128x512xf32, #tpu.memory_space<vmem>>, vector<128x512xf32>
    %cst_55 = arith.constant dense<0.000000e+00> : vector<8x512xf32>
    %150 = tpu.matmul %145, %149, %cst_55 {dimension_numbers = #tpu.dot_dimension_numbers<[1], [0], [0], [1], [0, 0, 1, 1], [], []>} : vector<8x128xf32>, vector<128x512xf32>, vector<8x512xf32> -> vector<8x512xf32>
    %151 = arith.addf %148, %150 : vector<8x512xf32>
    %152 = vector.extract_strided_slice %151 {offsets = [0, 0], sizes = [8, 384], strides = [1, 1]} : vector<8x512xf32> to vector<8x384xf32>
    %153 = arith.negf %152 : vector<8x384xf32>
    %154 = math.exp %153 : vector<8x384xf32>
    %cst_56 = arith.constant 1.000000e+00 : f32
    %155 = vector.broadcast %cst_56 : f32 to vector<8x384xf32>
    %156 = arith.addf %155, %154 : vector<8x384xf32>
    %157 = arith.divf %155, %156 : vector<8x384xf32>
    %158 = vector.extract_strided_slice %157 {offsets = [0, 0], sizes = [8, 128], strides = [1, 1]} : vector<8x384xf32> to vector<8x128xf32>
    %159 = vector.extract_strided_slice %157 {offsets = [0, 128], sizes = [8, 128], strides = [1, 1]} : vector<8x384xf32> to vector<8x128xf32>
    %160 = vector.extract_strided_slice %157 {offsets = [0, 256], sizes = [8, 128], strides = [1, 1]} : vector<8x384xf32> to vector<8x128xf32>
    %161 = vector.extract_strided_slice %151 {offsets = [0, 384], sizes = [8, 128], strides = [1, 1]} : vector<8x512xf32> to vector<8x128xf32>
    %162 = math.tanh %161 : vector<8x128xf32>
    %163 = arith.mulf %159, %143 : vector<8x128xf32>
    %164 = arith.mulf %158, %162 : vector<8x128xf32>
    %165 = arith.addf %163, %164 : vector<8x128xf32>
    %166 = math.tanh %165 : vector<8x128xf32>
    %167 = arith.mulf %160, %166 : vector<8x128xf32>
    %c7_i32 = arith.constant 7 : i32
    %168 = arith.index_cast %c7_i32 : i32 to index
    %c0_57 = arith.constant 0 : index
    %c0_58 = arith.constant 0 : index
    %169 = vector.load %arg9[%168, %c0_57, %c0_58] : memref<8x8x512xf32, #tpu.memory_space<vmem>>, vector<1x8x512xf32>
    %170 = vector.shape_cast %169 : vector<1x8x512xf32> to vector<8x512xf32>
    %c0_59 = arith.constant 0 : index
    %c0_60 = arith.constant 0 : index
    %171 = vector.load %arg4[%c0_59, %c0_60] : memref<128x512xf32, #tpu.memory_space<vmem>>, vector<128x512xf32>
    %cst_61 = arith.constant dense<0.000000e+00> : vector<8x512xf32>
    %172 = tpu.matmul %167, %171, %cst_61 {dimension_numbers = #tpu.dot_dimension_numbers<[1], [0], [0], [1], [0, 0, 1, 1], [], []>} : vector<8x128xf32>, vector<128x512xf32>, vector<8x512xf32> -> vector<8x512xf32>
    %173 = arith.addf %170, %172 : vector<8x512xf32>
    %174 = vector.extract_strided_slice %173 {offsets = [0, 0], sizes = [8, 384], strides = [1, 1]} : vector<8x512xf32> to vector<8x384xf32>
    %175 = arith.negf %174 : vector<8x384xf32>
    %176 = math.exp %175 : vector<8x384xf32>
    %cst_62 = arith.constant 1.000000e+00 : f32
    %177 = vector.broadcast %cst_62 : f32 to vector<8x384xf32>
    %178 = arith.addf %177, %176 : vector<8x384xf32>
    %179 = arith.divf %177, %178 : vector<8x384xf32>
    %180 = vector.extract_strided_slice %179 {offsets = [0, 0], sizes = [8, 128], strides = [1, 1]} : vector<8x384xf32> to vector<8x128xf32>
    %181 = vector.extract_strided_slice %179 {offsets = [0, 128], sizes = [8, 128], strides = [1, 1]} : vector<8x384xf32> to vector<8x128xf32>
    %182 = vector.extract_strided_slice %179 {offsets = [0, 256], sizes = [8, 128], strides = [1, 1]} : vector<8x384xf32> to vector<8x128xf32>
    %183 = vector.extract_strided_slice %173 {offsets = [0, 384], sizes = [8, 128], strides = [1, 1]} : vector<8x512xf32> to vector<8x128xf32>
    %184 = math.tanh %183 : vector<8x128xf32>
    %185 = arith.mulf %181, %165 : vector<8x128xf32>
    %186 = arith.mulf %180, %184 : vector<8x128xf32>
    %187 = arith.addf %185, %186 : vector<8x128xf32>
    %188 = math.tanh %187 : vector<8x128xf32>
    %189 = arith.mulf %182, %188 : vector<8x128xf32>
    %c8_i32 = arith.constant 8 : i32
    %c0_63 = arith.constant 0 : index
    %c0_64 = arith.constant 0 : index
    %190 = vector.load %arg10[%c0_63, %c0_64] : memref<8x128xf32, #tpu.memory_space<vmem>>, vector<8x128xf32>
    tpu.vector_store %arg10[%c0_63, %c0_64], %189 {strides = array<i32>} : memref<8x128xf32, #tpu.memory_space<vmem>>, vector<8x128xf32>,
    %c0_65 = arith.constant 0 : index
    %c0_66 = arith.constant 0 : index
    %191 = vector.load %arg11[%c0_65, %c0_66] : memref<8x128xf32, #tpu.memory_space<vmem>>, vector<8x128xf32>
    tpu.vector_store %arg11[%c0_65, %c0_66], %187 {strides = array<i32>} : memref<8x128xf32, #tpu.memory_space<vmem>>, vector<8x128xf32>,
    %c0_i32_67 = arith.constant 0 : i32
    %192 = arith.cmpi eq, %arg1, %c0_i32_67 : i32
    %193 = arith.extui %192 : i1 to i32
    %c0_i32_68 = arith.constant 0 : i32
    %194 = arith.cmpi ne, %193, %c0_i32_68 : i32
    scf.if %194 {
      %c0_69 = arith.constant 0 : index
      %c0_70 = arith.constant 0 : index
      %195 = vector.load %arg6[%c0_69, %c0_70] : memref<128x128xf32, #tpu.memory_space<vmem>>, vector<128x128xf32>
      %cst_71 = arith.constant dense<0.000000e+00> : vector<8x128xf32>
      %196 = tpu.matmul %189, %195, %cst_71 {dimension_numbers = #tpu.dot_dimension_numbers<[1], [0], [0], [1], [0, 0, 1, 1], [], []>} : vector<8x128xf32>, vector<128x128xf32>, vector<8x128xf32> -> vector<8x128xf32>
      %c0_72 = arith.constant 0 : index
      %c0_73 = arith.constant 0 : index
      %197 = vector.load %arg7[%c0_72, %c0_73] : memref<1x128xf32, #tpu.memory_space<vmem>>, vector<1x128xf32>
      %198 = vector.broadcast %197 : vector<1x128xf32> to vector<8x128xf32>
      %199 = arith.addf %196, %198 : vector<8x128xf32>
      %c0_74 = arith.constant 0 : index
      %c0_75 = arith.constant 0 : index
      %200 = vector.load %arg8[%c0_74, %c0_75] : memref<8x128xf32, #tpu.memory_space<vmem>>, vector<8x128xf32>
      tpu.vector_store %arg8[%c0_74, %c0_75], %199 {strides = array<i32>} : memref<8x128xf32, #tpu.memory_space<vmem>>, vector<8x128xf32>,
    } else {
    }
    return
  }
  func.func @transform_0(%arg0: i32, %arg1: i32) -> (i32, i32, i32) {
    %c0_i32 = arith.constant 0 : i32
    %c0_i32_0 = arith.constant 0 : i32
    return %arg1, %arg0, %c0_i32 : i32, i32, i32
  }
  func.func @transform_1(%arg0: i32, %arg1: i32) -> (i32, i32) {
    %c0_i32 = arith.constant 0 : i32
    %c0_i32_0 = arith.constant 0 : i32
    %c0_i32_1 = arith.constant 0 : i32
    return %c0_i32, %c0_i32_0 : i32, i32
  }
  func.func @transform_2(%arg0: i32, %arg1: i32) -> (i32, i32) {
    %c0_i32 = arith.constant 0 : i32
    %c0_i32_0 = arith.constant 0 : i32
    %c0_i32_1 = arith.constant 0 : i32
    return %c0_i32, %c0_i32_0 : i32, i32
  }
  func.func @transform_3(%arg0: i32, %arg1: i32) -> (i32, i32) {
    %c0_i32 = arith.constant 0 : i32
    %c0_i32_0 = arith.constant 0 : i32
    %c0_i32_1 = arith.constant 0 : i32
    return %c0_i32, %c0_i32_0 : i32, i32
  }
  func.func @transform_4(%arg0: i32, %arg1: i32) -> (i32, i32) {
    %c0_i32 = arith.constant 0 : i32
    %c0_i32_0 = arith.constant 0 : i32
    %c0_i32_1 = arith.constant 0 : i32
    return %c0_i32, %c0_i32_0 : i32, i32
  }
  func.func @transform_5(%arg0: i32, %arg1: i32) -> (i32, i32) {
    %c0_i32 = arith.constant 0 : i32
    %c0_i32_0 = arith.constant 0 : i32
    %c0_i32_1 = arith.constant 0 : i32
    return %c0_i32, %c0_i32_0 : i32, i32
  }
  func.func @transform_6(%arg0: i32, %arg1: i32) -> (i32, i32) {
    %c0_i32 = arith.constant 0 : i32
    %c0_i32_0 = arith.constant 0 : i32
    return %arg0, %c0_i32 : i32, i32
  }
}

module attributes {stable_mosaic.version = 11 : i64} {
  func.func @lstm_kernel(%arg0: i32, %arg1: i32, %arg2: memref<8x8x128xf32, #tpu.memory_space<vmem>>, %arg3: memref<128x512xf32, #tpu.memory_space<vmem>>, %arg4: memref<128x512xf32, #tpu.memory_space<vmem>>, %arg5: memref<1x512xf32, #tpu.memory_space<vmem>>, %arg6: memref<128x128xf32, #tpu.memory_space<vmem>>, %arg7: memref<1x128xf32, #tpu.memory_space<vmem>>, %arg8: memref<8x128xf32, #tpu.memory_space<vmem>>, %arg9: memref<8x8x512xf32, #tpu.memory_space<vmem>>, %arg10: memref<8x128xf32, #tpu.memory_space<vmem>>, %arg11: memref<8x128xf32, #tpu.memory_space<vmem>>) attributes {dimension_semantics = [#tpu.dimension_semantics<parallel>, #tpu.dimension_semantics<arbitrary>], iteration_bounds = array<i64: 1, 1>, scalar_prefetch = 0 : i64, scratch_operands = 3 : i64, tpu.core_type = #tpu.core_type<tc>, window_params = [{transform_indices = @transform_0, window_bounds = array<i64: 8, 8, 128>}, {pipeline_mode = #tpu.pipeline_mode<synchronous>, transform_indices = @transform_1, window_bounds = array<i64: 128, 512>}, {pipeline_mode = #tpu.pipeline_mode<synchronous>, transform_indices = @transform_2, window_bounds = array<i64: 128, 512>}, {pipeline_mode = #tpu.pipeline_mode<synchronous>, transform_indices = @transform_3, window_bounds = array<i64: 1, 512>}, {pipeline_mode = #tpu.pipeline_mode<synchronous>, transform_indices = @transform_4, window_bounds = array<i64: 128, 128>}, {pipeline_mode = #tpu.pipeline_mode<synchronous>, transform_indices = @transform_5, window_bounds = array<i64: 1, 128>}, {transform_indices = @transform_6, window_bounds = array<i64: 8, 128>}]} {
    %c0_i32 = arith.constant 0 : i32
    %0 = arith.cmpi eq, %arg1, %c0_i32 : i32
    %1 = arith.extui %0 : i1 to i32
    %c0_i32_0 = arith.constant 0 : i32
    %2 = arith.cmpi ne, %1, %c0_i32_0 : i32
    scf.if %2 {
      %cst_69 = arith.constant 0.000000e+00 : f32
      %195 = vector.broadcast %cst_69 : f32 to vector<8x128xf32>
      %c0_70 = arith.constant 0 : index
      %c0_71 = arith.constant 0 : index
      %196 = vector.load %arg10[%c0_70, %c0_71] : memref<8x128xf32, #tpu.memory_space<vmem>>, vector<8x128xf32>
      tpu.vector_store %arg10[%c0_70, %c0_71], %195 {strides = array<i32>} : memref<8x128xf32, #tpu.memory_space<vmem>>, vector<8x128xf32>,
      %cst_72 = arith.constant 0.000000e+00 : f32
      %197 = vector.broadcast %cst_72 : f32 to vector<8x128xf32>
      %c0_73 = arith.constant 0 : index
      %c0_74 = arith.constant 0 : index
      %198 = vector.load %arg11[%c0_73, %c0_74] : memref<8x128xf32, #tpu.memory_space<vmem>>, vector<8x128xf32>
      tpu.vector_store %arg11[%c0_73, %c0_74], %197 {strides = array<i32>} : memref<8x128xf32, #tpu.memory_space<vmem>>, vector<8x128xf32>,
    } else {
    }
    %c0 = arith.constant 0 : index
    %c0_1 = arith.constant 0 : index
    %c0_2 = arith.constant 0 : index
    %3 = vector.load %arg2[%c0, %c0_1, %c0_2] : memref<8x8x128xf32, #tpu.memory_space<vmem>>, vector<8x8x128xf32>
    %4 = vector.shape_cast %3 : vector<8x8x128xf32> to vector<64x128xf32>
    %c0_3 = arith.constant 0 : index
    %c0_4 = arith.constant 0 : index
    %5 = vector.load %arg3[%c0_3, %c0_4] : memref<128x512xf32, #tpu.memory_space<vmem>>, vector<128x512xf32>
    %cst = arith.constant dense<0.000000e+00> : vector<64x512xf32>
    %6 = tpu.matmul %4, %5, %cst {dimension_numbers = #tpu.dot_dimension_numbers<[1], [0], [0], [1], [0, 0, 1, 1], [], []>} : vector<64x128xf32>, vector<128x512xf32>, vector<64x512xf32> -> vector<64x512xf32>
    %c0_5 = arith.constant 0 : index
    %c0_6 = arith.constant 0 : index
    %7 = vector.load %arg5[%c0_5, %c0_6] : memref<1x512xf32, #tpu.memory_space<vmem>>, vector<1x512xf32>
    %8 = vector.broadcast %7 : vector<1x512xf32> to vector<64x512xf32>
    %9 = arith.addf %6, %8 : vector<64x512xf32>
    %10 = vector.shape_cast %9 : vector<64x512xf32> to vector<8x8x512xf32>
    %c0_7 = arith.constant 0 : index
    %c0_8 = arith.constant 0 : index
    %c0_9 = arith.constant 0 : index
    %11 = vector.load %arg9[%c0_7, %c0_8, %c0_9] : memref<8x8x512xf32, #tpu.memory_space<vmem>>, vector<8x8x512xf32>
    tpu.vector_store %arg9[%c0_7, %c0_8, %c0_9], %10 {strides = array<i32>} : memref<8x8x512xf32, #tpu.memory_space<vmem>>, vector<8x8x512xf32>,
    %c0_10 = arith.constant 0 : index
    %c0_11 = arith.constant 0 : index
    %12 = vector.load %arg10[%c0_10, %c0_11] : memref<8x128xf32, #tpu.memory_space<vmem>>, vector<8x128xf32>
    %c0_12 = arith.constant 0 : index
    %c0_13 = arith.constant 0 : index
    %13 = vector.load %arg11[%c0_12, %c0_13] : memref<8x128xf32, #tpu.memory_space<vmem>>, vector<8x128xf32>
    %c0_i32_14 = arith.constant 0 : i32
    %14 = arith.index_cast %c0_i32_14 : i32 to index
    %c0_15 = arith.constant 0 : index
    %c0_16 = arith.constant 0 : index
    %15 = vector.load %arg9[%14, %c0_15, %c0_16] : memref<8x8x512xf32, #tpu.memory_space<vmem>>, vector<1x8x512xf32>
    %16 = vector.shape_cast %15 : vector<1x8x512xf32> to vector<8x512xf32>
    %c0_17 = arith.constant 0 : index
    %c0_18 = arith.constant 0 : index
    %17 = vector.load %arg4[%c0_17, %c0_18] : memref<128x512xf32, #tpu.memory_space<vmem>>, vector<128x512xf32>
    %cst_19 = arith.constant dense<0.000000e+00> : vector<8x512xf32>
    %18 = tpu.matmul %12, %17, %cst_19 {dimension_numbers = #tpu.dot_dimension_numbers<[1], [0], [0], [1], [0, 0, 1, 1], [], []>} : vector<8x128xf32>, vector<128x512xf32>, vector<8x512xf32> -> vector<8x512xf32>
    %19 = arith.addf %16, %18 : vector<8x512xf32>
    %20 = vector.extract_strided_slice %19 {offsets = [0, 0], sizes = [8, 384], strides = [1, 1]} : vector<8x512xf32> to vector<8x384xf32>
    %21 = arith.negf %20 : vector<8x384xf32>
    %22 = math.exp %21 : vector<8x384xf32>
    %cst_20 = arith.constant 1.000000e+00 : f32
    %23 = vector.broadcast %cst_20 : f32 to vector<8x384xf32>
    %24 = arith.addf %23, %22 : vector<8x384xf32>
    %25 = arith.divf %23, %24 : vector<8x384xf32>
    %26 = vector.extract_strided_slice %25 {offsets = [0, 0], sizes = [8, 128], strides = [1, 1]} : vector<8x384xf32> to vector<8x128xf32>
    %27 = vector.extract_strided_slice %25 {offsets = [0, 128], sizes = [8, 128], strides = [1, 1]} : vector<8x384xf32> to vector<8x128xf32>
    %28 = vector.extract_strided_slice %25 {offsets = [0, 256], sizes = [8, 128], strides = [1, 1]} : vector<8x384xf32> to vector<8x128xf32>
    %29 = vector.extract_strided_slice %19 {offsets = [0, 384], sizes = [8, 128], strides = [1, 1]} : vector<8x512xf32> to vector<8x128xf32>
    %30 = math.tanh %29 : vector<8x128xf32>
    %31 = arith.mulf %27, %13 : vector<8x128xf32>
    %32 = arith.mulf %26, %30 : vector<8x128xf32>
    %33 = arith.addf %31, %32 : vector<8x128xf32>
    %34 = math.tanh %33 : vector<8x128xf32>
    %35 = arith.mulf %28, %34 : vector<8x128xf32>
    %c1_i32 = arith.constant 1 : i32
    %36 = arith.index_cast %c1_i32 : i32 to index
    %c0_21 = arith.constant 0 : index
    %c0_22 = arith.constant 0 : index
    %37 = vector.load %arg9[%36, %c0_21, %c0_22] : memref<8x8x512xf32, #tpu.memory_space<vmem>>, vector<1x8x512xf32>
    %38 = vector.shape_cast %37 : vector<1x8x512xf32> to vector<8x512xf32>
    %c0_23 = arith.constant 0 : index
    %c0_24 = arith.constant 0 : index
    %39 = vector.load %arg4[%c0_23, %c0_24] : memref<128x512xf32, #tpu.memory_space<vmem>>, vector<128x512xf32>
    %cst_25 = arith.constant dense<0.000000e+00> : vector<8x512xf32>
    %40 = tpu.matmul %35, %39, %cst_25 {dimension_numbers = #tpu.dot_dimension_numbers<[1], [0], [0], [1], [0, 0, 1, 1], [], []>} : vector<8x128xf32>, vector<128x512xf32>, vector<8x512xf32> -> vector<8x512xf32>
    %41 = arith.addf %38, %40 : vector<8x512xf32>
    %42 = vector.extract_strided_slice %41 {offsets = [0, 0], sizes = [8, 384], strides = [1, 1]} : vector<8x512xf32> to vector<8x384xf32>
    %43 = arith.negf %42 : vector<8x384xf32>
    %44 = math.exp %43 : vector<8x384xf32>
    %cst_26 = arith.constant 1.000000e+00 : f32
    %45 = vector.broadcast %cst_26 : f32 to vector<8x384xf32>
    %46 = arith.addf %45, %44 : vector<8x384xf32>
    %47 = arith.divf %45, %46 : vector<8x384xf32>
    %48 = vector.extract_strided_slice %47 {offsets = [0, 0], sizes = [8, 128], strides = [1, 1]} : vector<8x384xf32> to vector<8x128xf32>
    %49 = vector.extract_strided_slice %47 {offsets = [0, 128], sizes = [8, 128], strides = [1, 1]} : vector<8x384xf32> to vector<8x128xf32>
    %50 = vector.extract_strided_slice %47 {offsets = [0, 256], sizes = [8, 128], strides = [1, 1]} : vector<8x384xf32> to vector<8x128xf32>
    %51 = vector.extract_strided_slice %41 {offsets = [0, 384], sizes = [8, 128], strides = [1, 1]} : vector<8x512xf32> to vector<8x128xf32>
    %52 = math.tanh %51 : vector<8x128xf32>
    %53 = arith.mulf %49, %33 : vector<8x128xf32>
    %54 = arith.mulf %48, %52 : vector<8x128xf32>
    %55 = arith.addf %53, %54 : vector<8x128xf32>
    %56 = math.tanh %55 : vector<8x128xf32>
    %57 = arith.mulf %50, %56 : vector<8x128xf32>
    %c2_i32 = arith.constant 2 : i32
    %58 = arith.index_cast %c2_i32 : i32 to index
    %c0_27 = arith.constant 0 : index
    %c0_28 = arith.constant 0 : index
    %59 = vector.load %arg9[%58, %c0_27, %c0_28] : memref<8x8x512xf32, #tpu.memory_space<vmem>>, vector<1x8x512xf32>
    %60 = vector.shape_cast %59 : vector<1x8x512xf32> to vector<8x512xf32>
    %c0_29 = arith.constant 0 : index
    %c0_30 = arith.constant 0 : index
    %61 = vector.load %arg4[%c0_29, %c0_30] : memref<128x512xf32, #tpu.memory_space<vmem>>, vector<128x512xf32>
    %cst_31 = arith.constant dense<0.000000e+00> : vector<8x512xf32>
    %62 = tpu.matmul %57, %61, %cst_31 {dimension_numbers = #tpu.dot_dimension_numbers<[1], [0], [0], [1], [0, 0, 1, 1], [], []>} : vector<8x128xf32>, vector<128x512xf32>, vector<8x512xf32> -> vector<8x512xf32>
    %63 = arith.addf %60, %62 : vector<8x512xf32>
    %64 = vector.extract_strided_slice %63 {offsets = [0, 0], sizes = [8, 384], strides = [1, 1]} : vector<8x512xf32> to vector<8x384xf32>
    %65 = arith.negf %64 : vector<8x384xf32>
    %66 = math.exp %65 : vector<8x384xf32>
    %cst_32 = arith.constant 1.000000e+00 : f32
    %67 = vector.broadcast %cst_32 : f32 to vector<8x384xf32>
    %68 = arith.addf %67, %66 : vector<8x384xf32>
    %69 = arith.divf %67, %68 : vector<8x384xf32>
    %70 = vector.extract_strided_slice %69 {offsets = [0, 0], sizes = [8, 128], strides = [1, 1]} : vector<8x384xf32> to vector<8x128xf32>
    %71 = vector.extract_strided_slice %69 {offsets = [0, 128], sizes = [8, 128], strides = [1, 1]} : vector<8x384xf32> to vector<8x128xf32>
    %72 = vector.extract_strided_slice %69 {offsets = [0, 256], sizes = [8, 128], strides = [1, 1]} : vector<8x384xf32> to vector<8x128xf32>
    %73 = vector.extract_strided_slice %63 {offsets = [0, 384], sizes = [8, 128], strides = [1, 1]} : vector<8x512xf32> to vector<8x128xf32>
    %74 = math.tanh %73 : vector<8x128xf32>
    %75 = arith.mulf %71, %55 : vector<8x128xf32>
    %76 = arith.mulf %70, %74 : vector<8x128xf32>
    %77 = arith.addf %75, %76 : vector<8x128xf32>
    %78 = math.tanh %77 : vector<8x128xf32>
    %79 = arith.mulf %72, %78 : vector<8x128xf32>
    %c3_i32 = arith.constant 3 : i32
    %80 = arith.index_cast %c3_i32 : i32 to index
    %c0_33 = arith.constant 0 : index
    %c0_34 = arith.constant 0 : index
    %81 = vector.load %arg9[%80, %c0_33, %c0_34] : memref<8x8x512xf32, #tpu.memory_space<vmem>>, vector<1x8x512xf32>
    %82 = vector.shape_cast %81 : vector<1x8x512xf32> to vector<8x512xf32>
    %c0_35 = arith.constant 0 : index
    %c0_36 = arith.constant 0 : index
    %83 = vector.load %arg4[%c0_35, %c0_36] : memref<128x512xf32, #tpu.memory_space<vmem>>, vector<128x512xf32>
    %cst_37 = arith.constant dense<0.000000e+00> : vector<8x512xf32>
    %84 = tpu.matmul %79, %83, %cst_37 {dimension_numbers = #tpu.dot_dimension_numbers<[1], [0], [0], [1], [0, 0, 1, 1], [], []>} : vector<8x128xf32>, vector<128x512xf32>, vector<8x512xf32> -> vector<8x512xf32>
    %85 = arith.addf %82, %84 : vector<8x512xf32>
    %86 = vector.extract_strided_slice %85 {offsets = [0, 0], sizes = [8, 384], strides = [1, 1]} : vector<8x512xf32> to vector<8x384xf32>
    %87 = arith.negf %86 : vector<8x384xf32>
    %88 = math.exp %87 : vector<8x384xf32>
    %cst_38 = arith.constant 1.000000e+00 : f32
    %89 = vector.broadcast %cst_38 : f32 to vector<8x384xf32>
    %90 = arith.addf %89, %88 : vector<8x384xf32>
    %91 = arith.divf %89, %90 : vector<8x384xf32>
    %92 = vector.extract_strided_slice %91 {offsets = [0, 0], sizes = [8, 128], strides = [1, 1]} : vector<8x384xf32> to vector<8x128xf32>
    %93 = vector.extract_strided_slice %91 {offsets = [0, 128], sizes = [8, 128], strides = [1, 1]} : vector<8x384xf32> to vector<8x128xf32>
    %94 = vector.extract_strided_slice %91 {offsets = [0, 256], sizes = [8, 128], strides = [1, 1]} : vector<8x384xf32> to vector<8x128xf32>
    %95 = vector.extract_strided_slice %85 {offsets = [0, 384], sizes = [8, 128], strides = [1, 1]} : vector<8x512xf32> to vector<8x128xf32>
    %96 = math.tanh %95 : vector<8x128xf32>
    %97 = arith.mulf %93, %77 : vector<8x128xf32>
    %98 = arith.mulf %92, %96 : vector<8x128xf32>
    %99 = arith.addf %97, %98 : vector<8x128xf32>
    %100 = math.tanh %99 : vector<8x128xf32>
    %101 = arith.mulf %94, %100 : vector<8x128xf32>
    %c4_i32 = arith.constant 4 : i32
    %102 = arith.index_cast %c4_i32 : i32 to index
    %c0_39 = arith.constant 0 : index
    %c0_40 = arith.constant 0 : index
    %103 = vector.load %arg9[%102, %c0_39, %c0_40] : memref<8x8x512xf32, #tpu.memory_space<vmem>>, vector<1x8x512xf32>
    %104 = vector.shape_cast %103 : vector<1x8x512xf32> to vector<8x512xf32>
    %c0_41 = arith.constant 0 : index
    %c0_42 = arith.constant 0 : index
    %105 = vector.load %arg4[%c0_41, %c0_42] : memref<128x512xf32, #tpu.memory_space<vmem>>, vector<128x512xf32>
    %cst_43 = arith.constant dense<0.000000e+00> : vector<8x512xf32>
    %106 = tpu.matmul %101, %105, %cst_43 {dimension_numbers = #tpu.dot_dimension_numbers<[1], [0], [0], [1], [0, 0, 1, 1], [], []>} : vector<8x128xf32>, vector<128x512xf32>, vector<8x512xf32> -> vector<8x512xf32>
    %107 = arith.addf %104, %106 : vector<8x512xf32>
    %108 = vector.extract_strided_slice %107 {offsets = [0, 0], sizes = [8, 384], strides = [1, 1]} : vector<8x512xf32> to vector<8x384xf32>
    %109 = arith.negf %108 : vector<8x384xf32>
    %110 = math.exp %109 : vector<8x384xf32>
    %cst_44 = arith.constant 1.000000e+00 : f32
    %111 = vector.broadcast %cst_44 : f32 to vector<8x384xf32>
    %112 = arith.addf %111, %110 : vector<8x384xf32>
    %113 = arith.divf %111, %112 : vector<8x384xf32>
    %114 = vector.extract_strided_slice %113 {offsets = [0, 0], sizes = [8, 128], strides = [1, 1]} : vector<8x384xf32> to vector<8x128xf32>
    %115 = vector.extract_strided_slice %113 {offsets = [0, 128], sizes = [8, 128], strides = [1, 1]} : vector<8x384xf32> to vector<8x128xf32>
    %116 = vector.extract_strided_slice %113 {offsets = [0, 256], sizes = [8, 128], strides = [1, 1]} : vector<8x384xf32> to vector<8x128xf32>
    %117 = vector.extract_strided_slice %107 {offsets = [0, 384], sizes = [8, 128], strides = [1, 1]} : vector<8x512xf32> to vector<8x128xf32>
    %118 = math.tanh %117 : vector<8x128xf32>
    %119 = arith.mulf %115, %99 : vector<8x128xf32>
    %120 = arith.mulf %114, %118 : vector<8x128xf32>
    %121 = arith.addf %119, %120 : vector<8x128xf32>
    %122 = math.tanh %121 : vector<8x128xf32>
    %123 = arith.mulf %116, %122 : vector<8x128xf32>
    %c5_i32 = arith.constant 5 : i32
    %124 = arith.index_cast %c5_i32 : i32 to index
    %c0_45 = arith.constant 0 : index
    %c0_46 = arith.constant 0 : index
    %125 = vector.load %arg9[%124, %c0_45, %c0_46] : memref<8x8x512xf32, #tpu.memory_space<vmem>>, vector<1x8x512xf32>
    %126 = vector.shape_cast %125 : vector<1x8x512xf32> to vector<8x512xf32>
    %c0_47 = arith.constant 0 : index
    %c0_48 = arith.constant 0 : index
    %127 = vector.load %arg4[%c0_47, %c0_48] : memref<128x512xf32, #tpu.memory_space<vmem>>, vector<128x512xf32>
    %cst_49 = arith.constant dense<0.000000e+00> : vector<8x512xf32>
    %128 = tpu.matmul %123, %127, %cst_49 {dimension_numbers = #tpu.dot_dimension_numbers<[1], [0], [0], [1], [0, 0, 1, 1], [], []>} : vector<8x128xf32>, vector<128x512xf32>, vector<8x512xf32> -> vector<8x512xf32>
    %129 = arith.addf %126, %128 : vector<8x512xf32>
    %130 = vector.extract_strided_slice %129 {offsets = [0, 0], sizes = [8, 384], strides = [1, 1]} : vector<8x512xf32> to vector<8x384xf32>
    %131 = arith.negf %130 : vector<8x384xf32>
    %132 = math.exp %131 : vector<8x384xf32>
    %cst_50 = arith.constant 1.000000e+00 : f32
    %133 = vector.broadcast %cst_50 : f32 to vector<8x384xf32>
    %134 = arith.addf %133, %132 : vector<8x384xf32>
    %135 = arith.divf %133, %134 : vector<8x384xf32>
    %136 = vector.extract_strided_slice %135 {offsets = [0, 0], sizes = [8, 128], strides = [1, 1]} : vector<8x384xf32> to vector<8x128xf32>
    %137 = vector.extract_strided_slice %135 {offsets = [0, 128], sizes = [8, 128], strides = [1, 1]} : vector<8x384xf32> to vector<8x128xf32>
    %138 = vector.extract_strided_slice %135 {offsets = [0, 256], sizes = [8, 128], strides = [1, 1]} : vector<8x384xf32> to vector<8x128xf32>
    %139 = vector.extract_strided_slice %129 {offsets = [0, 384], sizes = [8, 128], strides = [1, 1]} : vector<8x512xf32> to vector<8x128xf32>
    %140 = math.tanh %139 : vector<8x128xf32>
    %141 = arith.mulf %137, %121 : vector<8x128xf32>
    %142 = arith.mulf %136, %140 : vector<8x128xf32>
    %143 = arith.addf %141, %142 : vector<8x128xf32>
    %144 = math.tanh %143 : vector<8x128xf32>
    %145 = arith.mulf %138, %144 : vector<8x128xf32>
    %c6_i32 = arith.constant 6 : i32
    %146 = arith.index_cast %c6_i32 : i32 to index
    %c0_51 = arith.constant 0 : index
    %c0_52 = arith.constant 0 : index
    %147 = vector.load %arg9[%146, %c0_51, %c0_52] : memref<8x8x512xf32, #tpu.memory_space<vmem>>, vector<1x8x512xf32>
    %148 = vector.shape_cast %147 : vector<1x8x512xf32> to vector<8x512xf32>
    %c0_53 = arith.constant 0 : index
    %c0_54 = arith.constant 0 : index
    %149 = vector.load %arg4[%c0_53, %c0_54] : memref<128x512xf32, #tpu.memory_space<vmem>>, vector<128x512xf32>
    %cst_55 = arith.constant dense<0.000000e+00> : vector<8x512xf32>
    %150 = tpu.matmul %145, %149, %cst_55 {dimension_numbers = #tpu.dot_dimension_numbers<[1], [0], [0], [1], [0, 0, 1, 1], [], []>} : vector<8x128xf32>, vector<128x512xf32>, vector<8x512xf32> -> vector<8x512xf32>
    %151 = arith.addf %148, %150 : vector<8x512xf32>
    %152 = vector.extract_strided_slice %151 {offsets = [0, 0], sizes = [8, 384], strides = [1, 1]} : vector<8x512xf32> to vector<8x384xf32>
    %153 = arith.negf %152 : vector<8x384xf32>
    %154 = math.exp %153 : vector<8x384xf32>
    %cst_56 = arith.constant 1.000000e+00 : f32
    %155 = vector.broadcast %cst_56 : f32 to vector<8x384xf32>
    %156 = arith.addf %155, %154 : vector<8x384xf32>
    %157 = arith.divf %155, %156 : vector<8x384xf32>
    %158 = vector.extract_strided_slice %157 {offsets = [0, 0], sizes = [8, 128], strides = [1, 1]} : vector<8x384xf32> to vector<8x128xf32>
    %159 = vector.extract_strided_slice %157 {offsets = [0, 128], sizes = [8, 128], strides = [1, 1]} : vector<8x384xf32> to vector<8x128xf32>
    %160 = vector.extract_strided_slice %157 {offsets = [0, 256], sizes = [8, 128], strides = [1, 1]} : vector<8x384xf32> to vector<8x128xf32>
    %161 = vector.extract_strided_slice %151 {offsets = [0, 384], sizes = [8, 128], strides = [1, 1]} : vector<8x512xf32> to vector<8x128xf32>
    %162 = math.tanh %161 : vector<8x128xf32>
    %163 = arith.mulf %159, %143 : vector<8x128xf32>
    %164 = arith.mulf %158, %162 : vector<8x128xf32>
    %165 = arith.addf %163, %164 : vector<8x128xf32>
    %166 = math.tanh %165 : vector<8x128xf32>
    %167 = arith.mulf %160, %166 : vector<8x128xf32>
    %c7_i32 = arith.constant 7 : i32
    %168 = arith.index_cast %c7_i32 : i32 to index
    %c0_57 = arith.constant 0 : index
    %c0_58 = arith.constant 0 : index
    %169 = vector.load %arg9[%168, %c0_57, %c0_58] : memref<8x8x512xf32, #tpu.memory_space<vmem>>, vector<1x8x512xf32>
    %170 = vector.shape_cast %169 : vector<1x8x512xf32> to vector<8x512xf32>
    %c0_59 = arith.constant 0 : index
    %c0_60 = arith.constant 0 : index
    %171 = vector.load %arg4[%c0_59, %c0_60] : memref<128x512xf32, #tpu.memory_space<vmem>>, vector<128x512xf32>
    %cst_61 = arith.constant dense<0.000000e+00> : vector<8x512xf32>
    %172 = tpu.matmul %167, %171, %cst_61 {dimension_numbers = #tpu.dot_dimension_numbers<[1], [0], [0], [1], [0, 0, 1, 1], [], []>} : vector<8x128xf32>, vector<128x512xf32>, vector<8x512xf32> -> vector<8x512xf32>
    %173 = arith.addf %170, %172 : vector<8x512xf32>
    %174 = vector.extract_strided_slice %173 {offsets = [0, 0], sizes = [8, 384], strides = [1, 1]} : vector<8x512xf32> to vector<8x384xf32>
    %175 = arith.negf %174 : vector<8x384xf32>
    %176 = math.exp %175 : vector<8x384xf32>
    %cst_62 = arith.constant 1.000000e+00 : f32
    %177 = vector.broadcast %cst_62 : f32 to vector<8x384xf32>
    %178 = arith.addf %177, %176 : vector<8x384xf32>
    %179 = arith.divf %177, %178 : vector<8x384xf32>
    %180 = vector.extract_strided_slice %179 {offsets = [0, 0], sizes = [8, 128], strides = [1, 1]} : vector<8x384xf32> to vector<8x128xf32>
    %181 = vector.extract_strided_slice %179 {offsets = [0, 128], sizes = [8, 128], strides = [1, 1]} : vector<8x384xf32> to vector<8x128xf32>
    %182 = vector.extract_strided_slice %179 {offsets = [0, 256], sizes = [8, 128], strides = [1, 1]} : vector<8x384xf32> to vector<8x128xf32>
    %183 = vector.extract_strided_slice %173 {offsets = [0, 384], sizes = [8, 128], strides = [1, 1]} : vector<8x512xf32> to vector<8x128xf32>
    %184 = math.tanh %183 : vector<8x128xf32>
    %185 = arith.mulf %181, %165 : vector<8x128xf32>
    %186 = arith.mulf %180, %184 : vector<8x128xf32>
    %187 = arith.addf %185, %186 : vector<8x128xf32>
    %188 = math.tanh %187 : vector<8x128xf32>
    %189 = arith.mulf %182, %188 : vector<8x128xf32>
    %c8_i32 = arith.constant 8 : i32
    %c0_63 = arith.constant 0 : index
    %c0_64 = arith.constant 0 : index
    %190 = vector.load %arg10[%c0_63, %c0_64] : memref<8x128xf32, #tpu.memory_space<vmem>>, vector<8x128xf32>
    tpu.vector_store %arg10[%c0_63, %c0_64], %189 {strides = array<i32>} : memref<8x128xf32, #tpu.memory_space<vmem>>, vector<8x128xf32>,
    %c0_65 = arith.constant 0 : index
    %c0_66 = arith.constant 0 : index
    %191 = vector.load %arg11[%c0_65, %c0_66] : memref<8x128xf32, #tpu.memory_space<vmem>>, vector<8x128xf32>
    tpu.vector_store %arg11[%c0_65, %c0_66], %187 {strides = array<i32>} : memref<8x128xf32, #tpu.memory_space<vmem>>, vector<8x128xf32>,
    %c0_i32_67 = arith.constant 0 : i32
    %192 = arith.cmpi eq, %arg1, %c0_i32_67 : i32
    %193 = arith.extui %192 : i1 to i32
    %c0_i32_68 = arith.constant 0 : i32
    %194 = arith.cmpi ne, %193, %c0_i32_68 : i32
    scf.if %194 {
      %c0_69 = arith.constant 0 : index
      %c0_70 = arith.constant 0 : index
      %195 = vector.load %arg6[%c0_69, %c0_70] : memref<128x128xf32, #tpu.memory_space<vmem>>, vector<128x128xf32>
      %cst_71 = arith.constant dense<0.000000e+00> : vector<8x128xf32>
      %196 = tpu.matmul %189, %195, %cst_71 {dimension_numbers = #tpu.dot_dimension_numbers<[1], [0], [0], [1], [0, 0, 1, 1], [], []>} : vector<8x128xf32>, vector<128x128xf32>, vector<8x128xf32> -> vector<8x128xf32>
      %c0_72 = arith.constant 0 : index
      %c0_73 = arith.constant 0 : index
      %197 = vector.load %arg7[%c0_72, %c0_73] : memref<1x128xf32, #tpu.memory_space<vmem>>, vector<1x128xf32>
      %198 = vector.broadcast %197 : vector<1x128xf32> to vector<8x128xf32>
      %199 = arith.addf %196, %198 : vector<8x128xf32>
      %c0_74 = arith.constant 0 : index
      %c0_75 = arith.constant 0 : index
      %200 = vector.load %arg8[%c0_74, %c0_75] : memref<8x128xf32, #tpu.memory_space<vmem>>, vector<8x128xf32>
      tpu.vector_store %arg8[%c0_74, %c0_75], %199 {strides = array<i32>} : memref<8x128xf32, #tpu.memory_space<vmem>>, vector<8x128xf32>,
    } else {
    }
    return
  }
  func.func @transform_0(%arg0: i32, %arg1: i32) -> (i32, i32, i32) {
    %c0_i32 = arith.constant 0 : i32
    %c0_i32_0 = arith.constant 0 : i32
    return %arg1, %arg0, %c0_i32 : i32, i32, i32
  }
  func.func @transform_1(%arg0: i32, %arg1: i32) -> (i32, i32) {
    %c0_i32 = arith.constant 0 : i32
    %c0_i32_0 = arith.constant 0 : i32
    %c0_i32_1 = arith.constant 0 : i32
    return %c0_i32, %c0_i32_0 : i32, i32
  }
  func.func @transform_2(%arg0: i32, %arg1: i32) -> (i32, i32) {
    %c0_i32 = arith.constant 0 : i32
    %c0_i32_0 = arith.constant 0 : i32
    %c0_i32_1 = arith.constant 0 : i32
    return %c0_i32, %c0_i32_0 : i32, i32
  }
  func.func @transform_3(%arg0: i32, %arg1: i32) -> (i32, i32) {
    %c0_i32 = arith.constant 0 : i32
    %c0_i32_0 = arith.constant 0 : i32
    %c0_i32_1 = arith.constant 0 : i32
    return %c0_i32, %c0_i32_0 : i32, i32
  }
  func.func @transform_4(%arg0: i32, %arg1: i32) -> (i32, i32) {
    %c0_i32 = arith.constant 0 : i32
    %c0_i32_0 = arith.constant 0 : i32
    %c0_i32_1 = arith.constant 0 : i32
    return %c0_i32, %c0_i32_0 : i32, i32
  }
  func.func @transform_5(%arg0: i32, %arg1: i32) -> (i32, i32) {
    %c0_i32 = arith.constant 0 : i32
    %c0_i32_0 = arith.constant 0 : i32
    %c0_i32_1 = arith.constant 0 : i32
    return %c0_i32, %c0_i32_0 : i32, i32
  }
  func.func @transform_6(%arg0: i32, %arg1: i32) -> (i32, i32) {
    %c0_i32 = arith.constant 0 : i32
    %c0_i32_0 = arith.constant 0 : i32
    return %arg0, %c0_i32 : i32, i32
  }
}

</mosaic_0001>

<bundles_post_ra>
// kernel: tpu_custom_call.1
= control target key start
LH: loop header
LB: loop body
LE: loop exit
PB: predicated region body
PF: predicated region fallthrough
CT: control target
= control target key end

     0   :  { %11 = vsyncpa [#allocation6], 0  ;;  %s3572_s0 = inlined_call_operand.hbm [shape: f32[8,8,128], index: 0, kind: input, shape index: {}]   ;;  %s3573_s1 = inlined_call_operand.hbm [shape: f32[128,512], index: 1, kind: input, shape index: {}]   ;;  %s3574_s2 = inlined_call_operand.hbm [shape: f32[128,512], index: 2, kind: input, shape index: {}]   ;;  %s3575_s3 = inlined_call_operand.vmem [shape: f32[1,512], index: 3, kind: input, shape index: {}]   ;;  %s3576_s4 = inlined_call_operand.hbm [shape: f32[128,128], index: 4, kind: input, shape index: {}]   ;;  %s3577_s5 = inlined_call_operand.vmem [shape: f32[1,128], index: 5, kind: input, shape index: {}]   ;;  %s3578_s6 = inlined_call_operand.hbm [shape: f32[8,128], index: 6, kind: output, shape index: {}]  }
   0x1   :  { %12 = vsyncpa [#allocation9], 0 }
   0x2   :  { %13 = vsyncpa [#allocation12], 0 }
   0x3   :  { %14 = vsyncpa [#allocation7], 0  ;;  %s3017_s21 = smov [#allocation8]   ;;  %s2899_s25 = scalar_lea.hbm %s3573_s1, 8192 }
   0x4   :  { %s32_s22 = sshll.u32 %s3017_s21, 4  ;;  %p2900_p0 = scmp.ne.s32.totalorder %s3573_s1, %s2899_s25  ;;  %s33_s22 = int_to_ptr.vmem [resolvable:$true] %s32_s22 }
   0x5   :  { %p2903_p1 = scmp.lt.u32.totalorder %s2899_s25, %s3573_s1 }
   0x7   :  { %p2905_p2 = pnand %p2903_p1, %p2900_p0 }
   0x9   :  { %2908 = shalt.err (!%p2905_p2)
}
   0xa   :  { %s2909_s30 = scalar_lea.vmem %s33_s22, 8192  ;;  %p2914_p4 = scmp.lt.s32.totalorder %s33_s22, %s33_s22 }
   0xb   :  { %p2910_p3 = scmp.ne.s32.totalorder %s33_s22, %s2909_s30  ;;  %p2915_p5 = scmp.lt.s32.totalorder %s2909_s30, %s2909_s30 }
   0xd   :  { %p2916_p6 = por %p2915_p5, %p2914_p4 }
   0xf   :  { %p2917_p7 = pnand %p2916_p6, %p2910_p3 }
  0x11   :  { %2920 = shalt.err (!%p2917_p7)
}
  0x12   :  { %s3018_s7 = smov 512   ;;  %s3019_s8 = smov 32  }
  0x13   :  { %38 = dma.hbm_to_vmem [thread:$0]  %s3573_s1, 8192, %s33_s22, [#allocation9], %s3018_s7, %s3018_s7, %s3019_s8  }
  0x14   :  { %s3020_s11 = smov [#allocation5]   ;;  %s2921_s15 = scalar_lea.hbm %s3572_s0, 1024 }
  0x15   :  { %s20_s12 = sshll.u32 %s3020_s11, 4  ;;  %p2922_p8 = scmp.ne.s32.totalorder %s3572_s0, %s2921_s15  ;;  %s21_s12 = int_to_ptr.vmem [resolvable:$true] %s20_s12 }
  0x16   :  { %p2925_p9 = scmp.lt.u32.totalorder %s2921_s15, %s3572_s0 }
  0x18   :  { %p2927_p10 = pnand %p2925_p9, %p2922_p8 }
  0x1a   :  { %2930 = shalt.err (!%p2927_p10)
}
  0x1b   :  { %s2931_s20 = scalar_lea.vmem %s21_s12, 1024  ;;  %p2936_p12 = scmp.lt.s32.totalorder %s21_s12, %s21_s12 }
  0x1c   :  { %p2932_p11 = scmp.ne.s32.totalorder %s21_s12, %s2931_s20  ;;  %p2937_p13 = scmp.lt.s32.totalorder %s2931_s20, %s2931_s20 }
  0x1e   :  { %p2938_p0 = por %p2937_p13, %p2936_p12 }
  0x20   :  { %p2939_p1 = pnand %p2938_p0, %p2932_p11 }
  0x22   :  { %2942 = shalt.err (!%p2939_p1)
}
  0x23   :  { %s3021_s1 = smov 128   ;;  %s3022_s21 = smov 8  }
  0x24   :  { %26 = dma.hbm_to_vmem [thread:$0]  %s3572_s0, 1024, %s21_s12, [#allocation6], %s3021_s1, %s3021_s1, %s3022_s21  }
  0x25   :  { %s3023_s24 = smov [#allocation10]   ;;  %s3024_s26 = smov [#allocation11]  }
  0x26   :  { %s44_s25 = sshll.u32 %s3023_s24, 4  ;;  %s58_s27 = sshll.u32 %s3024_s26, 4  ;;  %s45_s25 = int_to_ptr.vmem [resolvable:$true] %s44_s25  ;;  %s3094_s27 = int_to_ptr.vmem [resolvable:$true] %s58_s27 }
  0x27   :  { %s2943_s30 = scalar_lea.hbm %s3574_s2, 8192 }
  0x28   :  { %p2944_p2 = scmp.ne.s32.totalorder %s3574_s2, %s2943_s30  ;;  %p2947_p3 = scmp.lt.u32.totalorder %s2943_s30, %s3574_s2 }
  0x2a   :  { %p2949_p4 = pnand %p2947_p3, %p2944_p2 }
  0x2c   :  { %2952 = shalt.err (!%p2949_p4)
}
  0x2d   :  { %s2953_s0 = scalar_lea.vmem %s45_s25, 8192  ;;  %p2958_p6 = scmp.lt.s32.totalorder %s45_s25, %s45_s25 }
  0x2e   :  { %p2954_p5 = scmp.ne.s32.totalorder %s45_s25, %s2953_s0  ;;  %p2959_p7 = scmp.lt.s32.totalorder %s2953_s0, %s2953_s0 }
  0x30   :  { %p2960_p8 = por %p2959_p7, %p2958_p6 }
  0x32   :  { %p2961_p9 = pnand %p2960_p8, %p2954_p5 }
  0x34   :  { %2964 = shalt.err (!%p2961_p9)
}
  0x35   :  { %50 = dma.hbm_to_vmem [thread:$0]  %s3574_s2, 8192, %s45_s25, [#allocation9], %s3018_s7, %s3018_s7, %s3019_s8  }
  0x36   :  { %s2965_s17 = scalar_lea.hbm %s3576_s4, 2048 }
  0x37   :  { %p2966_p10 = scmp.ne.s32.totalorder %s3576_s4, %s2965_s17  ;;  %p2969_p11 = scmp.lt.u32.totalorder %s2965_s17, %s3576_s4 }
  0x39   :  { %p2971_p12 = pnand %p2969_p11, %p2966_p10 }
  0x3b   :  { %2974 = shalt.err (!%p2971_p12)
}
  0x3c   :  { %s2975_s23 = scalar_lea.vmem %s3094_s27, 2048  ;;  %p2980_p0 = scmp.lt.s32.totalorder %s3094_s27, %s3094_s27 }
  0x3d   :  { %p2976_p13 = scmp.ne.s32.totalorder %s3094_s27, %s2975_s23  ;;  %p2981_p1 = scmp.lt.s32.totalorder %s2975_s23, %s2975_s23 }
  0x3f   :  { %p2982_p2 = por %p2981_p1, %p2980_p0 }
  0x41   :  { %p2983_p3 = pnand %p2982_p2, %p2976_p13 }
  0x43   :  { %2986 = shalt.err (!%p2983_p3)
}
  0x44   :  { %64 = dma.hbm_to_vmem [thread:$0]  %s3576_s4, 2048, %s3094_s27, [#allocation12], %s3021_s1, %s3021_s1, %s3022_s21  }
  0x45   :  { %3009 = dma.done.wait [#allocation6], 1024  }
  0x46   :  { %3010 = vsyncadd [#allocation6], 4294966272 }
  0x47   :  { %3011 = dma.done.wait [#allocation9], 16384  }
  0x48   :  { %3012 = vsyncadd [#allocation9], 4294950912 }
  0x49   :  { %3013 = dma.done.wait [#allocation12], 2048  }
  0x4a   :  { %3014 = vsyncadd [#allocation12], 4294965248  ;;  %v3025_v0 = vmov 0.0   ;;  %v94_v1 = vld [vmem:[#allocation8 + $0x8] sm:$0xff]  ;;  %v96_v3 = vld [vmem:[#allocation8 + $0x18] sm:$0xff]  ;;  %vm3027_vm0 = vmmov 0  }
  0x4b   :  { %243 = vmatprep.mubr.f32.mxu0 %v3025_v0  ;;  %356 = vmatprep.mubr.f32.mxu1 %v3025_v0  ;;  %v98_v2 = vld [vmem:[#allocation8 + $0x28] sm:$0xff]  ;;  %v100_v5 = vld [vmem:[#allocation8 + $0x38] sm:$0xff]  ;;  %v93_v6 = vld [vmem:[#allocation8] sm:$0xff]  ;;  %s3028_s21 = smov [#allocation13]  }
  0x4c   :  { %v2095_v4 = vpack.c.bf16 %v98_v2, %v94_v1  ;;  %v97_v7 = vld [vmem:[#allocation8 + $0x20] sm:$0xff]  ;;  %v2127_v8 = vpack.c.bf16 %v100_v5, %v96_v3  ;;  %v95_v10 = vld [vmem:[#allocation8 + $0x10] sm:$0xff]  ;;  %v102_v12 = vld [vmem:[#allocation8 + $0x48] sm:$0xff]  ;;  %s2007_s24 = sshll.u32 %s3028_s21, 4  ;;  %s2008_s24 = int_to_ptr.vmem [resolvable:$true] %s2007_s24 }
  0x4d   :  { %v2097_v9 = vpack.c.bf16 %v97_v7, %v93_v6  ;;  %v99_v11 = vld [vmem:[#allocation8 + $0x30] sm:$0xff]  ;;  %v106_v14 = vld [vmem:[#allocation8 + $0x68] sm:$0xff]  ;;  %v104_v15 = vld [vmem:[#allocation8 + $0x58] sm:$0xff]  ;;  %s2987_s25 = scalar_lea.vmem %s2008_s24, 128  ;;  %p2992_p5 = scmp.lt.s32.totalorder %s2008_s24, %s2008_s24 }
  0x4e   :  { %2096 = vmatprep.subr.bf16.mxu0 %v2095_v4  ;;  %v2129_v13 = vpack.c.bf16 %v99_v11, %v95_v10  ;;  %v108_v16 = vld [vmem:[#allocation8 + $0x78] sm:$0xff]  ;;  %2128 = vmatprep.subr.bf16.mxu1 %v2127_v8  ;;  %v2099_v17 = vpack.c.bf16 %v106_v14, %v102_v12  ;;  %v101_v19 = vld [vmem:[#allocation8 + $0x40] sm:$0xff]  ;;  %v103_v21 = vld [vmem:[#allocation8 + $0x50] sm:$0xff]  ;;  %p2988_p4 = scmp.ne.s32.totalorder %s2008_s24, %s2987_s25  ;;  %p2993_p6 = scmp.lt.s32.totalorder %s2987_s25, %s2987_s25 }
  0x4f   :  { %2098 = vmatpush1.bf16.msra.mxu0 %v2097_v9  ;;  %v2131_v18 = vpack.c.bf16 %v108_v16, %v104_v15  ;;  %v105_v20 = vld [vmem:[#allocation8 + $0x60] sm:$0xff]  ;;  %v107_v23 = vld [vmem:[#allocation8 + $0x70] sm:$0xff]  ;;  %v110_v24 = vld [vmem:[#allocation8 + $0x88] sm:$0xff] }
  0x50   :  { %2130 = vmatpush1.bf16.msra.mxu1 %v2129_v13  ;;  %v2101_v22 = vpack.c.bf16 %v105_v20, %v101_v19  ;;  %v114_v25 = vld [vmem:[#allocation8 + $0xa8] sm:$0xff]  ;;  %2100 = vmatprep.subr.bf16.mxu0 %v2099_v17  ;;  %v2133_v26 = vpack.c.bf16 %v107_v23, %v103_v21  ;;  %v112_v28 = vld [vmem:[#allocation8 + $0x98] sm:$0xff]  ;;  %v109_v30 = vld [vmem:[#allocation8 + $0x80] sm:$0xff]  ;;  %p2994_p7 = por %p2993_p6, %p2992_p5 }
  0x51   :  { %2132 = vmatprep.subr.bf16.mxu1 %v2131_v18  ;;  %v2103_v27 = vpack.c.bf16 %v114_v25, %v110_v24  ;;  %v116_v29 = vld [vmem:[#allocation8 + $0xb8] sm:$0xff]  ;;  %v113_v32 = vld [vmem:[#allocation8 + $0xa0] sm:$0xff]  ;;  %v111_v33 = vld [vmem:[#allocation8 + $0x90] sm:$0xff] }
  0x52   :  { %v2135_v31 = vpack.c.bf16 %v116_v29, %v112_v28  ;;  %v115_v34 = vld [vmem:[#allocation8 + $0xb0] sm:$0xff]  ;;  %v2105_v35 = vpack.c.bf16 %v113_v32, %v109_v30  ;;  %v118_v36 = vld [vmem:[#allocation8 + $0xc8] sm:$0xff]  ;;  %v120_v38 = vld [vmem:[#allocation8 + $0xd8] sm:$0xff]  ;;  %p2995_p8 = pnand %p2994_p7, %p2988_p4 }
  0x53   :  { %2102 = vmatpush1.bf16.msra.mxu0 %v2101_v22  ;;  %v122_v37 = vld [vmem:[#allocation8 + $0xe8] sm:$0xff]  ;;  %v2137_v39 = vpack.c.bf16 %v115_v34, %v111_v33  ;;  %v124_v41 = vld [vmem:[#allocation8 + $0xf8] sm:$0xff]  ;;  %v117_v42 = vld [vmem:[#allocation8 + $0xc0] sm:$0xff] }
  0x54   :  { %2134 = vmatpush1.bf16.msra.mxu1 %v2133_v26  ;;  %2104 = vmatprep.subr.bf16.mxu0 %v2103_v27  ;;  %v2107_v40 = vpack.c.bf16 %v122_v37, %v118_v36  ;;  %v121_v43 = vld [vmem:[#allocation8 + $0xe0] sm:$0xff]  ;;  %v2139_v44 = vpack.c.bf16 %v124_v41, %v120_v38  ;;  %v119_v45 = vld [vmem:[#allocation8 + $0xd0] sm:$0xff]  ;;  %v126_v47 = vld [vmem:[#allocation8 + $0x108] sm:$0xff] }
  0x55   :  { %2136 = vmatprep.subr.bf16.mxu1 %v2135_v31  ;;  %v123_v46 = vld [vmem:[#allocation8 + $0xf0] sm:$0xff]  ;;  %v130_v48 = vld [vmem:[#allocation8 + $0x128] sm:$0xff]  ;;  %v128_v49 = vld [vmem:[#allocation8 + $0x118] sm:$0xff]  ;;  %v2109_v51 = vpack.c.bf16 %v121_v43, %v117_v42 }
  0x56   :  { %v132_v50 = vld [vmem:[#allocation8 + $0x138] sm:$0xff]  ;;  %v2141_v52 = vpack.c.bf16 %v123_v46, %v119_v45  ;;  %v2111_v53 = vpack.c.bf16 %v130_v48, %v126_v47  ;;  %v125_v54 = vld [vmem:[#allocation8 + $0x100] sm:$0xff]  ;;  %v127_v56 = vld [vmem:[#allocation8 + $0x110] sm:$0xff] }
  0x57   :  { %2106 = vmatpush1.bf16.msra.mxu0 %v2105_v35  ;;  %v129_v55 = vld [vmem:[#allocation8 + $0x120] sm:$0xff]  ;;  %v2143_v57 = vpack.c.bf16 %v132_v50, %v128_v49  ;;  %v131_v58 = vld [vmem:[#allocation8 + $0x130] sm:$0xff]  ;;  %v134_v59 = vld [vmem:[#allocation8 + $0x148] sm:$0xff] }
  0x58   :  { %2138 = vmatpush1.bf16.msra.mxu1 %v2137_v39  ;;  %2108 = vmatprep.subr.bf16.mxu0 %v2107_v40  ;;  %v138_v60 = vld [vmem:[#allocation8 + $0x168] sm:$0xff]  ;;  %v136_v61 = vld [vmem:[#allocation8 + $0x158] sm:$0xff]  ;;  %v2113_v63 = vpack.c.bf16 %v129_v55, %v125_v54  ;;  %v2145_v1 = vpack.c.bf16 %v131_v58, %v127_v56  ;;  %v133_v3 = vld [vmem:[#allocation8 + $0x140] sm:$0xff] }
  0x59   :  { %2140 = vmatprep.subr.bf16.mxu1 %v2139_v44  ;;  %v140_v62 = vld [vmem:[#allocation8 + $0x178] sm:$0xff]  ;;  %v2115_v2 = vpack.c.bf16 %v138_v60, %v134_v59  ;;  %v137_v4 = vld [vmem:[#allocation8 + $0x160] sm:$0xff]  ;;  %v135_v5 = vld [vmem:[#allocation8 + $0x150] sm:$0xff] }
  0x5a   :  { %v2147_v6 = vpack.c.bf16 %v140_v62, %v136_v61  ;;  %v139_v7 = vld [vmem:[#allocation8 + $0x170] sm:$0xff]  ;;  %v142_v8 = vld [vmem:[#allocation8 + $0x188] sm:$0xff]  ;;  %v144_v10 = vld [vmem:[#allocation8 + $0x198] sm:$0xff]  ;;  %v2117_v12 = vpack.c.bf16 %v137_v4, %v133_v3 }
  0x5b   :  { %2110 = vmatpush1.bf16.msra.mxu0 %v2109_v51  ;;  %v146_v9 = vld [vmem:[#allocation8 + $0x1a8] sm:$0xff]  ;;  %v148_v11 = vld [vmem:[#allocation8 + $0x1b8] sm:$0xff]  ;;  %v2149_v13 = vpack.c.bf16 %v139_v7, %v135_v5  ;;  %v141_v15 = vld [vmem:[#allocation8 + $0x180] sm:$0xff] }
  0x5c   :  { %2142 = vmatpush1.bf16.msra.mxu1 %v2141_v52  ;;  %2112 = vmatprep.subr.bf16.mxu0 %v2111_v53  ;;  %v2119_v14 = vpack.c.bf16 %v146_v9, %v142_v8  ;;  %v145_v16 = vld [vmem:[#allocation8 + $0x1a0] sm:$0xff]  ;;  %v143_v17 = vld [vmem:[#allocation8 + $0x190] sm:$0xff]  ;;  %v2151_v18 = vpack.c.bf16 %v148_v11, %v144_v10  ;;  %v150_v20 = vld [vmem:[#allocation8 + $0x1c8] sm:$0xff] }
  0x5d   :  { %2144 = vmatprep.subr.bf16.mxu1 %v2143_v57  ;;  %v147_v19 = vld [vmem:[#allocation8 + $0x1b0] sm:$0xff]  ;;  %v154_v21 = vld [vmem:[#allocation8 + $0x1e8] sm:$0xff]  ;;  %v152_v22 = vld [vmem:[#allocation8 + $0x1d8] sm:$0xff]  ;;  %v2121_v24 = vpack.c.bf16 %v145_v16, %v141_v15 }
  0x5e   :  { %v156_v23 = vld [vmem:[#allocation8 + $0x1f8] sm:$0xff]  ;;  %v2153_v25 = vpack.c.bf16 %v147_v19, %v143_v17  ;;  %v2123_v26 = vpack.c.bf16 %v154_v21, %v150_v20  ;;  %v149_v27 = vld [vmem:[#allocation8 + $0x1c0] sm:$0xff]  ;;  %v151_v29 = vld [vmem:[#allocation8 + $0x1d0] sm:$0xff] }
  0x5f   :  { %2114 = vmatpush1.bf16.msra.mxu0 %v2113_v63  ;;  %v153_v28 = vld [vmem:[#allocation8 + $0x1e0] sm:$0xff]  ;;  %v2155_v30 = vpack.c.bf16 %v156_v23, %v152_v22  ;;  %v155_v31 = vld [vmem:[#allocation8 + $0x1f0] sm:$0xff]  ;;  %v444_v32 = vld [vmem:[#allocation10 + $0x8] sm:$0xff] }
  0x60   :  { %2146 = vmatpush1.bf16.msra.mxu1 %v2145_v1  ;;  %2116 = vmatprep.subr.bf16.mxu0 %v2115_v2  ;;  %v448_v33 = vld [vmem:[#allocation10 + $0x28] sm:$0xff]  ;;  %v446_v34 = vld [vmem:[#allocation10 + $0x18] sm:$0xff]  ;;  %v2125_v36 = vpack.c.bf16 %v153_v28, %v149_v27  ;;  %v2157_v37 = vpack.c.bf16 %v155_v31, %v151_v29  ;;  %v443_v39 = vld [vmem:[#allocation10] sm:$0xff] }
  0x61   :  { %2148 = vmatprep.subr.bf16.mxu1 %v2147_v6  ;;  %v450_v35 = vld [vmem:[#allocation10 + $0x38] sm:$0xff]  ;;  %v3133_v38 = vpack.c.bf16 %v448_v33, %v444_v32  ;;  %v447_v40 = vld [vmem:[#allocation10 + $0x20] sm:$0xff]  ;;  %v445_v42 = vld [vmem:[#allocation10 + $0x10] sm:$0xff] }
  0x62   :  { %v3135_v41 = vpack.c.bf16 %v450_v35, %v446_v34  ;;  %v449_v43 = vld [vmem:[#allocation10 + $0x30] sm:$0xff]  ;;  %v452_v44 = vld [vmem:[#allocation10 + $0x48] sm:$0xff]  ;;  %v85_v46 = vld [vmem:[#allocation5] sm:$0xff]  ;;  %v3137_v47 = vpack.c.bf16 %v447_v40, %v443_v39 }
  0x63   :  { %2118 = vmatpush1.bf16.msra.mxu0 %v2117_v12  ;;  %v456_v45 = vld [vmem:[#allocation10 + $0x68] sm:$0xff]  ;;  %v454_v48 = vld [vmem:[#allocation10 + $0x58] sm:$0xff]  ;;  %v3140_v50 = vpack.c.bf16 %v449_v43, %v445_v42  ;;  %v451_v51 = vld [vmem:[#allocation10 + $0x40] sm:$0xff] }
  0x64   :  { %2150 = vmatpush1.bf16.msra.mxu1 %v2149_v13  ;;  %2120 = vmatprep.subr.bf16.mxu0 %v2119_v14  ;;  %v458_v49 = vld [vmem:[#allocation10 + $0x78] sm:$0xff]  ;;  %v455_v52 = vld [vmem:[#allocation10 + $0x60] sm:$0xff]  ;;  %v3143_v53 = vpack.c.bf16 %v456_v45, %v452_v44  ;;  %v453_v54 = vld [vmem:[#allocation10 + $0x50] sm:$0xff] }
  0x65   :  { %2152 = vmatprep.subr.bf16.mxu1 %v2151_v18  ;;  %v457_v55 = vld [vmem:[#allocation10 + $0x70] sm:$0xff]  ;;  %v3145_v56 = vpack.c.bf16 %v458_v49, %v454_v48  ;;  %v460_v57 = vld [vmem:[#allocation10 + $0x88] sm:$0xff]  ;;  %v3148_v60 = vpack.c.bf16 %v455_v52, %v451_v51  ;;  %v462_v61 = vld [vmem:[#allocation10 + $0x98] sm:$0xff] }
  0x66   :  { %v464_v58 = vld [vmem:[#allocation10 + $0xa8] sm:$0xff]  ;;  %v466_v62 = vld [vmem:[#allocation10 + $0xb8] sm:$0xff]  ;;  %v3152_v63 = vpack.c.bf16 %v457_v55, %v453_v54  ;;  %v459_v1 = vld [vmem:[#allocation10 + $0x80] sm:$0xff] }
  0x67   :  { %2122 = vmatpush1.bf16.msra.mxu0 %v2121_v24  ;;  %v86_v59 = vld [vmem:[#allocation5 + $0x8] sm:$0xff]  ;;  %v463_v2 = vld [vmem:[#allocation10 + $0xa0] sm:$0xff]  ;;  %v3156_v3 = vpack.c.bf16 %v464_v58, %v460_v57  ;;  %v461_v4 = vld [vmem:[#allocation10 + $0x90] sm:$0xff]  ;;  %v3159_v6 = vpack.c.bf16 %v466_v62, %v462_v61 }
  0x68   :  { %2154 = vmatpush1.bf16.msra.mxu1 %v2153_v25  ;;  %2124 = vmatprep.subr.bf16.mxu0 %v2123_v26  ;;  %v465_v5 = vld [vmem:[#allocation10 + $0xb0] sm:$0xff]  ;;  %v468_v7 = vld [vmem:[#allocation10 + $0xc8] sm:$0xff]  ;;  %v3162_v10 = vpack.c.bf16 %v463_v2, %v459_v1  ;;  %v470_v11 = vld [vmem:[#allocation10 + $0xd8] sm:$0xff] }
  0x69   :  { %2156 = vmatprep.subr.bf16.mxu1 %v2155_v30  ;;  %v472_v8 = vld [vmem:[#allocation10 + $0xe8] sm:$0xff]  ;;  %v87_v9 = vld [vmem:[#allocation5 + $0x10] sm:$0xff]  ;;  %v474_v12 = vld [vmem:[#allocation10 + $0xf8] sm:$0xff]  ;;  %v3166_v13 = vpack.c.bf16 %v465_v5, %v461_v4 }
  0x6a   :  { %v467_v14 = vld [vmem:[#allocation10 + $0xc0] sm:$0xff]  ;;  %v3170_v16 = vpack.c.bf16 %v472_v8, %v468_v7  ;;  %v469_v17 = vld [vmem:[#allocation10 + $0xd0] sm:$0xff]  ;;  %v3173_v19 = vpack.c.bf16 %v474_v12, %v470_v11  ;;  %v476_v20 = vld [vmem:[#allocation10 + $0x108] sm:$0xff] }
  0x6b   :  { %2126 = vmatpush1.bf16.msra.mxu0 %v2125_v36  ;;  %v471_v15 = vld [vmem:[#allocation10 + $0xe0] sm:$0xff]  ;;  %v473_v18 = vld [vmem:[#allocation10 + $0xf0] sm:$0xff]  ;;  %v480_v21 = vld [vmem:[#allocation10 + $0x128] sm:$0xff] }
  0x6c   :  { %2158 = vmatpush1.bf16.msra.mxu1 %v2157_v37  ;;  %2160 = vmatprep.subr.bf16.mxu0 %v3133_v38  ;;  %v88_v22 = vld [vmem:[#allocation5 + $0x18] sm:$0xff]  ;;  %v3176_v23 = vpack.c.bf16 %v471_v15, %v467_v14  ;;  %v3180_v26 = vpack.c.bf16 %v473_v18, %v469_v17  ;;  %v475_v27 = vld [vmem:[#allocation10 + $0x100] sm:$0xff]  ;;  %v3184_v29 = vpack.c.bf16 %v480_v21, %v476_v20  ;;  %v477_v30 = vld [vmem:[#allocation10 + $0x110] sm:$0xff] }
  0x6d   :  { %2192 = vmatprep.subr.bf16.mxu1 %v3135_v41  ;;  %v478_v24 = vld [vmem:[#allocation10 + $0x118] sm:$0xff]  ;;  %v479_v28 = vld [vmem:[#allocation10 + $0x120] sm:$0xff]  ;;  %v481_v31 = vld [vmem:[#allocation10 + $0x130] sm:$0xff] }
  0x6e   :  { %244 = vmatmul.mubr.f32.vlgmr.msra.gmra.mrb[0].mxu0 %v85_v46  ;;  %v482_v25 = vld [vmem:[#allocation10 + $0x138] sm:$0xff]  ;;  %v484_v33 = vld [vmem:[#allocation10 + $0x148] sm:$0xff]  ;;  %v89_v35 = vld [vmem:[#allocation5 + $0x20] sm:$0xff]  ;;  %v3190_v36 = vpack.c.bf16 %v479_v28, %v475_v27  ;;  %v3194_v40 = vpack.c.bf16 %v481_v31, %v477_v30  ;;  %v159_v28 = vlaneseq }
  0x6f   :  { %357 = vmatmul.mubr.f32.vlgmr.msra.gmra.mrb[0].mxu1 %v85_v46  ;;  %2162 = vmatpush1.bf16.msra.mxu0 %v3137_v47  ;;  %v3187_v32 = vpack.c.bf16 %v482_v25, %v478_v24  ;;  %v488_v34 = vld [vmem:[#allocation10 + $0x168] sm:$0xff]  ;;  %v486_v37 = vld [vmem:[#allocation10 + $0x158] sm:$0xff]  ;;  %v483_v42 = vld [vmem:[#allocation10 + $0x140] sm:$0xff] }
  0x70   :  { %2194 = vmatpush1.bf16.msra.mxu1 %v3140_v50  ;;  %249 = vmatprep.mubr.f32.mxu0 %v3025_v0  ;;  %v490_v39 = vld [vmem:[#allocation10 + $0x178] sm:$0xff]  ;;  %v487_v43 = vld [vmem:[#allocation10 + $0x160] sm:$0xff]  ;;  %v3198_v44 = vpack.c.bf16 %v488_v34, %v484_v33  ;;  %v485_v45 = vld [vmem:[#allocation10 + $0x150] sm:$0xff]  ;;  %v160_v30 = vshrl.u32 %v159_v28, 7 }
  0x71   :  { %362 = vmatprep.mubr.f32.mxu1 %v3025_v0  ;;  %2164 = vmatprep.subr.bf16.mxu0 %v3143_v53  ;;  %v489_v46 = vld [vmem:[#allocation10 + $0x170] sm:$0xff]  ;;  %v3201_v48 = vpack.c.bf16 %v490_v39, %v486_v37  ;;  %v492_v49 = vld [vmem:[#allocation10 + $0x188] sm:$0xff]  ;;  %v3204_v54 = vpack.c.bf16 %v487_v43, %v483_v42  ;;  %v494_v55 = vld [vmem:[#allocation10 + $0x198] sm:$0xff] }
  0x72   :  { %250 = vmatmul.mubr.f32.gmra.mrb[2].mxu0 %v86_v59  ;;  %2196 = vmatprep.subr.bf16.mxu1 %v3145_v56  ;;  %v496_v51 = vld [vmem:[#allocation10 + $0x1a8] sm:$0xff]  ;;  %v498_v57 = vld [vmem:[#allocation10 + $0x1b8] sm:$0xff]  ;;  %v3208_v58 = vpack.c.bf16 %v489_v46, %v485_v45  ;;  %v495_v61 = vld [vmem:[#allocation10 + $0x1a0] sm:$0xff]  ;;  %v161_v31 = vsub.s32 0, %v160_v30  ;;  %v165_v34 = vsub.s32 1, %v160_v30  ;;  %v169_v42 = vsub.s32 2, %v160_v30 }
  0x73   :  { %363 = vmatmul.mubr.f32.gmra.mrb[2].mxu1 %v86_v59  ;;  %2166 = vmatpush1.bf16.msra.mxu0 %v3148_v60  ;;  %v90_v52 = vld [vmem:[#allocation5 + $0x28] sm:$0xff]  ;;  %v491_v59 = vld [vmem:[#allocation10 + $0x180] sm:$0xff]  ;;  %v3212_v62 = vpack.c.bf16 %v496_v51, %v492_v49  ;;  %v493_v1 = vld [vmem:[#allocation10 + $0x190] sm:$0xff]  ;;  %v3215_v4 = vpack.c.bf16 %v498_v57, %v494_v55 }
  0x74   :  { %2198 = vmatpush1.bf16.msra.mxu1 %v3152_v63  ;;  %255 = vmatprep.mubr.f32.mxu0 %v3025_v0  ;;  %v497_v2 = vld [vmem:[#allocation10 + $0x1b0] sm:$0xff]  ;;  %v500_v5 = vld [vmem:[#allocation10 + $0x1c8] sm:$0xff]  ;;  %v502_v11 = vld [vmem:[#allocation10 + $0x1d8] sm:$0xff] }
  0x75   :  { %368 = vmatprep.mubr.f32.mxu1 %v3025_v0  ;;  %2168 = vmatprep.subr.bf16.mxu0 %v3156_v3  ;;  %v504_v7 = vld [vmem:[#allocation10 + $0x1e8] sm:$0xff]  ;;  %v91_v8 = vld [vmem:[#allocation5 + $0x30] sm:$0xff]  ;;  %v506_v12 = vld [vmem:[#allocation10 + $0x1f8] sm:$0xff]  ;;  %v3222_v14 = vpack.c.bf16 %v497_v2, %v493_v1 }
  0x76   :  { %256 = vmatmul.mubr.f32.gmra.mrb[4].mxu0 %v87_v9  ;;  %2200 = vmatprep.subr.bf16.mxu1 %v3159_v6  ;;  %v499_v15 = vld [vmem:[#allocation10 + $0x1c0] sm:$0xff]  ;;  %v3226_v18 = vpack.c.bf16 %v504_v7, %v500_v5  ;;  %v501_v20 = vld [vmem:[#allocation10 + $0x1d0] sm:$0xff]  ;;  %v92_v24 = vld [vmem:[#allocation5 + $0x38] sm:$0xff] }
  0x77   :  { %369 = vmatmul.mubr.f32.gmra.mrb[4].mxu1 %v87_v9  ;;  %2170 = vmatpush1.bf16.msra.mxu0 %v3162_v10  ;;  %v3218_v9 = vpack.c.bf16 %v495_v61, %v491_v59  ;;  %v503_v17 = vld [vmem:[#allocation10 + $0x1e0] sm:$0xff]  ;;  %v505_v21 = vld [vmem:[#allocation10 + $0x1f0] sm:$0xff]  ;;  %v173_v59 = vsub.s32 3, %v160_v30 }
  0x78   :  { %2202 = vmatpush1.bf16.msra.mxu1 %v3166_v13  ;;  %261 = vmatprep.mubr.f32.mxu0 %v3025_v0  ;;  %v3232_v25 = vpack.c.bf16 %v503_v17, %v499_v15  ;;  %v3236_v27 = vpack.c.bf16 %v505_v21, %v501_v20  ;;  %v157_v33 = vld [vmem:[%s3575_s3] sm:$0xf] }
  0x79   :  { %374 = vmatprep.mubr.f32.mxu1 %v3025_v0  ;;  %2172 = vmatprep.subr.bf16.mxu0 %v3170_v16  ;;  %v3288_v37 = vrot.slane %v157_v33, %v165_v34  ;;  %v3292_v55 = vrot.slane %v157_v33, %v169_v42  ;;  %v3295_v1 = vrot.slane %v157_v33, %v173_v59 }
  0x7a   :  { %262 = vmatmul.mubr.f32.gmra.mrb[6].mxu0 %v88_v22  ;;  %2204 = vmatprep.subr.bf16.mxu1 %v3173_v19 }
  0x7b   :  { %375 = vmatmul.mubr.f32.gmra.mrb[6].mxu1 %v88_v22  ;;  %2174 = vmatpush1.bf16.msra.mxu0 %v3176_v23  ;;  %v3229_v22 = vpack.c.bf16 %v506_v12, %v502_v11 }
  0x7c   :  { %2206 = vmatpush1.bf16.msra.mxu1 %v3180_v26  ;;  %267 = vmatprep.mubr.f32.mxu0 %v3025_v0 }
  0x7d   :  { %380 = vmatprep.mubr.f32.mxu1 %v3025_v0  ;;  %2176 = vmatprep.subr.bf16.mxu0 %v3184_v29 }
  0x7e   :  { %268 = vmatmul.mubr.f32.gmra.mrb[8].mxu0 %v89_v35  ;;  %2208 = vmatprep.subr.bf16.mxu1 %v3187_v32 }
  0x7f   :  { %381 = vmatmul.mubr.f32.gmra.mrb[8].mxu1 %v89_v35  ;;  %2178 = vmatpush1.bf16.msra.mxu0 %v3190_v36  ;;  %v3286_v35 = vrot.slane %v157_v33, %v161_v31 }
  0x80   :  { %2210 = vmatpush1.bf16.msra.mxu1 %v3194_v40  ;;  %273 = vmatprep.mubr.f32.mxu0 %v3025_v0 }
  0x81   :  { %386 = vmatprep.mubr.f32.mxu1 %v3025_v0  ;;  %2180 = vmatprep.subr.bf16.mxu0 %v3198_v44 }
  0x82   :  { %274 = vmatmul.mubr.f32.gmra.mrb[10].mxu0 %v90_v52  ;;  %2212 = vmatprep.subr.bf16.mxu1 %v3201_v48 }
  0x83   :  { %387 = vmatmul.mubr.f32.gmra.mrb[10].mxu1 %v90_v52  ;;  %2182 = vmatpush1.bf16.msra.mxu0 %v3204_v54 }
  0x84   :  { %2214 = vmatpush1.bf16.msra.mxu1 %v3208_v58  ;;  %279 = vmatprep.mubr.f32.mxu0 %v3025_v0 }
  0x85   :  { %392 = vmatprep.mubr.f32.mxu1 %v3025_v0  ;;  %2184 = vmatprep.subr.bf16.mxu0 %v3212_v62 }
  0x86   :  { %280 = vmatmul.mubr.f32.gmra.mrb[12].mxu0 %v91_v8  ;;  %2216 = vmatprep.subr.bf16.mxu1 %v3215_v4 }
  0x87   :  { %393 = vmatmul.mubr.f32.gmra.mrb[12].mxu1 %v91_v8  ;;  %2186 = vmatpush1.bf16.msra.mxu0 %v3218_v9 }
  0x88   :  { %2218 = vmatpush1.bf16.msra.mxu1 %v3222_v14  ;;  %285 = vmatprep.mubr.f32.mxu0 %v3025_v0 }
  0x89   :  { %398 = vmatprep.mubr.f32.mxu1 %v3025_v0  ;;  %2188 = vmatprep.subr.bf16.mxu0 %v3226_v18 }
  0x8a   :  { %286 = vmatmul.mubr.f32.gmra.mrb[14].mxu0 %v92_v24  ;;  %2220 = vmatprep.subr.bf16.mxu1 %v3229_v22 }
  0x8b   :  { %399 = vmatmul.mubr.f32.gmra.mrb[14].mxu1 %v92_v24  ;;  %2190 = vmatpush1.bf16.msra.mxu0 %v3232_v25 }
  0x8c   :  { %2222 = vmatpush1.bf16.msra.mxu1 %v3236_v27  ;;  %571 = vmatprep.mubr.f32.mxu0 %v3025_v0 }
  0x8d   :  { %642 = vmatprep.mubr.f32.mxu1 %v3025_v0  ;;  %2224 = vmatprep.subr.bf16.mxu0 %v3133_v38 }
  0x8e   :  { %572 = vmatmul.mubr.f32.vlgmr.msra.gmra.mrb[0].mxu0 %v3025_v0  ;;  %2256 = vmatprep.subr.bf16.mxu1 %v3135_v41 }
  0x8f   :  { %643 = vmatmul.mubr.f32.vlgmr.msra.gmra.mrb[0].mxu1 %v3025_v0  ;;  %2226 = vmatpush1.bf16.msra.mxu0 %v3137_v47 }
  0x90   :  { %2258 = vmatpush1.bf16.msra.mxu1 %v3140_v50  ;;  %2228 = vmatprep.subr.bf16.mxu0 %v3143_v53 }
  0x91   :  { %2260 = vmatprep.subr.bf16.mxu1 %v3145_v56  ;;  %746 = vmatprep.mubr.f32.mxu0 %v3025_v0 }
  0x92   :  { %817 = vmatprep.mubr.f32.mxu1 %v3025_v0 }
  0x93   :  { %2230 = vmatpush1.bf16.msra.mxu0 %v3148_v60 }
  0x94   :  { %2262 = vmatpush1.bf16.msra.mxu1 %v3152_v63  ;;  %2232 = vmatprep.subr.bf16.mxu0 %v3156_v3 }
  0x95   :  { %2264 = vmatprep.subr.bf16.mxu1 %v3159_v6 }
  0x97   :  { %2234 = vmatpush1.bf16.msra.mxu0 %v3162_v10 }
  0x98   :  { %2266 = vmatpush1.bf16.msra.mxu1 %v3166_v13  ;;  %2236 = vmatprep.subr.bf16.mxu0 %v3170_v16 }
  0x99   :  { %2268 = vmatprep.subr.bf16.mxu1 %v3173_v19 }
  0x9b   :  { %2238 = vmatpush1.bf16.msra.mxu0 %v3176_v23 }
  0x9c   :  { %2270 = vmatpush1.bf16.msra.mxu1 %v3180_v26  ;;  %2240 = vmatprep.subr.bf16.mxu0 %v3184_v29 }
  0x9d   :  { %2272 = vmatprep.subr.bf16.mxu1 %v3187_v32 }
  0x9f   :  { %2242 = vmatpush1.bf16.msra.mxu0 %v3190_v36 }
  0xa0   :  { %2274 = vmatpush1.bf16.msra.mxu1 %v3194_v40  ;;  %2244 = vmatprep.subr.bf16.mxu0 %v3198_v44 }
  0xa1   :  { %2276 = vmatprep.subr.bf16.mxu1 %v3201_v48 }
  0xa3   :  { %2246 = vmatpush1.bf16.msra.mxu0 %v3204_v54 }
  0xa4   :  { %2278 = vmatpush1.bf16.msra.mxu1 %v3208_v58  ;;  %2248 = vmatprep.subr.bf16.mxu0 %v3212_v62 }
  0xa5   :  { %2280 = vmatprep.subr.bf16.mxu1 %v3215_v4 }
  0xa7   :  { %2250 = vmatpush1.bf16.msra.mxu0 %v3218_v9 }
  0xa8   :  { %2282 = vmatpush1.bf16.msra.mxu1 %v3222_v14  ;;  %2252 = vmatprep.subr.bf16.mxu0 %v3226_v18 }
  0xa9   :  { %2284 = vmatprep.subr.bf16.mxu1 %v3229_v22 }
  0xab   :  { %2254 = vmatpush1.bf16.msra.mxu0 %v3232_v25 }
  0xac   :  { %2286 = vmatpush1.bf16.msra.mxu1 %v3236_v27  ;;  %2288 = vmatprep.subr.bf16.mxu0 %v3133_v38 }
  0xad   :  { %2320 = vmatprep.subr.bf16.mxu1 %v3135_v41 }
 0x161   :  { %v573_v39 = vpop.f32.mrb[0].mxu0 }
 0x162   :  { %v2695_v43 = vadd.f32 %v573_v39, %v3286_v35  ;;  %v644_v45 = vpop.f32.mrb[0].mxu1  ;;  %v575_v46 = vpop.f32.mrb[1].mxu0 }
 0x163   :  { %v2696_v49 = vadd.f32 %v575_v46, %v3288_v37  ;;  %v646_v51 = vpop.f32.mrb[1].mxu1  ;;  %v2711_v61 = vadd.f32 %v644_v45, %v3292_v55 }
 0x164   :  { %v2018_v52 = vmul.f32 -1.442695, %v2695_v43  ;;  %v2712_v5 = vadd.f32 %v646_v51, %v3295_v1 }
 0x165   :  { %v2019_v57 = vmul.f32 -1.442695, %v2696_v49  ;;  %v2020_v2 = vmul.f32 -1.442695, %v2711_v61 }
 0x166   :  { %2771 = vpow2.f32 %v2018_v52 }
 0x167   :  { %2773 = vpow2.f32 %v2019_v57 }
 0x168   :  { %2775 = vpow2.f32 %v2020_v2 }
 0x169   :  { %2777 = vtanh.f32 %v2712_v5 }
 0x170   :  { %v2772_v7 = vpop.eup %2771 }
 0x171   :  { %v662_v8 = vadd.f32 1.0, %v2772_v7  ;;  %v2774_v11 = vpop.eup %2773 }
 0x172   :  { %v663_v12 = vadd.f32 1.0, %v2774_v11  ;;  %v2776_v15 = vpop.eup %2775 }
 0x173   :  { %2779 = vrcp.f32 %v662_v8  ;;  %v2778_v17 = vpop.eup %2777  ;;  %v664_v28 = vadd.f32 1.0, %v2776_v15 }
 0x174   :  { %2781 = vrcp.f32 %v663_v12 }
 0x175   :  { %2783 = vrcp.f32 %v664_v28 }
 0x17d   :  { %v2780_v20 = vpop.eup %2779 }
 0x17e   :  { %v673_v21 = vmul.f32 %v2780_v20, %v2778_v17  ;;  %v2782_v24 = vpop.eup %2781 }
 0x17f   :  { %v672_v30 = vmul.f32 0.0, %v2782_v24  ;;  %v2784_v33 = vpop.eup %2783 }
 0x181   :  { %v3298_v31 = vadd.f32 %v673_v21, %v672_v30 }
 0x183   :  { %2785 = vtanh.f32 %v3298_v31 }
 0x18d   :  { %v2786_v34 = vpop.eup %2785 }
 0x18e   :  { %v676_v39 = vmul.f32 %v2786_v34, %v2784_v33 }
 0x190   :  { %747 = vmatmul.mubr.f32.vlgmr.msra.gmra.mrb[2].mxu0 %v676_v39  ;;  %818 = vmatmul.mubr.f32.vlgmr.msra.gmra.mrb[2].mxu1 %v676_v39 }
 0x191   :  { %2290 = vmatpush1.bf16.msra.mxu0 %v3137_v47  ;;  %2322 = vmatpush1.bf16.msra.mxu1 %v3140_v50 }
 0x192   :  { %2292 = vmatprep.subr.bf16.mxu0 %v3143_v53  ;;  %2324 = vmatprep.subr.bf16.mxu1 %v3145_v56 }
 0x193   :  { %921 = vmatprep.mubr.f32.mxu0 %v3025_v0  ;;  %992 = vmatprep.mubr.f32.mxu1 %v3025_v0 }
 0x195   :  { %2294 = vmatpush1.bf16.msra.mxu0 %v3148_v60  ;;  %2326 = vmatpush1.bf16.msra.mxu1 %v3152_v63 }
 0x196   :  { %2296 = vmatprep.subr.bf16.mxu0 %v3156_v3  ;;  %2328 = vmatprep.subr.bf16.mxu1 %v3159_v6 }
 0x199   :  { %2298 = vmatpush1.bf16.msra.mxu0 %v3162_v10  ;;  %2330 = vmatpush1.bf16.msra.mxu1 %v3166_v13 }
 0x19a   :  { %2300 = vmatprep.subr.bf16.mxu0 %v3170_v16  ;;  %2332 = vmatprep.subr.bf16.mxu1 %v3173_v19 }
 0x19d   :  { %2302 = vmatpush1.bf16.msra.mxu0 %v3176_v23  ;;  %2334 = vmatpush1.bf16.msra.mxu1 %v3180_v26 }
 0x19e   :  { %2304 = vmatprep.subr.bf16.mxu0 %v3184_v29  ;;  %2336 = vmatprep.subr.bf16.mxu1 %v3187_v32 }
 0x1a1   :  { %2306 = vmatpush1.bf16.msra.mxu0 %v3190_v36  ;;  %2338 = vmatpush1.bf16.msra.mxu1 %v3194_v40 }
 0x1a2   :  { %2308 = vmatprep.subr.bf16.mxu0 %v3198_v44  ;;  %2340 = vmatprep.subr.bf16.mxu1 %v3201_v48 }
 0x1a5   :  { %2310 = vmatpush1.bf16.msra.mxu0 %v3204_v54  ;;  %2342 = vmatpush1.bf16.msra.mxu1 %v3208_v58 }
 0x1a6   :  { %2312 = vmatprep.subr.bf16.mxu0 %v3212_v62  ;;  %2344 = vmatprep.subr.bf16.mxu1 %v3215_v4 }
 0x1a9   :  { %2314 = vmatpush1.bf16.msra.mxu0 %v3218_v9  ;;  %2346 = vmatpush1.bf16.msra.mxu1 %v3222_v14 }
 0x1aa   :  { %2316 = vmatprep.subr.bf16.mxu0 %v3226_v18  ;;  %2348 = vmatprep.subr.bf16.mxu1 %v3229_v22 }
 0x1ad   :  { %2318 = vmatpush1.bf16.msra.mxu0 %v3232_v25  ;;  %2350 = vmatpush1.bf16.msra.mxu1 %v3236_v27 }
 0x1ae   :  { %2352 = vmatprep.subr.bf16.mxu0 %v3133_v38  ;;  %2384 = vmatprep.subr.bf16.mxu1 %v3135_v41 }
 0x263   :  { %v748_v42 = vpop.f32.mrb[2].mxu0  ;;  %v819_v43 = vpop.f32.mrb[2].mxu1 }
 0x264   :  { %v2697_v45 = vadd.f32 %v748_v42, %v3286_v35  ;;  %v750_v46 = vpop.f32.mrb[3].mxu0  ;;  %v821_v49 = vpop.f32.mrb[3].mxu1  ;;  %v2713_v59 = vadd.f32 %v819_v43, %v3292_v55 }
 0x265   :  { %v2698_v51 = vadd.f32 %v750_v46, %v3288_v37  ;;  %v2714_v61 = vadd.f32 %v821_v49, %v3295_v1 }
 0x266   :  { %v2021_v52 = vmul.f32 -1.442695, %v2697_v45  ;;  %v2023_v2 = vmul.f32 -1.442695, %v2713_v59 }
 0x267   :  { %v2022_v57 = vmul.f32 -1.442695, %v2698_v51 }
 0x268   :  { %2787 = vpow2.f32 %v2021_v52 }
 0x269   :  { %2789 = vpow2.f32 %v2022_v57 }
 0x26a   :  { %2791 = vtanh.f32 %v2714_v61 }
 0x26b   :  { %2793 = vpow2.f32 %v2023_v2 }
 0x272   :  { %v2788_v5 = vpop.eup %2787 }
 0x273   :  { %v837_v7 = vadd.f32 1.0, %v2788_v5  ;;  %v2790_v8 = vpop.eup %2789 }
 0x274   :  { %v838_v11 = vadd.f32 1.0, %v2790_v8  ;;  %v2792_v12 = vpop.eup %2791 }
 0x275   :  { %2795 = vrcp.f32 %v837_v7  ;;  %v2794_v15 = vpop.eup %2793 }
 0x276   :  { %2797 = vrcp.f32 %v838_v11  ;;  %v839_v24 = vadd.f32 1.0, %v2794_v15 }
 0x278   :  { %2799 = vrcp.f32 %v839_v24 }
 0x27f   :  { %v2796_v17 = vpop.eup %2795 }
 0x280   :  { %v848_v20 = vmul.f32 %v2796_v17, %v2792_v12  ;;  %v2798_v21 = vpop.eup %2797 }
 0x281   :  { %v847_v28 = vmul.f32 %v2798_v21, %v3298_v31 }
 0x282   :  { %v2800_v33 = vpop.eup %2799 }
 0x283   :  { %v3340_v30 = vadd.f32 %v848_v20, %v847_v28 }
 0x285   :  { %2801 = vtanh.f32 %v3340_v30 }
 0x28f   :  { %v2802_v34 = vpop.eup %2801 }
 0x290   :  { %v851_v39 = vmul.f32 %v2802_v34, %v2800_v33 }
 0x292   :  { %922 = vmatmul.mubr.f32.vlgmr.msra.gmra.mrb[4].mxu0 %v851_v39  ;;  %993 = vmatmul.mubr.f32.vlgmr.msra.gmra.mrb[4].mxu1 %v851_v39 }
 0x293   :  { %2354 = vmatpush1.bf16.msra.mxu0 %v3137_v47  ;;  %2386 = vmatpush1.bf16.msra.mxu1 %v3140_v50 }
 0x294   :  { %2356 = vmatprep.subr.bf16.mxu0 %v3143_v53  ;;  %2388 = vmatprep.subr.bf16.mxu1 %v3145_v56 }
 0x295   :  { %1096 = vmatprep.mubr.f32.mxu0 %v3025_v0  ;;  %1167 = vmatprep.mubr.f32.mxu1 %v3025_v0 }
 0x297   :  { %2358 = vmatpush1.bf16.msra.mxu0 %v3148_v60  ;;  %2390 = vmatpush1.bf16.msra.mxu1 %v3152_v63 }
 0x298   :  { %2360 = vmatprep.subr.bf16.mxu0 %v3156_v3  ;;  %2392 = vmatprep.subr.bf16.mxu1 %v3159_v6 }
 0x29b   :  { %2362 = vmatpush1.bf16.msra.mxu0 %v3162_v10  ;;  %2394 = vmatpush1.bf16.msra.mxu1 %v3166_v13 }
 0x29c   :  { %2364 = vmatprep.subr.bf16.mxu0 %v3170_v16  ;;  %2396 = vmatprep.subr.bf16.mxu1 %v3173_v19 }
 0x29f   :  { %2366 = vmatpush1.bf16.msra.mxu0 %v3176_v23  ;;  %2398 = vmatpush1.bf16.msra.mxu1 %v3180_v26 }
 0x2a0   :  { %2368 = vmatprep.subr.bf16.mxu0 %v3184_v29  ;;  %2400 = vmatprep.subr.bf16.mxu1 %v3187_v32 }
 0x2a3   :  { %2370 = vmatpush1.bf16.msra.mxu0 %v3190_v36  ;;  %2402 = vmatpush1.bf16.msra.mxu1 %v3194_v40 }
 0x2a4   :  { %2372 = vmatprep.subr.bf16.mxu0 %v3198_v44  ;;  %2404 = vmatprep.subr.bf16.mxu1 %v3201_v48 }
 0x2a7   :  { %2374 = vmatpush1.bf16.msra.mxu0 %v3204_v54  ;;  %2406 = vmatpush1.bf16.msra.mxu1 %v3208_v58 }
 0x2a8   :  { %2376 = vmatprep.subr.bf16.mxu0 %v3212_v62  ;;  %2408 = vmatprep.subr.bf16.mxu1 %v3215_v4 }
 0x2ab   :  { %2378 = vmatpush1.bf16.msra.mxu0 %v3218_v9  ;;  %2410 = vmatpush1.bf16.msra.mxu1 %v3222_v14 }
 0x2ac   :  { %2380 = vmatprep.subr.bf16.mxu0 %v3226_v18  ;;  %2412 = vmatprep.subr.bf16.mxu1 %v3229_v22 }
 0x2af   :  { %2382 = vmatpush1.bf16.msra.mxu0 %v3232_v25  ;;  %2414 = vmatpush1.bf16.msra.mxu1 %v3236_v27 }
 0x2b0   :  { %2416 = vmatprep.subr.bf16.mxu0 %v3133_v38  ;;  %2448 = vmatprep.subr.bf16.mxu1 %v3135_v41 }
 0x365   :  { %v923_v31 = vpop.f32.mrb[4].mxu0  ;;  %v994_v42 = vpop.f32.mrb[4].mxu1 }
 0x366   :  { %v2699_v43 = vadd.f32 %v923_v31, %v3286_v35  ;;  %v925_v45 = vpop.f32.mrb[5].mxu0  ;;  %v996_v46 = vpop.f32.mrb[5].mxu1  ;;  %v2715_v57 = vadd.f32 %v994_v42, %v3292_v55 }
 0x367   :  { %v2700_v49 = vadd.f32 %v925_v45, %v3288_v37  ;;  %v2716_v59 = vadd.f32 %v996_v46, %v3295_v1 }
 0x368   :  { %v2024_v51 = vmul.f32 -1.442695, %v2699_v43  ;;  %v2026_v61 = vmul.f32 -1.442695, %v2715_v57 }
 0x369   :  { %v2025_v52 = vmul.f32 -1.442695, %v2700_v49 }
 0x36a   :  { %2803 = vpow2.f32 %v2024_v51 }
 0x36b   :  { %2805 = vpow2.f32 %v2025_v52 }
 0x36c   :  { %2807 = vtanh.f32 %v2716_v59 }
 0x36d   :  { %2809 = vpow2.f32 %v2026_v61 }
 0x374   :  { %v2804_v2 = vpop.eup %2803 }
 0x375   :  { %v1012_v5 = vadd.f32 1.0, %v2804_v2  ;;  %v2806_v7 = vpop.eup %2805 }
 0x376   :  { %v1013_v8 = vadd.f32 1.0, %v2806_v7  ;;  %v2808_v11 = vpop.eup %2807 }
 0x377   :  { %2811 = vrcp.f32 %v1012_v5  ;;  %v2810_v12 = vpop.eup %2809 }
 0x378   :  { %2813 = vrcp.f32 %v1013_v8  ;;  %v1014_v21 = vadd.f32 1.0, %v2810_v12 }
 0x37a   :  { %2815 = vrcp.f32 %v1014_v21 }
 0x381   :  { %v2812_v15 = vpop.eup %2811 }
 0x382   :  { %v1023_v17 = vmul.f32 %v2812_v15, %v2808_v11  ;;  %v2814_v20 = vpop.eup %2813 }
 0x383   :  { %v1022_v24 = vmul.f32 %v2814_v20, %v3340_v30 }
 0x384   :  { %v2816_v33 = vpop.eup %2815 }
 0x385   :  { %v3382_v28 = vadd.f32 %v1023_v17, %v1022_v24 }
 0x387   :  { %2817 = vtanh.f32 %v3382_v28 }
 0x391   :  { %v2818_v34 = vpop.eup %2817 }
 0x392   :  { %v1026_v39 = vmul.f32 %v2818_v34, %v2816_v33 }
 0x394   :  { %1097 = vmatmul.mubr.f32.vlgmr.msra.gmra.mrb[6].mxu0 %v1026_v39  ;;  %1168 = vmatmul.mubr.f32.vlgmr.msra.gmra.mrb[6].mxu1 %v1026_v39 }
 0x395   :  { %2418 = vmatpush1.bf16.msra.mxu0 %v3137_v47  ;;  %2450 = vmatpush1.bf16.msra.mxu1 %v3140_v50 }
 0x396   :  { %2420 = vmatprep.subr.bf16.mxu0 %v3143_v53  ;;  %2452 = vmatprep.subr.bf16.mxu1 %v3145_v56 }
 0x397   :  { %1271 = vmatprep.mubr.f32.mxu0 %v3025_v0  ;;  %1342 = vmatprep.mubr.f32.mxu1 %v3025_v0 }
 0x399   :  { %2422 = vmatpush1.bf16.msra.mxu0 %v3148_v60  ;;  %2454 = vmatpush1.bf16.msra.mxu1 %v3152_v63 }
 0x39a   :  { %2424 = vmatprep.subr.bf16.mxu0 %v3156_v3  ;;  %2456 = vmatprep.subr.bf16.mxu1 %v3159_v6 }
 0x39d   :  { %2426 = vmatpush1.bf16.msra.mxu0 %v3162_v10  ;;  %2458 = vmatpush1.bf16.msra.mxu1 %v3166_v13 }
 0x39e   :  { %2428 = vmatprep.subr.bf16.mxu0 %v3170_v16  ;;  %2460 = vmatprep.subr.bf16.mxu1 %v3173_v19 }
 0x3a1   :  { %2430 = vmatpush1.bf16.msra.mxu0 %v3176_v23  ;;  %2462 = vmatpush1.bf16.msra.mxu1 %v3180_v26 }
 0x3a2   :  { %2432 = vmatprep.subr.bf16.mxu0 %v3184_v29  ;;  %2464 = vmatprep.subr.bf16.mxu1 %v3187_v32 }
 0x3a5   :  { %2434 = vmatpush1.bf16.msra.mxu0 %v3190_v36  ;;  %2466 = vmatpush1.bf16.msra.mxu1 %v3194_v40 }
 0x3a6   :  { %2436 = vmatprep.subr.bf16.mxu0 %v3198_v44  ;;  %2468 = vmatprep.subr.bf16.mxu1 %v3201_v48 }
 0x3a9   :  { %2438 = vmatpush1.bf16.msra.mxu0 %v3204_v54  ;;  %2470 = vmatpush1.bf16.msra.mxu1 %v3208_v58 }
 0x3aa   :  { %2440 = vmatprep.subr.bf16.mxu0 %v3212_v62  ;;  %2472 = vmatprep.subr.bf16.mxu1 %v3215_v4 }
 0x3ad   :  { %2442 = vmatpush1.bf16.msra.mxu0 %v3218_v9  ;;  %2474 = vmatpush1.bf16.msra.mxu1 %v3222_v14 }
 0x3ae   :  { %2444 = vmatprep.subr.bf16.mxu0 %v3226_v18  ;;  %2476 = vmatprep.subr.bf16.mxu1 %v3229_v22 }
 0x3b1   :  { %2446 = vmatpush1.bf16.msra.mxu0 %v3232_v25  ;;  %2478 = vmatpush1.bf16.msra.mxu1 %v3236_v27 }
 0x3b2   :  { %2480 = vmatprep.subr.bf16.mxu0 %v3133_v38  ;;  %2512 = vmatprep.subr.bf16.mxu1 %v3135_v41 }
 0x467   :  { %v1098_v30 = vpop.f32.mrb[6].mxu0  ;;  %v1169_v31 = vpop.f32.mrb[6].mxu1 }
 0x468   :  { %v2701_v42 = vadd.f32 %v1098_v30, %v3286_v35  ;;  %v1100_v43 = vpop.f32.mrb[7].mxu0  ;;  %v1171_v45 = vpop.f32.mrb[7].mxu1  ;;  %v2717_v52 = vadd.f32 %v1169_v31, %v3292_v55 }
 0x469   :  { %v2702_v46 = vadd.f32 %v1100_v43, %v3288_v37  ;;  %v2718_v57 = vadd.f32 %v1171_v45, %v3295_v1 }
 0x46a   :  { %v2027_v49 = vmul.f32 -1.442695, %v2701_v42  ;;  %v2029_v59 = vmul.f32 -1.442695, %v2717_v52 }
 0x46b   :  { %v2028_v51 = vmul.f32 -1.442695, %v2702_v46 }
 0x46c   :  { %2819 = vpow2.f32 %v2027_v49 }
 0x46d   :  { %2821 = vpow2.f32 %v2028_v51 }
 0x46e   :  { %2823 = vtanh.f32 %v2718_v57 }
 0x46f   :  { %2825 = vpow2.f32 %v2029_v59 }
 0x476   :  { %v2820_v61 = vpop.eup %2819 }
 0x477   :  { %v1187_v2 = vadd.f32 1.0, %v2820_v61  ;;  %v2822_v5 = vpop.eup %2821 }
 0x478   :  { %v1188_v7 = vadd.f32 1.0, %v2822_v5  ;;  %v2824_v8 = vpop.eup %2823 }
 0x479   :  { %2827 = vrcp.f32 %v1187_v2  ;;  %v2826_v11 = vpop.eup %2825 }
 0x47a   :  { %2829 = vrcp.f32 %v1188_v7  ;;  %v1189_v20 = vadd.f32 1.0, %v2826_v11 }
 0x47c   :  { %2831 = vrcp.f32 %v1189_v20 }
 0x483   :  { %v2828_v12 = vpop.eup %2827 }
 0x484   :  { %v1198_v15 = vmul.f32 %v2828_v12, %v2824_v8  ;;  %v2830_v17 = vpop.eup %2829 }
 0x485   :  { %v1197_v21 = vmul.f32 %v2830_v17, %v3382_v28 }
 0x486   :  { %v2832_v33 = vpop.eup %2831 }
 0x487   :  { %v3424_v24 = vadd.f32 %v1198_v15, %v1197_v21 }
 0x489   :  { %2833 = vtanh.f32 %v3424_v24 }
 0x493   :  { %v2834_v34 = vpop.eup %2833 }
 0x494   :  { %v1201_v39 = vmul.f32 %v2834_v34, %v2832_v33 }
 0x496   :  { %1272 = vmatmul.mubr.f32.vlgmr.msra.gmra.mrb[8].mxu0 %v1201_v39  ;;  %1343 = vmatmul.mubr.f32.vlgmr.msra.gmra.mrb[8].mxu1 %v1201_v39 }
 0x497   :  { %2482 = vmatpush1.bf16.msra.mxu0 %v3137_v47  ;;  %2514 = vmatpush1.bf16.msra.mxu1 %v3140_v50 }
 0x498   :  { %2484 = vmatprep.subr.bf16.mxu0 %v3143_v53  ;;  %2516 = vmatprep.subr.bf16.mxu1 %v3145_v56 }
 0x499   :  { %1446 = vmatprep.mubr.f32.mxu0 %v3025_v0  ;;  %1517 = vmatprep.mubr.f32.mxu1 %v3025_v0 }
 0x49b   :  { %2486 = vmatpush1.bf16.msra.mxu0 %v3148_v60  ;;  %2518 = vmatpush1.bf16.msra.mxu1 %v3152_v63 }
 0x49c   :  { %2488 = vmatprep.subr.bf16.mxu0 %v3156_v3  ;;  %2520 = vmatprep.subr.bf16.mxu1 %v3159_v6 }
 0x49f   :  { %2490 = vmatpush1.bf16.msra.mxu0 %v3162_v10  ;;  %2522 = vmatpush1.bf16.msra.mxu1 %v3166_v13 }
 0x4a0   :  { %2492 = vmatprep.subr.bf16.mxu0 %v3170_v16  ;;  %2524 = vmatprep.subr.bf16.mxu1 %v3173_v19 }
 0x4a3   :  { %2494 = vmatpush1.bf16.msra.mxu0 %v3176_v23  ;;  %2526 = vmatpush1.bf16.msra.mxu1 %v3180_v26 }
 0x4a4   :  { %2496 = vmatprep.subr.bf16.mxu0 %v3184_v29  ;;  %2528 = vmatprep.subr.bf16.mxu1 %v3187_v32 }
 0x4a7   :  { %2498 = vmatpush1.bf16.msra.mxu0 %v3190_v36  ;;  %2530 = vmatpush1.bf16.msra.mxu1 %v3194_v40 }
 0x4a8   :  { %2500 = vmatprep.subr.bf16.mxu0 %v3198_v44  ;;  %2532 = vmatprep.subr.bf16.mxu1 %v3201_v48 }
 0x4ab   :  { %2502 = vmatpush1.bf16.msra.mxu0 %v3204_v54  ;;  %2534 = vmatpush1.bf16.msra.mxu1 %v3208_v58 }
 0x4ac   :  { %2504 = vmatprep.subr.bf16.mxu0 %v3212_v62  ;;  %2536 = vmatprep.subr.bf16.mxu1 %v3215_v4 }
 0x4af   :  { %2506 = vmatpush1.bf16.msra.mxu0 %v3218_v9  ;;  %2538 = vmatpush1.bf16.msra.mxu1 %v3222_v14 }
 0x4b0   :  { %2508 = vmatprep.subr.bf16.mxu0 %v3226_v18  ;;  %2540 = vmatprep.subr.bf16.mxu1 %v3229_v22 }
 0x4b3   :  { %2510 = vmatpush1.bf16.msra.mxu0 %v3232_v25  ;;  %2542 = vmatpush1.bf16.msra.mxu1 %v3236_v27 }
 0x4b4   :  { %2544 = vmatprep.subr.bf16.mxu0 %v3133_v38  ;;  %2576 = vmatprep.subr.bf16.mxu1 %v3135_v41 }
 0x569   :  { %v1273_v28 = vpop.f32.mrb[8].mxu0  ;;  %v1344_v30 = vpop.f32.mrb[8].mxu1 }
 0x56a   :  { %v2703_v31 = vadd.f32 %v1273_v28, %v3286_v35  ;;  %v1275_v42 = vpop.f32.mrb[9].mxu0  ;;  %v1346_v43 = vpop.f32.mrb[9].mxu1  ;;  %v2719_v51 = vadd.f32 %v1344_v30, %v3292_v55 }
 0x56b   :  { %v2704_v45 = vadd.f32 %v1275_v42, %v3288_v37  ;;  %v2720_v52 = vadd.f32 %v1346_v43, %v3295_v1 }
 0x56c   :  { %v2030_v46 = vmul.f32 -1.442695, %v2703_v31  ;;  %v2032_v57 = vmul.f32 -1.442695, %v2719_v51 }
 0x56d   :  { %v2031_v49 = vmul.f32 -1.442695, %v2704_v45 }
 0x56e   :  { %2835 = vpow2.f32 %v2030_v46 }
 0x56f   :  { %2837 = vpow2.f32 %v2031_v49 }
 0x570   :  { %2839 = vtanh.f32 %v2720_v52 }
 0x571   :  { %2841 = vpow2.f32 %v2032_v57 }
 0x578   :  { %v2836_v59 = vpop.eup %2835 }
 0x579   :  { %v1362_v61 = vadd.f32 1.0, %v2836_v59  ;;  %v2838_v2 = vpop.eup %2837 }
 0x57a   :  { %v1363_v5 = vadd.f32 1.0, %v2838_v2  ;;  %v2840_v7 = vpop.eup %2839 }
 0x57b   :  { %2843 = vrcp.f32 %v1362_v61  ;;  %v2842_v8 = vpop.eup %2841 }
 0x57c   :  { %2845 = vrcp.f32 %v1363_v5  ;;  %v1364_v17 = vadd.f32 1.0, %v2842_v8 }
 0x57e   :  { %2847 = vrcp.f32 %v1364_v17 }
 0x585   :  { %v2844_v11 = vpop.eup %2843 }
 0x586   :  { %v1373_v12 = vmul.f32 %v2844_v11, %v2840_v7  ;;  %v2846_v15 = vpop.eup %2845 }
 0x587   :  { %v1372_v20 = vmul.f32 %v2846_v15, %v3424_v24 }
 0x588   :  { %v2848_v33 = vpop.eup %2847 }
 0x589   :  { %v3466_v21 = vadd.f32 %v1373_v12, %v1372_v20 }
 0x58b   :  { %2849 = vtanh.f32 %v3466_v21 }
 0x595   :  { %v2850_v34 = vpop.eup %2849 }
 0x596   :  { %v1376_v39 = vmul.f32 %v2850_v34, %v2848_v33  ;;  %v1910_v34 = vld [vmem:[#allocation11 + $0x18] sm:$0xff] }
 0x598   :  { %1447 = vmatmul.mubr.f32.vlgmr.msra.gmra.mrb[10].mxu0 %v1376_v39  ;;  %1518 = vmatmul.mubr.f32.vlgmr.msra.gmra.mrb[10].mxu1 %v1376_v39 }
 0x599   :  { %2546 = vmatpush1.bf16.msra.mxu0 %v3137_v47  ;;  %2578 = vmatpush1.bf16.msra.mxu1 %v3140_v50 }
 0x59a   :  { %2548 = vmatprep.subr.bf16.mxu0 %v3143_v53  ;;  %2580 = vmatprep.subr.bf16.mxu1 %v3145_v56 }
 0x59b   :  { %1621 = vmatprep.mubr.f32.mxu0 %v3025_v0  ;;  %1692 = vmatprep.mubr.f32.mxu1 %v3025_v0 }
 0x59d   :  { %2550 = vmatpush1.bf16.msra.mxu0 %v3148_v60  ;;  %2582 = vmatpush1.bf16.msra.mxu1 %v3152_v63 }
 0x59e   :  { %2552 = vmatprep.subr.bf16.mxu0 %v3156_v3  ;;  %2584 = vmatprep.subr.bf16.mxu1 %v3159_v6 }
 0x5a1   :  { %2554 = vmatpush1.bf16.msra.mxu0 %v3162_v10  ;;  %2586 = vmatpush1.bf16.msra.mxu1 %v3166_v13 }
 0x5a2   :  { %2556 = vmatprep.subr.bf16.mxu0 %v3170_v16  ;;  %2588 = vmatprep.subr.bf16.mxu1 %v3173_v19 }
 0x5a5   :  { %2558 = vmatpush1.bf16.msra.mxu0 %v3176_v23  ;;  %2590 = vmatpush1.bf16.msra.mxu1 %v3180_v26 }
 0x5a6   :  { %2560 = vmatprep.subr.bf16.mxu0 %v3184_v29  ;;  %2592 = vmatprep.subr.bf16.mxu1 %v3187_v32 }
 0x5a9   :  { %2562 = vmatpush1.bf16.msra.mxu0 %v3190_v36  ;;  %2594 = vmatpush1.bf16.msra.mxu1 %v3194_v40 }
 0x5aa   :  { %2564 = vmatprep.subr.bf16.mxu0 %v3198_v44  ;;  %2596 = vmatprep.subr.bf16.mxu1 %v3201_v48 }
 0x5ad   :  { %2566 = vmatpush1.bf16.msra.mxu0 %v3204_v54  ;;  %2598 = vmatpush1.bf16.msra.mxu1 %v3208_v58 }
 0x5ae   :  { %2568 = vmatprep.subr.bf16.mxu0 %v3212_v62  ;;  %2600 = vmatprep.subr.bf16.mxu1 %v3215_v4 }
 0x5b1   :  { %2570 = vmatpush1.bf16.msra.mxu0 %v3218_v9  ;;  %2602 = vmatpush1.bf16.msra.mxu1 %v3222_v14 }
 0x5b2   :  { %2572 = vmatprep.subr.bf16.mxu0 %v3226_v18  ;;  %2604 = vmatprep.subr.bf16.mxu1 %v3229_v22 }
 0x5b5   :  { %2574 = vmatpush1.bf16.msra.mxu0 %v3232_v25  ;;  %2606 = vmatpush1.bf16.msra.mxu1 %v3236_v27 }
 0x5b6   :  { %2608 = vmatprep.subr.bf16.mxu0 %v3133_v38  ;;  %2640 = vmatprep.subr.bf16.mxu1 %v3135_v41 }
 0x66b   :  { %v1448_v24 = vpop.f32.mrb[10].mxu0  ;;  %v1519_v28 = vpop.f32.mrb[10].mxu1 }
 0x66c   :  { %v2705_v30 = vadd.f32 %v1448_v24, %v3286_v35  ;;  %v1450_v31 = vpop.f32.mrb[11].mxu0  ;;  %v1521_v42 = vpop.f32.mrb[11].mxu1  ;;  %v2721_v49 = vadd.f32 %v1519_v28, %v3292_v55  ;;  %v1911_v24 = vld [vmem:[#allocation11 + $0x20] sm:$0xff]  ;;  %v1912_v28 = vld [vmem:[#allocation11 + $0x28] sm:$0xff] }
 0x66d   :  { %v2706_v43 = vadd.f32 %v1450_v31, %v3288_v37  ;;  %v2722_v51 = vadd.f32 %v1521_v42, %v3295_v1  ;;  %v1913_v31 = vld [vmem:[#allocation11 + $0x30] sm:$0xff]  ;;  %v1914_v42 = vld [vmem:[#allocation11 + $0x38] sm:$0xff] }
 0x66e   :  { %v2033_v45 = vmul.f32 -1.442695, %v2705_v30  ;;  %v2035_v52 = vmul.f32 -1.442695, %v2721_v49  ;;  %v2678_v30 = vpack.c.bf16 %v1912_v28, %v1911_v24 }
 0x66f   :  { %v2034_v46 = vmul.f32 -1.442695, %v2706_v43  ;;  %v2681_v43 = vpack.c.bf16 %v1914_v42, %v1913_v31 }
 0x670   :  { %2851 = vpow2.f32 %v2033_v45  ;;  %v1915_v45 = vld [vmem:[#allocation11 + $0x40] sm:$0xff] }
 0x671   :  { %2853 = vpow2.f32 %v2034_v46  ;;  %v1916_v46 = vld [vmem:[#allocation11 + $0x48] sm:$0xff] }
 0x672   :  { %2855 = vtanh.f32 %v2722_v51  ;;  %v2684_v49 = vpack.c.bf16 %v1916_v46, %v1915_v45  ;;  %v1917_v51 = vld [vmem:[#allocation11 + $0x50] sm:$0xff] }
 0x673   :  { %2857 = vpow2.f32 %v2035_v52  ;;  %v1918_v52 = vld [vmem:[#allocation11 + $0x58] sm:$0xff] }
 0x67a   :  { %v2852_v38 = vpop.eup %2851 }
 0x67b   :  { %v1537_v57 = vadd.f32 1.0, %v2852_v38  ;;  %v2854_v41 = vpop.eup %2853  ;;  %v2687_v38 = vpack.c.bf16 %v1918_v52, %v1917_v51 }
 0x67c   :  { %v1538_v59 = vadd.f32 1.0, %v2854_v41  ;;  %v2856_v61 = vpop.eup %2855  ;;  %v1920_v41 = vld [vmem:[#allocation11 + $0x68] sm:$0xff] }
 0x67d   :  { %2859 = vrcp.f32 %v1537_v57  ;;  %v2858_v2 = vpop.eup %2857  ;;  %v1919_v57 = vld [vmem:[#allocation11 + $0x60] sm:$0xff] }
 0x67e   :  { %2861 = vrcp.f32 %v1538_v59  ;;  %v1539_v11 = vadd.f32 1.0, %v2858_v2  ;;  %v2690_v59 = vpack.c.bf16 %v1920_v41, %v1919_v57  ;;  %v1922_v2 = vld [vmem:[#allocation11 + $0x78] sm:$0xff] }
 0x680   :  { %2863 = vrcp.f32 %v1539_v11 }
 0x687   :  { %v2860_v5 = vpop.eup %2859 }
 0x688   :  { %v1548_v7 = vmul.f32 %v2860_v5, %v2856_v61  ;;  %v2862_v8 = vpop.eup %2861  ;;  %v1921_v61 = vld [vmem:[#allocation11 + $0x70] sm:$0xff] }
 0x689   :  { %v1547_v12 = vmul.f32 %v2862_v8, %v3466_v21  ;;  %v1909_v21 = vld [vmem:[#allocation11 + $0x10] sm:$0xff]  ;;  %v2693_v5 = vpack.c.bf16 %v1922_v2, %v1921_v61 }
 0x68a   :  { %v2864_v17 = vpop.eup %2863  ;;  %v2675_v39 = vpack.c.bf16 %v1910_v34, %v1909_v21 }
 0x68b   :  { %v3508_v15 = vadd.f32 %v1548_v7, %v1547_v12 }
 0x68d   :  { %2865 = vtanh.f32 %v3508_v15 }
 0x697   :  { %v2866_v20 = vpop.eup %2865 }
 0x698   :  { %v1551_v33 = vmul.f32 %v2866_v20, %v2864_v17 }
 0x69a   :  { %1622 = vmatmul.mubr.f32.vlgmr.msra.gmra.mrb[12].mxu0 %v1551_v33  ;;  %1693 = vmatmul.mubr.f32.vlgmr.msra.gmra.mrb[12].mxu1 %v1551_v33 }
 0x69b   :  { %2610 = vmatpush1.bf16.msra.mxu0 %v3137_v47  ;;  %2642 = vmatpush1.bf16.msra.mxu1 %v3140_v50 }
 0x69c   :  { %2612 = vmatprep.subr.bf16.mxu0 %v3143_v53  ;;  %2644 = vmatprep.subr.bf16.mxu1 %v3145_v56 }
 0x69d   :  { %1796 = vmatprep.mubr.f32.mxu0 %v3025_v0  ;;  %1867 = vmatprep.mubr.f32.mxu1 %v3025_v0 }
 0x69f   :  { %2614 = vmatpush1.bf16.msra.mxu0 %v3148_v60  ;;  %2646 = vmatpush1.bf16.msra.mxu1 %v3152_v63 }
 0x6a0   :  { %2616 = vmatprep.subr.bf16.mxu0 %v3156_v3  ;;  %2648 = vmatprep.subr.bf16.mxu1 %v3159_v6 }
 0x6a3   :  { %2618 = vmatpush1.bf16.msra.mxu0 %v3162_v10  ;;  %2650 = vmatpush1.bf16.msra.mxu1 %v3166_v13 }
 0x6a4   :  { %2620 = vmatprep.subr.bf16.mxu0 %v3170_v16  ;;  %2652 = vmatprep.subr.bf16.mxu1 %v3173_v19 }
 0x6a7   :  { %2622 = vmatpush1.bf16.msra.mxu0 %v3176_v23  ;;  %2654 = vmatpush1.bf16.msra.mxu1 %v3180_v26 }
 0x6a8   :  { %2624 = vmatprep.subr.bf16.mxu0 %v3184_v29  ;;  %2656 = vmatprep.subr.bf16.mxu1 %v3187_v32 }
 0x6ab   :  { %2626 = vmatpush1.bf16.msra.mxu0 %v3190_v36  ;;  %2658 = vmatpush1.bf16.msra.mxu1 %v3194_v40 }
 0x6ac   :  { %2628 = vmatprep.subr.bf16.mxu0 %v3198_v44  ;;  %2660 = vmatprep.subr.bf16.mxu1 %v3201_v48 }
 0x6af   :  { %2630 = vmatpush1.bf16.msra.mxu0 %v3204_v54  ;;  %2662 = vmatpush1.bf16.msra.mxu1 %v3208_v58 }
 0x6b0   :  { %2632 = vmatprep.subr.bf16.mxu0 %v3212_v62  ;;  %2664 = vmatprep.subr.bf16.mxu1 %v3215_v4 }
 0x6b3   :  { %2634 = vmatpush1.bf16.msra.mxu0 %v3218_v9  ;;  %2666 = vmatpush1.bf16.msra.mxu1 %v3222_v14 }
 0x6b4   :  { %2636 = vmatprep.subr.bf16.mxu0 %v3226_v18  ;;  %2668 = vmatprep.subr.bf16.mxu1 %v3229_v22  ;;  %v1907_v18 = vld [vmem:[#allocation11] sm:$0xff]  ;;  %v1908_v22 = vld [vmem:[#allocation11 + $0x8] sm:$0xff] }
 0x6b7   :  { %2638 = vmatpush1.bf16.msra.mxu0 %v3232_v25  ;;  %2670 = vmatpush1.bf16.msra.mxu1 %v3236_v27  ;;  %v2672_v25 = vpack.c.bf16 %v1908_v22, %v1907_v18  ;;  %v3026_v27 = vmov 0.0|0.0  }
 0x6b8   :  { %2671 = vmatprep.subr.bf16.mxu0 %v3026_v27 }
 0x76d   :  { %v1623_v47 = vpop.f32.mrb[12].mxu0  ;;  %v1694_v50 = vpop.f32.mrb[12].mxu1 }
 0x76e   :  { %v2707_v53 = vadd.f32 %v1623_v47, %v3286_v35  ;;  %v1625_v56 = vpop.f32.mrb[13].mxu0  ;;  %v1696_v60 = vpop.f32.mrb[13].mxu1  ;;  %v2723_v10 = vadd.f32 %v1694_v50, %v3292_v55 }
 0x76f   :  { %v2708_v63 = vadd.f32 %v1625_v56, %v3288_v37  ;;  %v2724_v13 = vadd.f32 %v1696_v60, %v3295_v1 }
 0x770   :  { %v2036_v3 = vmul.f32 -1.442695, %v2707_v53  ;;  %v2038_v16 = vmul.f32 -1.442695, %v2723_v10 }
 0x771   :  { %v2037_v6 = vmul.f32 -1.442695, %v2708_v63 }
 0x772   :  { %2867 = vpow2.f32 %v2036_v3 }
 0x773   :  { %2869 = vpow2.f32 %v2037_v6 }
 0x774   :  { %2871 = vtanh.f32 %v2724_v13 }
 0x775   :  { %2873 = vpow2.f32 %v2038_v16 }
 0x77c   :  { %v2868_v19 = vpop.eup %2867 }
 0x77d   :  { %v1712_v23 = vadd.f32 1.0, %v2868_v19  ;;  %v2870_v26 = vpop.eup %2869 }
 0x77e   :  { %v1713_v29 = vadd.f32 1.0, %v2870_v26  ;;  %v2872_v32 = vpop.eup %2871  ;;  %v2042_v26 = vld [vmem:[%s3577_s5] ss:$0 sm:$0xff] }
 0x77f   :  { %2875 = vrcp.f32 %v1712_v23  ;;  %v2874_v36 = vpop.eup %2873 }
 0x780   :  { %2877 = vrcp.f32 %v1713_v29  ;;  %v1714_v54 = vadd.f32 1.0, %v2874_v36 }
 0x782   :  { %2879 = vrcp.f32 %v1714_v54 }
 0x789   :  { %v2876_v40 = vpop.eup %2875 }
 0x78a   :  { %v1723_v44 = vmul.f32 %v2876_v40, %v2872_v32  ;;  %v2878_v48 = vpop.eup %2877 }
 0x78b   :  { %v1722_v58 = vmul.f32 %v2878_v48, %v3508_v15 }
 0x78c   :  { %v2880_v4 = vpop.eup %2879 }
 0x78d   :  { %v3548_v62 = vadd.f32 %v1723_v44, %v1722_v58 }
 0x78f   :  { %2881 = vtanh.f32 %v3548_v62 }
 0x799   :  { %v2882_v9 = vpop.eup %2881 }
 0x79a   :  { %v1726_v14 = vmul.f32 %v2882_v9, %v2880_v4 }
 0x79c   :  { %1797 = vmatmul.mubr.f32.vlgmr.msra.gmra.mrb[14].mxu0 %v1726_v14  ;;  %1868 = vmatmul.mubr.f32.vlgmr.msra.gmra.mrb[14].mxu1 %v1726_v14 }
 0x79d   :  { %2673 = vmatpush3.bf16.msra.mxu0 %v2672_v25  ;;  %2092 = vmatprep.mubr.msk.f32.mxu0 %vm3027_vm0, %v3025_v0 }
 0x79e   :  { %2674 = vmatprep.subr.bf16.mxu0 %v3026_v27 }
 0x7a1   :  { %2676 = vmatpush3.bf16.msra.mxu0 %v2675_v39 }
 0x7a2   :  { %2677 = vmatprep.subr.bf16.mxu0 %v3026_v27 }
 0x7a5   :  { %2679 = vmatpush3.bf16.msra.mxu0 %v2678_v30 }
 0x7a6   :  { %2680 = vmatprep.subr.bf16.mxu0 %v3026_v27 }
 0x7a9   :  { %2682 = vmatpush3.bf16.msra.mxu0 %v2681_v43 }
 0x7aa   :  { %2683 = vmatprep.subr.bf16.mxu0 %v3026_v27 }
 0x7ad   :  { %2685 = vmatpush3.bf16.msra.mxu0 %v2684_v49 }
 0x7ae   :  { %2686 = vmatprep.subr.bf16.mxu0 %v3026_v27 }
 0x7b1   :  { %2688 = vmatpush3.bf16.msra.mxu0 %v2687_v38 }
 0x7b2   :  { %2689 = vmatprep.subr.bf16.mxu0 %v3026_v27 }
 0x7b5   :  { %2691 = vmatpush3.bf16.msra.mxu0 %v2690_v59 }
 0x7b6   :  { %2692 = vmatprep.subr.bf16.mxu0 %v3026_v27 }
 0x7b9   :  { %2694 = vmatpush3.bf16.msra.mxu0 %v2693_v5 }
 0x86f   :  { %v1798_v7 = vpop.f32.mrb[14].mxu0  ;;  %v1869_v8 = vpop.f32.mrb[14].mxu1 }
 0x870   :  { %v2709_v11 = vadd.f32 %v1798_v7, %v3286_v35  ;;  %v1800_v12 = vpop.f32.mrb[15].mxu0  ;;  %v1871_v15 = vpop.f32.mrb[15].mxu1  ;;  %v2725_v0 = vadd.f32 %v1869_v8, %v3292_v55 }
 0x871   :  { %v2710_v17 = vadd.f32 %v1800_v12, %v3288_v37  ;;  %v2726_v47 = vadd.f32 %v1871_v15, %v3295_v1 }
 0x872   :  { %v2039_v20 = vmul.f32 -1.442695, %v2709_v11  ;;  %v2041_v50 = vmul.f32 -1.442695, %v2725_v0 }
 0x873   :  { %v2040_v33 = vmul.f32 -1.442695, %v2710_v17 }
 0x874   :  { %2883 = vpow2.f32 %v2039_v20 }
 0x875   :  { %2885 = vpow2.f32 %v2040_v33 }
 0x876   :  { %2887 = vtanh.f32 %v2726_v47 }
 0x877   :  { %2889 = vpow2.f32 %v2041_v50 }
 0x87e   :  { %v2884_v53 = vpop.eup %2883 }
 0x87f   :  { %v1887_v56 = vadd.f32 1.0, %v2884_v53  ;;  %v2886_v60 = vpop.eup %2885 }
 0x880   :  { %v1888_v35 = vadd.f32 1.0, %v2886_v60  ;;  %v2888_v63 = vpop.eup %2887 }
 0x881   :  { %2891 = vrcp.f32 %v1887_v56  ;;  %v2890_v3 = vpop.eup %2889 }
 0x882   :  { %2893 = vrcp.f32 %v1888_v35  ;;  %v1889_v13 = vadd.f32 1.0, %v2890_v3 }
 0x884   :  { %2895 = vrcp.f32 %v1889_v13 }
 0x88b   :  { %v2892_v37 = vpop.eup %2891 }
 0x88c   :  { %v1898_v6 = vmul.f32 %v2892_v37, %v2888_v63  ;;  %v2894_v10 = vpop.eup %2893 }
 0x88d   :  { %v1897_v16 = vmul.f32 %v2894_v10, %v3548_v62 }
 0x88e   :  { %v2896_v1 = vpop.eup %2895 }
 0x88f   :  { %v1899_v55 = vadd.f32 %v1898_v6, %v1897_v16 }
 0x891   :  { %2897 = vtanh.f32 %v1899_v55 }
 0x89b   :  { %v2898_v19 = vpop.eup %2897 }
 0x89c   :  { %v1901_v23 = vmul.f32 %v2898_v19, %v2896_v1 }
 0x89e   :  { %2093 = vmatmul.mubr.f32.vlgmr.msra.gmra.mrb[16].mxu0 %v1901_v23 }
 0x971   :  { %v1996_v29 = vpop.f32.mrb[16].mxu0 }
 0x972   :  { %v1997_v32 = vadd.f32 %v2042_v26, %v1996_v29  ;;  %v2094_v36 = vpop.f32.mrb[17].mxu0 }
 0x974   :  { %2000 = vst [vmem:[#allocation13] sm:$0xff] %v1997_v32 }
 0x975   :  { %2998 = shalt.err (!%p2995_p8)
}
 0x976   :  { %s2999_s28 = scalar_lea.hbm %s3578_s6, 128 }
 0x977   :  { %p3000_p9 = scmp.ne.s32.totalorder %s3578_s6, %s2999_s28  ;;  %p3003_p10 = scmp.lt.u32.totalorder %s2999_s28, %s3578_s6 }
 0x979   :  { %p3005_p11 = pnand %p3003_p10, %p3000_p9 }
 0x97b   :  { %3008 = shalt.err (!%p3005_p11)
}
 0x97c   :  { %2010 = dma.vmem_to_hbm [thread:$0]  %s2008_s24, 128, %s3578_s6, [#allocation7]  }
 0x97d   :  { %3015 = dma.done.wait [#allocation7], 128  }
 0x97e   :  { %3016 = vsyncadd [#allocation7], 4294967168 }
 0x97f   :  { %2014 = vsyncpa [#allocation6], 1 }
 0x980   :  { %2015 = vsyncpa [#allocation9], 1 }
 0x981   :  { %2016 = vsyncpa [#allocation12], 1 }
 0x982   :  { %2017 = vsyncpa [#allocation7], 1 }

// kernel: tpu_custom_call.1
= control target key start
LH: loop header
LB: loop body
LE: loop exit
PB: predicated region body
PF: predicated region fallthrough
CT: control target
= control target key end

     0   :  { %11 = vsyncpa [#allocation6], 0  ;;  %s3572_s0 = inlined_call_operand.hbm [shape: f32[8,8,128], index: 0, kind: input, shape index: {}]   ;;  %s3573_s1 = inlined_call_operand.hbm [shape: f32[128,512], index: 1, kind: input, shape index: {}]   ;;  %s3574_s2 = inlined_call_operand.hbm [shape: f32[128,512], index: 2, kind: input, shape index: {}]   ;;  %s3575_s3 = inlined_call_operand.vmem [shape: f32[1,512], index: 3, kind: input, shape index: {}]   ;;  %s3576_s4 = inlined_call_operand.hbm [shape: f32[128,128], index: 4, kind: input, shape index: {}]   ;;  %s3577_s5 = inlined_call_operand.vmem [shape: f32[1,128], index: 5, kind: input, shape index: {}]   ;;  %s3578_s6 = inlined_call_operand.hbm [shape: f32[8,128], index: 6, kind: output, shape index: {}]  }
   0x1   :  { %12 = vsyncpa [#allocation9], 0 }
   0x2   :  { %13 = vsyncpa [#allocation12], 0 }
   0x3   :  { %14 = vsyncpa [#allocation7], 0  ;;  %s3017_s21 = smov [#allocation8]   ;;  %s2899_s25 = scalar_lea.hbm %s3573_s1, 8192 }
   0x4   :  { %s32_s22 = sshll.u32 %s3017_s21, 4  ;;  %p2900_p0 = scmp.ne.s32.totalorder %s3573_s1, %s2899_s25  ;;  %s33_s22 = int_to_ptr.vmem [resolvable:$true] %s32_s22 }
   0x5   :  { %p2903_p1 = scmp.lt.u32.totalorder %s2899_s25, %s3573_s1 }
   0x7   :  { %p2905_p2 = pnand %p2903_p1, %p2900_p0 }
   0x9   :  { %2908 = shalt.err (!%p2905_p2)
}
   0xa   :  { %s2909_s30 = scalar_lea.vmem %s33_s22, 8192  ;;  %p2914_p4 = scmp.lt.s32.totalorder %s33_s22, %s33_s22 }
   0xb   :  { %p2910_p3 = scmp.ne.s32.totalorder %s33_s22, %s2909_s30  ;;  %p2915_p5 = scmp.lt.s32.totalorder %s2909_s30, %s2909_s30 }
   0xd   :  { %p2916_p6 = por %p2915_p5, %p2914_p4 }
   0xf   :  { %p2917_p7 = pnand %p2916_p6, %p2910_p3 }
  0x11   :  { %2920 = shalt.err (!%p2917_p7)
}
  0x12   :  { %s3018_s7 = smov 512   ;;  %s3019_s8 = smov 32  }
  0x13   :  { %38 = dma.hbm_to_vmem [thread:$0]  %s3573_s1, 8192, %s33_s22, [#allocation9], %s3018_s7, %s3018_s7, %s3019_s8  }
  0x14   :  { %s3020_s11 = smov [#allocation5]   ;;  %s2921_s15 = scalar_lea.hbm %s3572_s0, 1024 }
  0x15   :  { %s20_s12 = sshll.u32 %s3020_s11, 4  ;;  %p2922_p8 = scmp.ne.s32.totalorder %s3572_s0, %s2921_s15  ;;  %s21_s12 = int_to_ptr.vmem [resolvable:$true] %s20_s12 }
  0x16   :  { %p2925_p9 = scmp.lt.u32.totalorder %s2921_s15, %s3572_s0 }
  0x18   :  { %p2927_p10 = pnand %p2925_p9, %p2922_p8 }
  0x1a   :  { %2930 = shalt.err (!%p2927_p10)
}
  0x1b   :  { %s2931_s20 = scalar_lea.vmem %s21_s12, 1024  ;;  %p2936_p12 = scmp.lt.s32.totalorder %s21_s12, %s21_s12 }
  0x1c   :  { %p2932_p11 = scmp.ne.s32.totalorder %s21_s12, %s2931_s20  ;;  %p2937_p13 = scmp.lt.s32.totalorder %s2931_s20, %s2931_s20 }
  0x1e   :  { %p2938_p0 = por %p2937_p13, %p2936_p12 }
  0x20   :  { %p2939_p1 = pnand %p2938_p0, %p2932_p11 }
  0x22   :  { %2942 = shalt.err (!%p2939_p1)
}
  0x23   :  { %s3021_s1 = smov 128   ;;  %s3022_s21 = smov 8  }
  0x24   :  { %26 = dma.hbm_to_vmem [thread:$0]  %s3572_s0, 1024, %s21_s12, [#allocation6], %s3021_s1, %s3021_s1, %s3022_s21  }
  0x25   :  { %s3023_s24 = smov [#allocation10]   ;;  %s3024_s26 = smov [#allocation11]  }
  0x26   :  { %s44_s25 = sshll.u32 %s3023_s24, 4  ;;  %s58_s27 = sshll.u32 %s3024_s26, 4  ;;  %s45_s25 = int_to_ptr.vmem [resolvable:$true] %s44_s25  ;;  %s3094_s27 = int_to_ptr.vmem [resolvable:$true] %s58_s27 }
  0x27   :  { %s2943_s30 = scalar_lea.hbm %s3574_s2, 8192 }
  0x28   :  { %p2944_p2 = scmp.ne.s32.totalorder %s3574_s2, %s2943_s30  ;;  %p2947_p3 = scmp.lt.u32.totalorder %s2943_s30, %s3574_s2 }
  0x2a   :  { %p2949_p4 = pnand %p2947_p3, %p2944_p2 }
  0x2c   :  { %2952 = shalt.err (!%p2949_p4)
}
  0x2d   :  { %s2953_s0 = scalar_lea.vmem %s45_s25, 8192  ;;  %p2958_p6 = scmp.lt.s32.totalorder %s45_s25, %s45_s25 }
  0x2e   :  { %p2954_p5 = scmp.ne.s32.totalorder %s45_s25, %s2953_s0  ;;  %p2959_p7 = scmp.lt.s32.totalorder %s2953_s0, %s2953_s0 }
  0x30   :  { %p2960_p8 = por %p2959_p7, %p2958_p6 }
  0x32   :  { %p2961_p9 = pnand %p2960_p8, %p2954_p5 }
  0x34   :  { %2964 = shalt.err (!%p2961_p9)
}
  0x35   :  { %50 = dma.hbm_to_vmem [thread:$0]  %s3574_s2, 8192, %s45_s25, [#allocation9], %s3018_s7, %s3018_s7, %s3019_s8  }
  0x36   :  { %s2965_s17 = scalar_lea.hbm %s3576_s4, 2048 }
  0x37   :  { %p2966_p10 = scmp.ne.s32.totalorder %s3576_s4, %s2965_s17  ;;  %p2969_p11 = scmp.lt.u32.totalorder %s2965_s17, %s3576_s4 }
  0x39   :  { %p2971_p12 = pnand %p2969_p11, %p2966_p10 }
  0x3b   :  { %2974 = shalt.err (!%p2971_p12)
}
  0x3c   :  { %s2975_s23 = scalar_lea.vmem %s3094_s27, 2048  ;;  %p2980_p0 = scmp.lt.s32.totalorder %s3094_s27, %s3094_s27 }
  0x3d   :  { %p2976_p13 = scmp.ne.s32.totalorder %s3094_s27, %s2975_s23  ;;  %p2981_p1 = scmp.lt.s32.totalorder %s2975_s23, %s2975_s23 }
  0x3f   :  { %p2982_p2 = por %p2981_p1, %p2980_p0 }
  0x41   :  { %p2983_p3 = pnand %p2982_p2, %p2976_p13 }
  0x43   :  { %2986 = shalt.err (!%p2983_p3)
}
  0x44   :  { %64 = dma.hbm_to_vmem [thread:$0]  %s3576_s4, 2048, %s3094_s27, [#allocation12], %s3021_s1, %s3021_s1, %s3022_s21  }
  0x45   :  { %3009 = dma.done.wait [#allocation6], 1024  }
  0x46   :  { %3010 = vsyncadd [#allocation6], 4294966272 }
  0x47   :  { %3011 = dma.done.wait [#allocation9], 16384  }
  0x48   :  { %3012 = vsyncadd [#allocation9], 4294950912 }
  0x49   :  { %3013 = dma.done.wait [#allocation12], 2048  }
  0x4a   :  { %3014 = vsyncadd [#allocation12], 4294965248  ;;  %v3025_v0 = vmov 0.0   ;;  %v94_v1 = vld [vmem:[#allocation8 + $0x8] sm:$0xff]  ;;  %v96_v3 = vld [vmem:[#allocation8 + $0x18] sm:$0xff]  ;;  %vm3027_vm0 = vmmov 0  }
  0x4b   :  { %243 = vmatprep.mubr.f32.mxu0 %v3025_v0  ;;  %356 = vmatprep.mubr.f32.mxu1 %v3025_v0  ;;  %v98_v2 = vld [vmem:[#allocation8 + $0x28] sm:$0xff]  ;;  %v100_v5 = vld [vmem:[#allocation8 + $0x38] sm:$0xff]  ;;  %v93_v6 = vld [vmem:[#allocation8] sm:$0xff]  ;;  %s3028_s21 = smov [#allocation13]  }
  0x4c   :  { %v2095_v4 = vpack.c.bf16 %v98_v2, %v94_v1  ;;  %v97_v7 = vld [vmem:[#allocation8 + $0x20] sm:$0xff]  ;;  %v2127_v8 = vpack.c.bf16 %v100_v5, %v96_v3  ;;  %v95_v10 = vld [vmem:[#allocation8 + $0x10] sm:$0xff]  ;;  %v102_v12 = vld [vmem:[#allocation8 + $0x48] sm:$0xff]  ;;  %s2007_s24 = sshll.u32 %s3028_s21, 4  ;;  %s2008_s24 = int_to_ptr.vmem [resolvable:$true] %s2007_s24 }
  0x4d   :  { %v2097_v9 = vpack.c.bf16 %v97_v7, %v93_v6  ;;  %v99_v11 = vld [vmem:[#allocation8 + $0x30] sm:$0xff]  ;;  %v106_v14 = vld [vmem:[#allocation8 + $0x68] sm:$0xff]  ;;  %v104_v15 = vld [vmem:[#allocation8 + $0x58] sm:$0xff]  ;;  %s2987_s25 = scalar_lea.vmem %s2008_s24, 128  ;;  %p2992_p5 = scmp.lt.s32.totalorder %s2008_s24, %s2008_s24 }
  0x4e   :  { %2096 = vmatprep.subr.bf16.mxu0 %v2095_v4  ;;  %v2129_v13 = vpack.c.bf16 %v99_v11, %v95_v10  ;;  %v108_v16 = vld [vmem:[#allocation8 + $0x78] sm:$0xff]  ;;  %2128 = vmatprep.subr.bf16.mxu1 %v2127_v8  ;;  %v2099_v17 = vpack.c.bf16 %v106_v14, %v102_v12  ;;  %v101_v19 = vld [vmem:[#allocation8 + $0x40] sm:$0xff]  ;;  %v103_v21 = vld [vmem:[#allocation8 + $0x50] sm:$0xff]  ;;  %p2988_p4 = scmp.ne.s32.totalorder %s2008_s24, %s2987_s25  ;;  %p2993_p6 = scmp.lt.s32.totalorder %s2987_s25, %s2987_s25 }
  0x4f   :  { %2098 = vmatpush1.bf16.msra.mxu0 %v2097_v9  ;;  %v2131_v18 = vpack.c.bf16 %v108_v16, %v104_v15  ;;  %v105_v20 = vld [vmem:[#allocation8 + $0x60] sm:$0xff]  ;;  %v107_v23 = vld [vmem:[#allocation8 + $0x70] sm:$0xff]  ;;  %v110_v24 = vld [vmem:[#allocation8 + $0x88] sm:$0xff] }
  0x50   :  { %2130 = vmatpush1.bf16.msra.mxu1 %v2129_v13  ;;  %v2101_v22 = vpack.c.bf16 %v105_v20, %v101_v19  ;;  %v114_v25 = vld [vmem:[#allocation8 + $0xa8] sm:$0xff]  ;;  %2100 = vmatprep.subr.bf16.mxu0 %v2099_v17  ;;  %v2133_v26 = vpack.c.bf16 %v107_v23, %v103_v21  ;;  %v112_v28 = vld [vmem:[#allocation8 + $0x98] sm:$0xff]  ;;  %v109_v30 = vld [vmem:[#allocation8 + $0x80] sm:$0xff]  ;;  %p2994_p7 = por %p2993_p6, %p2992_p5 }
  0x51   :  { %2132 = vmatprep.subr.bf16.mxu1 %v2131_v18  ;;  %v2103_v27 = vpack.c.bf16 %v114_v25, %v110_v24  ;;  %v116_v29 = vld [vmem:[#allocation8 + $0xb8] sm:$0xff]  ;;  %v113_v32 = vld [vmem:[#allocation8 + $0xa0] sm:$0xff]  ;;  %v111_v33 = vld [vmem:[#allocation8 + $0x90] sm:$0xff] }
  0x52   :  { %v2135_v31 = vpack.c.bf16 %v116_v29, %v112_v28  ;;  %v115_v34 = vld [vmem:[#allocation8 + $0xb0] sm:$0xff]  ;;  %v2105_v35 = vpack.c.bf16 %v113_v32, %v109_v30  ;;  %v118_v36 = vld [vmem:[#allocation8 + $0xc8] sm:$0xff]  ;;  %v120_v38 = vld [vmem:[#allocation8 + $0xd8] sm:$0xff]  ;;  %p2995_p8 = pnand %p2994_p7, %p2988_p4 }
  0x53   :  { %2102 = vmatpush1.bf16.msra.mxu0 %v2101_v22  ;;  %v122_v37 = vld [vmem:[#allocation8 + $0xe8] sm:$0xff]  ;;  %v2137_v39 = vpack.c.bf16 %v115_v34, %v111_v33  ;;  %v124_v41 = vld [vmem:[#allocation8 + $0xf8] sm:$0xff]  ;;  %v117_v42 = vld [vmem:[#allocation8 + $0xc0] sm:$0xff] }
  0x54   :  { %2134 = vmatpush1.bf16.msra.mxu1 %v2133_v26  ;;  %2104 = vmatprep.subr.bf16.mxu0 %v2103_v27  ;;  %v2107_v40 = vpack.c.bf16 %v122_v37, %v118_v36  ;;  %v121_v43 = vld [vmem:[#allocation8 + $0xe0] sm:$0xff]  ;;  %v2139_v44 = vpack.c.bf16 %v124_v41, %v120_v38  ;;  %v119_v45 = vld [vmem:[#allocation8 + $0xd0] sm:$0xff]  ;;  %v126_v47 = vld [vmem:[#allocation8 + $0x108] sm:$0xff] }
  0x55   :  { %2136 = vmatprep.subr.bf16.mxu1 %v2135_v31  ;;  %v123_v46 = vld [vmem:[#allocation8 + $0xf0] sm:$0xff]  ;;  %v130_v48 = vld [vmem:[#allocation8 + $0x128] sm:$0xff]  ;;  %v128_v49 = vld [vmem:[#allocation8 + $0x118] sm:$0xff]  ;;  %v2109_v51 = vpack.c.bf16 %v121_v43, %v117_v42 }
  0x56   :  { %v132_v50 = vld [vmem:[#allocation8 + $0x138] sm:$0xff]  ;;  %v2141_v52 = vpack.c.bf16 %v123_v46, %v119_v45  ;;  %v2111_v53 = vpack.c.bf16 %v130_v48, %v126_v47  ;;  %v125_v54 = vld [vmem:[#allocation8 + $0x100] sm:$0xff]  ;;  %v127_v56 = vld [vmem:[#allocation8 + $0x110] sm:$0xff] }
  0x57   :  { %2106 = vmatpush1.bf16.msra.mxu0 %v2105_v35  ;;  %v129_v55 = vld [vmem:[#allocation8 + $0x120] sm:$0xff]  ;;  %v2143_v57 = vpack.c.bf16 %v132_v50, %v128_v49  ;;  %v131_v58 = vld [vmem:[#allocation8 + $0x130] sm:$0xff]  ;;  %v134_v59 = vld [vmem:[#allocation8 + $0x148] sm:$0xff] }
  0x58   :  { %2138 = vmatpush1.bf16.msra.mxu1 %v2137_v39  ;;  %2108 = vmatprep.subr.bf16.mxu0 %v2107_v40  ;;  %v138_v60 = vld [vmem:[#allocation8 + $0x168] sm:$0xff]  ;;  %v136_v61 = vld [vmem:[#allocation8 + $0x158] sm:$0xff]  ;;  %v2113_v63 = vpack.c.bf16 %v129_v55, %v125_v54  ;;  %v2145_v1 = vpack.c.bf16 %v131_v58, %v127_v56  ;;  %v133_v3 = vld [vmem:[#allocation8 + $0x140] sm:$0xff] }
  0x59   :  { %2140 = vmatprep.subr.bf16.mxu1 %v2139_v44  ;;  %v140_v62 = vld [vmem:[#allocation8 + $0x178] sm:$0xff]  ;;  %v2115_v2 = vpack.c.bf16 %v138_v60, %v134_v59  ;;  %v137_v4 = vld [vmem:[#allocation8 + $0x160] sm:$0xff]  ;;  %v135_v5 = vld [vmem:[#allocation8 + $0x150] sm:$0xff] }
  0x5a   :  { %v2147_v6 = vpack.c.bf16 %v140_v62, %v136_v61  ;;  %v139_v7 = vld [vmem:[#allocation8 + $0x170] sm:$0xff]  ;;  %v142_v8 = vld [vmem:[#allocation8 + $0x188] sm:$0xff]  ;;  %v144_v10 = vld [vmem:[#allocation8 + $0x198] sm:$0xff]  ;;  %v2117_v12 = vpack.c.bf16 %v137_v4, %v133_v3 }
  0x5b   :  { %2110 = vmatpush1.bf16.msra.mxu0 %v2109_v51  ;;  %v146_v9 = vld [vmem:[#allocation8 + $0x1a8] sm:$0xff]  ;;  %v148_v11 = vld [vmem:[#allocation8 + $0x1b8] sm:$0xff]  ;;  %v2149_v13 = vpack.c.bf16 %v139_v7, %v135_v5  ;;  %v141_v15 = vld [vmem:[#allocation8 + $0x180] sm:$0xff] }
  0x5c   :  { %2142 = vmatpush1.bf16.msra.mxu1 %v2141_v52  ;;  %2112 = vmatprep.subr.bf16.mxu0 %v2111_v53  ;;  %v2119_v14 = vpack.c.bf16 %v146_v9, %v142_v8  ;;  %v145_v16 = vld [vmem:[#allocation8 + $0x1a0] sm:$0xff]  ;;  %v143_v17 = vld [vmem:[#allocation8 + $0x190] sm:$0xff]  ;;  %v2151_v18 = vpack.c.bf16 %v148_v11, %v144_v10  ;;  %v150_v20 = vld [vmem:[#allocation8 + $0x1c8] sm:$0xff] }
  0x5d   :  { %2144 = vmatprep.subr.bf16.mxu1 %v2143_v57  ;;  %v147_v19 = vld [vmem:[#allocation8 + $0x1b0] sm:$0xff]  ;;  %v154_v21 = vld [vmem:[#allocation8 + $0x1e8] sm:$0xff]  ;;  %v152_v22 = vld [vmem:[#allocation8 + $0x1d8] sm:$0xff]  ;;  %v2121_v24 = vpack.c.bf16 %v145_v16, %v141_v15 }
  0x5e   :  { %v156_v23 = vld [vmem:[#allocation8 + $0x1f8] sm:$0xff]  ;;  %v2153_v25 = vpack.c.bf16 %v147_v19, %v143_v17  ;;  %v2123_v26 = vpack.c.bf16 %v154_v21, %v150_v20  ;;  %v149_v27 = vld [vmem:[#allocation8 + $0x1c0] sm:$0xff]  ;;  %v151_v29 = vld [vmem:[#allocation8 + $0x1d0] sm:$0xff] }
  0x5f   :  { %2114 = vmatpush1.bf16.msra.mxu0 %v2113_v63  ;;  %v153_v28 = vld [vmem:[#allocation8 + $0x1e0] sm:$0xff]  ;;  %v2155_v30 = vpack.c.bf16 %v156_v23, %v152_v22  ;;  %v155_v31 = vld [vmem:[#allocation8 + $0x1f0] sm:$0xff]  ;;  %v444_v32 = vld [vmem:[#allocation10 + $0x8] sm:$0xff] }
  0x60   :  { %2146 = vmatpush1.bf16.msra.mxu1 %v2145_v1  ;;  %2116 = vmatprep.subr.bf16.mxu0 %v2115_v2  ;;  %v448_v33 = vld [vmem:[#allocation10 + $0x28] sm:$0xff]  ;;  %v446_v34 = vld [vmem:[#allocation10 + $0x18] sm:$0xff]  ;;  %v2125_v36 = vpack.c.bf16 %v153_v28, %v149_v27  ;;  %v2157_v37 = vpack.c.bf16 %v155_v31, %v151_v29  ;;  %v443_v39 = vld [vmem:[#allocation10] sm:$0xff] }
  0x61   :  { %2148 = vmatprep.subr.bf16.mxu1 %v2147_v6  ;;  %v450_v35 = vld [vmem:[#allocation10 + $0x38] sm:$0xff]  ;;  %v3133_v38 = vpack.c.bf16 %v448_v33, %v444_v32  ;;  %v447_v40 = vld [vmem:[#allocation10 + $0x20] sm:$0xff]  ;;  %v445_v42 = vld [vmem:[#allocation10 + $0x10] sm:$0xff] }
  0x62   :  { %v3135_v41 = vpack.c.bf16 %v450_v35, %v446_v34  ;;  %v449_v43 = vld [vmem:[#allocation10 + $0x30] sm:$0xff]  ;;  %v452_v44 = vld [vmem:[#allocation10 + $0x48] sm:$0xff]  ;;  %v85_v46 = vld [vmem:[#allocation5] sm:$0xff]  ;;  %v3137_v47 = vpack.c.bf16 %v447_v40, %v443_v39 }
  0x63   :  { %2118 = vmatpush1.bf16.msra.mxu0 %v2117_v12  ;;  %v456_v45 = vld [vmem:[#allocation10 + $0x68] sm:$0xff]  ;;  %v454_v48 = vld [vmem:[#allocation10 + $0x58] sm:$0xff]  ;;  %v3140_v50 = vpack.c.bf16 %v449_v43, %v445_v42  ;;  %v451_v51 = vld [vmem:[#allocation10 + $0x40] sm:$0xff] }
  0x64   :  { %2150 = vmatpush1.bf16.msra.mxu1 %v2149_v13  ;;  %2120 = vmatprep.subr.bf16.mxu0 %v2119_v14  ;;  %v458_v49 = vld [vmem:[#allocation10 + $0x78] sm:$0xff]  ;;  %v455_v52 = vld [vmem:[#allocation10 + $0x60] sm:$0xff]  ;;  %v3143_v53 = vpack.c.bf16 %v456_v45, %v452_v44  ;;  %v453_v54 = vld [vmem:[#allocation10 + $0x50] sm:$0xff] }
  0x65   :  { %2152 = vmatprep.subr.bf16.mxu1 %v2151_v18  ;;  %v457_v55 = vld [vmem:[#allocation10 + $0x70] sm:$0xff]  ;;  %v3145_v56 = vpack.c.bf16 %v458_v49, %v454_v48  ;;  %v460_v57 = vld [vmem:[#allocation10 + $0x88] sm:$0xff]  ;;  %v3148_v60 = vpack.c.bf16 %v455_v52, %v451_v51  ;;  %v462_v61 = vld [vmem:[#allocation10 + $0x98] sm:$0xff] }
  0x66   :  { %v464_v58 = vld [vmem:[#allocation10 + $0xa8] sm:$0xff]  ;;  %v466_v62 = vld [vmem:[#allocation10 + $0xb8] sm:$0xff]  ;;  %v3152_v63 = vpack.c.bf16 %v457_v55, %v453_v54  ;;  %v459_v1 = vld [vmem:[#allocation10 + $0x80] sm:$0xff] }
  0x67   :  { %2122 = vmatpush1.bf16.msra.mxu0 %v2121_v24  ;;  %v86_v59 = vld [vmem:[#allocation5 + $0x8] sm:$0xff]  ;;  %v463_v2 = vld [vmem:[#allocation10 + $0xa0] sm:$0xff]  ;;  %v3156_v3 = vpack.c.bf16 %v464_v58, %v460_v57  ;;  %v461_v4 = vld [vmem:[#allocation10 + $0x90] sm:$0xff]  ;;  %v3159_v6 = vpack.c.bf16 %v466_v62, %v462_v61 }
  0x68   :  { %2154 = vmatpush1.bf16.msra.mxu1 %v2153_v25  ;;  %2124 = vmatprep.subr.bf16.mxu0 %v2123_v26  ;;  %v465_v5 = vld [vmem:[#allocation10 + $0xb0] sm:$0xff]  ;;  %v468_v7 = vld [vmem:[#allocation10 + $0xc8] sm:$0xff]  ;;  %v3162_v10 = vpack.c.bf16 %v463_v2, %v459_v1  ;;  %v470_v11 = vld [vmem:[#allocation10 + $0xd8] sm:$0xff] }
  0x69   :  { %2156 = vmatprep.subr.bf16.mxu1 %v2155_v30  ;;  %v472_v8 = vld [vmem:[#allocation10 + $0xe8] sm:$0xff]  ;;  %v87_v9 = vld [vmem:[#allocation5 + $0x10] sm:$0xff]  ;;  %v474_v12 = vld [vmem:[#allocation10 + $0xf8] sm:$0xff]  ;;  %v3166_v13 = vpack.c.bf16 %v465_v5, %v461_v4 }
  0x6a   :  { %v467_v14 = vld [vmem:[#allocation10 + $0xc0] sm:$0xff]  ;;  %v3170_v16 = vpack.c.bf16 %v472_v8, %v468_v7  ;;  %v469_v17 = vld [vmem:[#allocation10 + $0xd0] sm:$0xff]  ;;  %v3173_v19 = vpack.c.bf16 %v474_v12, %v470_v11  ;;  %v476_v20 = vld [vmem:[#allocation10 + $0x108] sm:$0xff] }
  0x6b   :  { %2126 = vmatpush1.bf16.msra.mxu0 %v2125_v36  ;;  %v471_v15 = vld [vmem:[#allocation10 + $0xe0] sm:$0xff]  ;;  %v473_v18 = vld [vmem:[#allocation10 + $0xf0] sm:$0xff]  ;;  %v480_v21 = vld [vmem:[#allocation10 + $0x128] sm:$0xff] }
  0x6c   :  { %2158 = vmatpush1.bf16.msra.mxu1 %v2157_v37  ;;  %2160 = vmatprep.subr.bf16.mxu0 %v3133_v38  ;;  %v88_v22 = vld [vmem:[#allocation5 + $0x18] sm:$0xff]  ;;  %v3176_v23 = vpack.c.bf16 %v471_v15, %v467_v14  ;;  %v3180_v26 = vpack.c.bf16 %v473_v18, %v469_v17  ;;  %v475_v27 = vld [vmem:[#allocation10 + $0x100] sm:$0xff]  ;;  %v3184_v29 = vpack.c.bf16 %v480_v21, %v476_v20  ;;  %v477_v30 = vld [vmem:[#allocation10 + $0x110] sm:$0xff] }
  0x6d   :  { %2192 = vmatprep.subr.bf16.mxu1 %v3135_v41  ;;  %v478_v24 = vld [vmem:[#allocation10 + $0x118] sm:$0xff]  ;;  %v479_v28 = vld [vmem:[#allocation10 + $0x120] sm:$0xff]  ;;  %v481_v31 = vld [vmem:[#allocation10 + $0x130] sm:$0xff] }
  0x6e   :  { %244 = vmatmul.mubr.f32.vlgmr.msra.gmra.mrb[0].mxu0 %v85_v46  ;;  %v482_v25 = vld [vmem:[#allocation10 + $0x138] sm:$0xff]  ;;  %v484_v33 = vld [vmem:[#allocation10 + $0x148] sm:$0xff]  ;;  %v89_v35 = vld [vmem:[#allocation5 + $0x20] sm:$0xff]  ;;  %v3190_v36 = vpack.c.bf16 %v479_v28, %v475_v27  ;;  %v3194_v40 = vpack.c.bf16 %v481_v31, %v477_v30  ;;  %v159_v28 = vlaneseq }
  0x6f   :  { %357 = vmatmul.mubr.f32.vlgmr.msra.gmra.mrb[0].mxu1 %v85_v46  ;;  %2162 = vmatpush1.bf16.msra.mxu0 %v3137_v47  ;;  %v3187_v32 = vpack.c.bf16 %v482_v25, %v478_v24  ;;  %v488_v34 = vld [vmem:[#allocation10 + $0x168] sm:$0xff]  ;;  %v486_v37 = vld [vmem:[#allocation10 + $0x158] sm:$0xff]  ;;  %v483_v42 = vld [vmem:[#allocation10 + $0x140] sm:$0xff] }
  0x70   :  { %2194 = vmatpush1.bf16.msra.mxu1 %v3140_v50  ;;  %249 = vmatprep.mubr.f32.mxu0 %v3025_v0  ;;  %v490_v39 = vld [vmem:[#allocation10 + $0x178] sm:$0xff]  ;;  %v487_v43 = vld [vmem:[#allocation10 + $0x160] sm:$0xff]  ;;  %v3198_v44 = vpack.c.bf16 %v488_v34, %v484_v33  ;;  %v485_v45 = vld [vmem:[#allocation10 + $0x150] sm:$0xff]  ;;  %v160_v30 = vshrl.u32 %v159_v28, 7 }
  0x71   :  { %362 = vmatprep.mubr.f32.mxu1 %v3025_v0  ;;  %2164 = vmatprep.subr.bf16.mxu0 %v3143_v53  ;;  %v489_v46 = vld [vmem:[#allocation10 + $0x170] sm:$0xff]  ;;  %v3201_v48 = vpack.c.bf16 %v490_v39, %v486_v37  ;;  %v492_v49 = vld [vmem:[#allocation10 + $0x188] sm:$0xff]  ;;  %v3204_v54 = vpack.c.bf16 %v487_v43, %v483_v42  ;;  %v494_v55 = vld [vmem:[#allocation10 + $0x198] sm:$0xff] }
  0x72   :  { %250 = vmatmul.mubr.f32.gmra.mrb[2].mxu0 %v86_v59  ;;  %2196 = vmatprep.subr.bf16.mxu1 %v3145_v56  ;;  %v496_v51 = vld [vmem:[#allocation10 + $0x1a8] sm:$0xff]  ;;  %v498_v57 = vld [vmem:[#allocation10 + $0x1b8] sm:$0xff]  ;;  %v3208_v58 = vpack.c.bf16 %v489_v46, %v485_v45  ;;  %v495_v61 = vld [vmem:[#allocation10 + $0x1a0] sm:$0xff]  ;;  %v161_v31 = vsub.s32 0, %v160_v30  ;;  %v165_v34 = vsub.s32 1, %v160_v30  ;;  %v169_v42 = vsub.s32 2, %v160_v30 }
  0x73   :  { %363 = vmatmul.mubr.f32.gmra.mrb[2].mxu1 %v86_v59  ;;  %2166 = vmatpush1.bf16.msra.mxu0 %v3148_v60  ;;  %v90_v52 = vld [vmem:[#allocation5 + $0x28] sm:$0xff]  ;;  %v491_v59 = vld [vmem:[#allocation10 + $0x180] sm:$0xff]  ;;  %v3212_v62 = vpack.c.bf16 %v496_v51, %v492_v49  ;;  %v493_v1 = vld [vmem:[#allocation10 + $0x190] sm:$0xff]  ;;  %v3215_v4 = vpack.c.bf16 %v498_v57, %v494_v55 }
  0x74   :  { %2198 = vmatpush1.bf16.msra.mxu1 %v3152_v63  ;;  %255 = vmatprep.mubr.f32.mxu0 %v3025_v0  ;;  %v497_v2 = vld [vmem:[#allocation10 + $0x1b0] sm:$0xff]  ;;  %v500_v5 = vld [vmem:[#allocation10 + $0x1c8] sm:$0xff]  ;;  %v502_v11 = vld [vmem:[#allocation10 + $0x1d8] sm:$0xff] }
  0x75   :  { %368 = vmatprep.mubr.f32.mxu1 %v3025_v0  ;;  %2168 = vmatprep.subr.bf16.mxu0 %v3156_v3  ;;  %v504_v7 = vld [vmem:[#allocation10 + $0x1e8] sm:$0xff]  ;;  %v91_v8 = vld [vmem:[#allocation5 + $0x30] sm:$0xff]  ;;  %v506_v12 = vld [vmem:[#allocation10 + $0x1f8] sm:$0xff]  ;;  %v3222_v14 = vpack.c.bf16 %v497_v2, %v493_v1 }
  0x76   :  { %256 = vmatmul.mubr.f32.gmra.mrb[4].mxu0 %v87_v9  ;;  %2200 = vmatprep.subr.bf16.mxu1 %v3159_v6  ;;  %v499_v15 = vld [vmem:[#allocation10 + $0x1c0] sm:$0xff]  ;;  %v3226_v18 = vpack.c.bf16 %v504_v7, %v500_v5  ;;  %v501_v20 = vld [vmem:[#allocation10 + $0x1d0] sm:$0xff]  ;;  %v92_v24 = vld [vmem:[#allocation5 + $0x38] sm:$0xff] }
  0x77   :  { %369 = vmatmul.mubr.f32.gmra.mrb[4].mxu1 %v87_v9  ;;  %2170 = vmatpush1.bf16.msra.mxu0 %v3162_v10  ;;  %v3218_v9 = vpack.c.bf16 %v495_v61, %v491_v59  ;;  %v503_v17 = vld [vmem:[#allocation10 + $0x1e0] sm:$0xff]  ;;  %v505_v21 = vld [vmem:[#allocation10 + $0x1f0] sm:$0xff]  ;;  %v173_v59 = vsub.s32 3, %v160_v30 }
  0x78   :  { %2202 = vmatpush1.bf16.msra.mxu1 %v3166_v13  ;;  %261 = vmatprep.mubr.f32.mxu0 %v3025_v0  ;;  %v3232_v25 = vpack.c.bf16 %v503_v17, %v499_v15  ;;  %v3236_v27 = vpack.c.bf16 %v505_v21, %v501_v20  ;;  %v157_v33 = vld [vmem:[%s3575_s3] sm:$0xf] }
  0x79   :  { %374 = vmatprep.mubr.f32.mxu1 %v3025_v0  ;;  %2172 = vmatprep.subr.bf16.mxu0 %v3170_v16  ;;  %v3288_v37 = vrot.slane %v157_v33, %v165_v34  ;;  %v3292_v55 = vrot.slane %v157_v33, %v169_v42  ;;  %v3295_v1 = vrot.slane %v157_v33, %v173_v59 }
  0x7a   :  { %262 = vmatmul.mubr.f32.gmra.mrb[6].mxu0 %v88_v22  ;;  %2204 = vmatprep.subr.bf16.mxu1 %v3173_v19 }
  0x7b   :  { %375 = vmatmul.mubr.f32.gmra.mrb[6].mxu1 %v88_v22  ;;  %2174 = vmatpush1.bf16.msra.mxu0 %v3176_v23  ;;  %v3229_v22 = vpack.c.bf16 %v506_v12, %v502_v11 }
  0x7c   :  { %2206 = vmatpush1.bf16.msra.mxu1 %v3180_v26  ;;  %267 = vmatprep.mubr.f32.mxu0 %v3025_v0 }
  0x7d   :  { %380 = vmatprep.mubr.f32.mxu1 %v3025_v0  ;;  %2176 = vmatprep.subr.bf16.mxu0 %v3184_v29 }
  0x7e   :  { %268 = vmatmul.mubr.f32.gmra.mrb[8].mxu0 %v89_v35  ;;  %2208 = vmatprep.subr.bf16.mxu1 %v3187_v32 }
  0x7f   :  { %381 = vmatmul.mubr.f32.gmra.mrb[8].mxu1 %v89_v35  ;;  %2178 = vmatpush1.bf16.msra.mxu0 %v3190_v36  ;;  %v3286_v35 = vrot.slane %v157_v33, %v161_v31 }
  0x80   :  { %2210 = vmatpush1.bf16.msra.mxu1 %v3194_v40  ;;  %273 = vmatprep.mubr.f32.mxu0 %v3025_v0 }
  0x81   :  { %386 = vmatprep.mubr.f32.mxu1 %v3025_v0  ;;  %2180 = vmatprep.subr.bf16.mxu0 %v3198_v44 }
  0x82   :  { %274 = vmatmul.mubr.f32.gmra.mrb[10].mxu0 %v90_v52  ;;  %2212 = vmatprep.subr.bf16.mxu1 %v3201_v48 }
  0x83   :  { %387 = vmatmul.mubr.f32.gmra.mrb[10].mxu1 %v90_v52  ;;  %2182 = vmatpush1.bf16.msra.mxu0 %v3204_v54 }
  0x84   :  { %2214 = vmatpush1.bf16.msra.mxu1 %v3208_v58  ;;  %279 = vmatprep.mubr.f32.mxu0 %v3025_v0 }
  0x85   :  { %392 = vmatprep.mubr.f32.mxu1 %v3025_v0  ;;  %2184 = vmatprep.subr.bf16.mxu0 %v3212_v62 }
  0x86   :  { %280 = vmatmul.mubr.f32.gmra.mrb[12].mxu0 %v91_v8  ;;  %2216 = vmatprep.subr.bf16.mxu1 %v3215_v4 }
  0x87   :  { %393 = vmatmul.mubr.f32.gmra.mrb[12].mxu1 %v91_v8  ;;  %2186 = vmatpush1.bf16.msra.mxu0 %v3218_v9 }
  0x88   :  { %2218 = vmatpush1.bf16.msra.mxu1 %v3222_v14  ;;  %285 = vmatprep.mubr.f32.mxu0 %v3025_v0 }
  0x89   :  { %398 = vmatprep.mubr.f32.mxu1 %v3025_v0  ;;  %2188 = vmatprep.subr.bf16.mxu0 %v3226_v18 }
  0x8a   :  { %286 = vmatmul.mubr.f32.gmra.mrb[14].mxu0 %v92_v24  ;;  %2220 = vmatprep.subr.bf16.mxu1 %v3229_v22 }
  0x8b   :  { %399 = vmatmul.mubr.f32.gmra.mrb[14].mxu1 %v92_v24  ;;  %2190 = vmatpush1.bf16.msra.mxu0 %v3232_v25 }
  0x8c   :  { %2222 = vmatpush1.bf16.msra.mxu1 %v3236_v27  ;;  %571 = vmatprep.mubr.f32.mxu0 %v3025_v0 }
  0x8d   :  { %642 = vmatprep.mubr.f32.mxu1 %v3025_v0  ;;  %2224 = vmatprep.subr.bf16.mxu0 %v3133_v38 }
  0x8e   :  { %572 = vmatmul.mubr.f32.vlgmr.msra.gmra.mrb[0].mxu0 %v3025_v0  ;;  %2256 = vmatprep.subr.bf16.mxu1 %v3135_v41 }
  0x8f   :  { %643 = vmatmul.mubr.f32.vlgmr.msra.gmra.mrb[0].mxu1 %v3025_v0  ;;  %2226 = vmatpush1.bf16.msra.mxu0 %v3137_v47 }
  0x90   :  { %2258 = vmatpush1.bf16.msra.mxu1 %v3140_v50  ;;  %2228 = vmatprep.subr.bf16.mxu0 %v3143_v53 }
  0x91   :  { %2260 = vmatprep.subr.bf16.mxu1 %v3145_v56  ;;  %746 = vmatprep.mubr.f32.mxu0 %v3025_v0 }
  0x92   :  { %817 = vmatprep.mubr.f32.mxu1 %v3025_v0 }
  0x93   :  { %2230 = vmatpush1.bf16.msra.mxu0 %v3148_v60 }
  0x94   :  { %2262 = vmatpush1.bf16.msra.mxu1 %v3152_v63  ;;  %2232 = vmatprep.subr.bf16.mxu0 %v3156_v3 }
  0x95   :  { %2264 = vmatprep.subr.bf16.mxu1 %v3159_v6 }
  0x97   :  { %2234 = vmatpush1.bf16.msra.mxu0 %v3162_v10 }
  0x98   :  { %2266 = vmatpush1.bf16.msra.mxu1 %v3166_v13  ;;  %2236 = vmatprep.subr.bf16.mxu0 %v3170_v16 }
  0x99   :  { %2268 = vmatprep.subr.bf16.mxu1 %v3173_v19 }
  0x9b   :  { %2238 = vmatpush1.bf16.msra.mxu0 %v3176_v23 }
  0x9c   :  { %2270 = vmatpush1.bf16.msra.mxu1 %v3180_v26  ;;  %2240 = vmatprep.subr.bf16.mxu0 %v3184_v29 }
  0x9d   :  { %2272 = vmatprep.subr.bf16.mxu1 %v3187_v32 }
  0x9f   :  { %2242 = vmatpush1.bf16.msra.mxu0 %v3190_v36 }
  0xa0   :  { %2274 = vmatpush1.bf16.msra.mxu1 %v3194_v40  ;;  %2244 = vmatprep.subr.bf16.mxu0 %v3198_v44 }
  0xa1   :  { %2276 = vmatprep.subr.bf16.mxu1 %v3201_v48 }
  0xa3   :  { %2246 = vmatpush1.bf16.msra.mxu0 %v3204_v54 }
  0xa4   :  { %2278 = vmatpush1.bf16.msra.mxu1 %v3208_v58  ;;  %2248 = vmatprep.subr.bf16.mxu0 %v3212_v62 }
  0xa5   :  { %2280 = vmatprep.subr.bf16.mxu1 %v3215_v4 }
  0xa7   :  { %2250 = vmatpush1.bf16.msra.mxu0 %v3218_v9 }
  0xa8   :  { %2282 = vmatpush1.bf16.msra.mxu1 %v3222_v14  ;;  %2252 = vmatprep.subr.bf16.mxu0 %v3226_v18 }
  0xa9   :  { %2284 = vmatprep.subr.bf16.mxu1 %v3229_v22 }
  0xab   :  { %2254 = vmatpush1.bf16.msra.mxu0 %v3232_v25 }
  0xac   :  { %2286 = vmatpush1.bf16.msra.mxu1 %v3236_v27  ;;  %2288 = vmatprep.subr.bf16.mxu0 %v3133_v38 }
  0xad   :  { %2320 = vmatprep.subr.bf16.mxu1 %v3135_v41 }
 0x161   :  { %v573_v39 = vpop.f32.mrb[0].mxu0 }
 0x162   :  { %v2695_v43 = vadd.f32 %v573_v39, %v3286_v35  ;;  %v644_v45 = vpop.f32.mrb[0].mxu1  ;;  %v575_v46 = vpop.f32.mrb[1].mxu0 }
 0x163   :  { %v2696_v49 = vadd.f32 %v575_v46, %v3288_v37  ;;  %v646_v51 = vpop.f32.mrb[1].mxu1  ;;  %v2711_v61 = vadd.f32 %v644_v45, %v3292_v55 }
 0x164   :  { %v2018_v52 = vmul.f32 -1.442695, %v2695_v43  ;;  %v2712_v5 = vadd.f32 %v646_v51, %v3295_v1 }
 0x165   :  { %v2019_v57 = vmul.f32 -1.442695, %v2696_v49  ;;  %v2020_v2 = vmul.f32 -1.442695, %v2711_v61 }
 0x166   :  { %2771 = vpow2.f32 %v2018_v52 }
 0x167   :  { %2773 = vpow2.f32 %v2019_v57 }
 0x168   :  { %2775 = vpow2.f32 %v2020_v2 }
 0x169   :  { %2777 = vtanh.f32 %v2712_v5 }
 0x170   :  { %v2772_v7 = vpop.eup %2771 }
 0x171   :  { %v662_v8 = vadd.f32 1.0, %v2772_v7  ;;  %v2774_v11 = vpop.eup %2773 }
 0x172   :  { %v663_v12 = vadd.f32 1.0, %v2774_v11  ;;  %v2776_v15 = vpop.eup %2775 }
 0x173   :  { %2779 = vrcp.f32 %v662_v8  ;;  %v2778_v17 = vpop.eup %2777  ;;  %v664_v28 = vadd.f32 1.0, %v2776_v15 }
 0x174   :  { %2781 = vrcp.f32 %v663_v12 }
 0x175   :  { %2783 = vrcp.f32 %v664_v28 }
 0x17d   :  { %v2780_v20 = vpop.eup %2779 }
 0x17e   :  { %v673_v21 = vmul.f32 %v2780_v20, %v2778_v17  ;;  %v2782_v24 = vpop.eup %2781 }
 0x17f   :  { %v672_v30 = vmul.f32 0.0, %v2782_v24  ;;  %v2784_v33 = vpop.eup %2783 }
 0x181   :  { %v3298_v31 = vadd.f32 %v673_v21, %v672_v30 }
 0x183   :  { %2785 = vtanh.f32 %v3298_v31 }
 0x18d   :  { %v2786_v34 = vpop.eup %2785 }
 0x18e   :  { %v676_v39 = vmul.f32 %v2786_v34, %v2784_v33 }
 0x190   :  { %747 = vmatmul.mubr.f32.vlgmr.msra.gmra.mrb[2].mxu0 %v676_v39  ;;  %818 = vmatmul.mubr.f32.vlgmr.msra.gmra.mrb[2].mxu1 %v676_v39 }
 0x191   :  { %2290 = vmatpush1.bf16.msra.mxu0 %v3137_v47  ;;  %2322 = vmatpush1.bf16.msra.mxu1 %v3140_v50 }
 0x192   :  { %2292 = vmatprep.subr.bf16.mxu0 %v3143_v53  ;;  %2324 = vmatprep.subr.bf16.mxu1 %v3145_v56 }
 0x193   :  { %921 = vmatprep.mubr.f32.mxu0 %v3025_v0  ;;  %992 = vmatprep.mubr.f32.mxu1 %v3025_v0 }
 0x195   :  { %2294 = vmatpush1.bf16.msra.mxu0 %v3148_v60  ;;  %2326 = vmatpush1.bf16.msra.mxu1 %v3152_v63 }
 0x196   :  { %2296 = vmatprep.subr.bf16.mxu0 %v3156_v3  ;;  %2328 = vmatprep.subr.bf16.mxu1 %v3159_v6 }
 0x199   :  { %2298 = vmatpush1.bf16.msra.mxu0 %v3162_v10  ;;  %2330 = vmatpush1.bf16.msra.mxu1 %v3166_v13 }
 0x19a   :  { %2300 = vmatprep.subr.bf16.mxu0 %v3170_v16  ;;  %2332 = vmatprep.subr.bf16.mxu1 %v3173_v19 }
 0x19d   :  { %2302 = vmatpush1.bf16.msra.mxu0 %v3176_v23  ;;  %2334 = vmatpush1.bf16.msra.mxu1 %v3180_v26 }
 0x19e   :  { %2304 = vmatprep.subr.bf16.mxu0 %v3184_v29  ;;  %2336 = vmatprep.subr.bf16.mxu1 %v3187_v32 }
 0x1a1   :  { %2306 = vmatpush1.bf16.msra.mxu0 %v3190_v36  ;;  %2338 = vmatpush1.bf16.msra.mxu1 %v3194_v40 }
 0x1a2   :  { %2308 = vmatprep.subr.bf16.mxu0 %v3198_v44  ;;  %2340 = vmatprep.subr.bf16.mxu1 %v3201_v48 }
 0x1a5   :  { %2310 = vmatpush1.bf16.msra.mxu0 %v3204_v54  ;;  %2342 = vmatpush1.bf16.msra.mxu1 %v3208_v58 }
 0x1a6   :  { %2312 = vmatprep.subr.bf16.mxu0 %v3212_v62  ;;  %2344 = vmatprep.subr.bf16.mxu1 %v3215_v4 }
 0x1a9   :  { %2314 = vmatpush1.bf16.msra.mxu0 %v3218_v9  ;;  %2346 = vmatpush1.bf16.msra.mxu1 %v3222_v14 }
 0x1aa   :  { %2316 = vmatprep.subr.bf16.mxu0 %v3226_v18  ;;  %2348 = vmatprep.subr.bf16.mxu1 %v3229_v22 }
 0x1ad   :  { %2318 = vmatpush1.bf16.msra.mxu0 %v3232_v25  ;;  %2350 = vmatpush1.bf16.msra.mxu1 %v3236_v27 }
 0x1ae   :  { %2352 = vmatprep.subr.bf16.mxu0 %v3133_v38  ;;  %2384 = vmatprep.subr.bf16.mxu1 %v3135_v41 }
 0x263   :  { %v748_v42 = vpop.f32.mrb[2].mxu0  ;;  %v819_v43 = vpop.f32.mrb[2].mxu1 }
 0x264   :  { %v2697_v45 = vadd.f32 %v748_v42, %v3286_v35  ;;  %v750_v46 = vpop.f32.mrb[3].mxu0  ;;  %v821_v49 = vpop.f32.mrb[3].mxu1  ;;  %v2713_v59 = vadd.f32 %v819_v43, %v3292_v55 }
 0x265   :  { %v2698_v51 = vadd.f32 %v750_v46, %v3288_v37  ;;  %v2714_v61 = vadd.f32 %v821_v49, %v3295_v1 }
 0x266   :  { %v2021_v52 = vmul.f32 -1.442695, %v2697_v45  ;;  %v2023_v2 = vmul.f32 -1.442695, %v2713_v59 }
 0x267   :  { %v2022_v57 = vmul.f32 -1.442695, %v2698_v51 }
 0x268   :  { %2787 = vpow2.f32 %v2021_v52 }
 0x269   :  { %2789 = vpow2.f32 %v2022_v57 }
 0x26a   :  { %2791 = vtanh.f32 %v2714_v61 }
 0x26b   :  { %2793 = vpow2.f32 %v2023_v2 }
 0x272   :  { %v2788_v5 = vpop.eup %2787 }
 0x273   :  { %v837_v7 = vadd.f32 1.0, %v2788_v5  ;;  %v2790_v8 = vpop.eup %2789 }
 0x274   :  { %v838_v11 = vadd.f32 1.0, %v2790_v8  ;;  %v2792_v12 = vpop.eup %2791 }
 0x275   :  { %2795 = vrcp.f32 %v837_v7  ;;  %v2794_v15 = vpop.eup %2793 }
 0x276   :  { %2797 = vrcp.f32 %v838_v11  ;;  %v839_v24 = vadd.f32 1.0, %v2794_v15 }
 0x278   :  { %2799 = vrcp.f32 %v839_v24 }
 0x27f   :  { %v2796_v17 = vpop.eup %2795 }
 0x280   :  { %v848_v20 = vmul.f32 %v2796_v17, %v2792_v12  ;;  %v2798_v21 = vpop.eup %2797 }
 0x281   :  { %v847_v28 = vmul.f32 %v2798_v21, %v3298_v31 }
 0x282   :  { %v2800_v33 = vpop.eup %2799 }
 0x283   :  { %v3340_v30 = vadd.f32 %v848_v20, %v847_v28 }
 0x285   :  { %2801 = vtanh.f32 %v3340_v30 }
 0x28f   :  { %v2802_v34 = vpop.eup %2801 }
 0x290   :  { %v851_v39 = vmul.f32 %v2802_v34, %v2800_v33 }
 0x292   :  { %922 = vmatmul.mubr.f32.vlgmr.msra.gmra.mrb[4].mxu0 %v851_v39  ;;  %993 = vmatmul.mubr.f32.vlgmr.msra.gmra.mrb[4].mxu1 %v851_v39 }
 0x293   :  { %2354 = vmatpush1.bf16.msra.mxu0 %v3137_v47  ;;  %2386 = vmatpush1.bf16.msra.mxu1 %v3140_v50 }
 0x294   :  { %2356 = vmatprep.subr.bf16.mxu0 %v3143_v53  ;;  %2388 = vmatprep.subr.bf16.mxu1 %v3145_v56 }
 0x295   :  { %1096 = vmatprep.mubr.f32.mxu0 %v3025_v0  ;;  %1167 = vmatprep.mubr.f32.mxu1 %v3025_v0 }
 0x297   :  { %2358 = vmatpush1.bf16.msra.mxu0 %v3148_v60  ;;  %2390 = vmatpush1.bf16.msra.mxu1 %v3152_v63 }
 0x298   :  { %2360 = vmatprep.subr.bf16.mxu0 %v3156_v3  ;;  %2392 = vmatprep.subr.bf16.mxu1 %v3159_v6 }
 0x29b   :  { %2362 = vmatpush1.bf16.msra.mxu0 %v3162_v10  ;;  %2394 = vmatpush1.bf16.msra.mxu1 %v3166_v13 }
 0x29c   :  { %2364 = vmatprep.subr.bf16.mxu0 %v3170_v16  ;;  %2396 = vmatprep.subr.bf16.mxu1 %v3173_v19 }
 0x29f   :  { %2366 = vmatpush1.bf16.msra.mxu0 %v3176_v23  ;;  %2398 = vmatpush1.bf16.msra.mxu1 %v3180_v26 }
 0x2a0   :  { %2368 = vmatprep.subr.bf16.mxu0 %v3184_v29  ;;  %2400 = vmatprep.subr.bf16.mxu1 %v3187_v32 }
 0x2a3   :  { %2370 = vmatpush1.bf16.msra.mxu0 %v3190_v36  ;;  %2402 = vmatpush1.bf16.msra.mxu1 %v3194_v40 }
 0x2a4   :  { %2372 = vmatprep.subr.bf16.mxu0 %v3198_v44  ;;  %2404 = vmatprep.subr.bf16.mxu1 %v3201_v48 }
 0x2a7   :  { %2374 = vmatpush1.bf16.msra.mxu0 %v3204_v54  ;;  %2406 = vmatpush1.bf16.msra.mxu1 %v3208_v58 }
 0x2a8   :  { %2376 = vmatprep.subr.bf16.mxu0 %v3212_v62  ;;  %2408 = vmatprep.subr.bf16.mxu1 %v3215_v4 }
 0x2ab   :  { %2378 = vmatpush1.bf16.msra.mxu0 %v3218_v9  ;;  %2410 = vmatpush1.bf16.msra.mxu1 %v3222_v14 }
 0x2ac   :  { %2380 = vmatprep.subr.bf16.mxu0 %v3226_v18  ;;  %2412 = vmatprep.subr.bf16.mxu1 %v3229_v22 }
 0x2af   :  { %2382 = vmatpush1.bf16.msra.mxu0 %v3232_v25  ;;  %2414 = vmatpush1.bf16.msra.mxu1 %v3236_v27 }
 0x2b0   :  { %2416 = vmatprep.subr.bf16.mxu0 %v3133_v38  ;;  %2448 = vmatprep.subr.bf16.mxu1 %v3135_v41 }
 0x365   :  { %v923_v31 = vpop.f32.mrb[4].mxu0  ;;  %v994_v42 = vpop.f32.mrb[4].mxu1 }
 0x366   :  { %v2699_v43 = vadd.f32 %v923_v31, %v3286_v35  ;;  %v925_v45 = vpop.f32.mrb[5].mxu0  ;;  %v996_v46 = vpop.f32.mrb[5].mxu1  ;;  %v2715_v57 = vadd.f32 %v994_v42, %v3292_v55 }
 0x367   :  { %v2700_v49 = vadd.f32 %v925_v45, %v3288_v37  ;;  %v2716_v59 = vadd.f32 %v996_v46, %v3295_v1 }
 0x368   :  { %v2024_v51 = vmul.f32 -1.442695, %v2699_v43  ;;  %v2026_v61 = vmul.f32 -1.442695, %v2715_v57 }
 0x369   :  { %v2025_v52 = vmul.f32 -1.442695, %v2700_v49 }
 0x36a   :  { %2803 = vpow2.f32 %v2024_v51 }
 0x36b   :  { %2805 = vpow2.f32 %v2025_v52 }
 0x36c   :  { %2807 = vtanh.f32 %v2716_v59 }
 0x36d   :  { %2809 = vpow2.f32 %v2026_v61 }
 0x374   :  { %v2804_v2 = vpop.eup %2803 }
 0x375   :  { %v1012_v5 = vadd.f32 1.0, %v2804_v2  ;;  %v2806_v7 = vpop.eup %2805 }
 0x376   :  { %v1013_v8 = vadd.f32 1.0, %v2806_v7  ;;  %v2808_v11 = vpop.eup %2807 }
 0x377   :  { %2811 = vrcp.f32 %v1012_v5  ;;  %v2810_v12 = vpop.eup %2809 }
 0x378   :  { %2813 = vrcp.f32 %v1013_v8  ;;  %v1014_v21 = vadd.f32 1.0, %v2810_v12 }
 0x37a   :  { %2815 = vrcp.f32 %v1014_v21 }
 0x381   :  { %v2812_v15 = vpop.eup %2811 }
 0x382   :  { %v1023_v17 = vmul.f32 %v2812_v15, %v2808_v11  ;;  %v2814_v20 = vpop.eup %2813 }
 0x383   :  { %v1022_v24 = vmul.f32 %v2814_v20, %v3340_v30 }
 0x384   :  { %v2816_v33 = vpop.eup %2815 }
 0x385   :  { %v3382_v28 = vadd.f32 %v1023_v17, %v1022_v24 }
 0x387   :  { %2817 = vtanh.f32 %v3382_v28 }
 0x391   :  { %v2818_v34 = vpop.eup %2817 }
 0x392   :  { %v1026_v39 = vmul.f32 %v2818_v34, %v2816_v33 }
 0x394   :  { %1097 = vmatmul.mubr.f32.vlgmr.msra.gmra.mrb[6].mxu0 %v1026_v39  ;;  %1168 = vmatmul.mubr.f32.vlgmr.msra.gmra.mrb[6].mxu1 %v1026_v39 }
 0x395   :  { %2418 = vmatpush1.bf16.msra.mxu0 %v3137_v47  ;;  %2450 = vmatpush1.bf16.msra.mxu1 %v3140_v50 }
 0x396   :  { %2420 = vmatprep.subr.bf16.mxu0 %v3143_v53  ;;  %2452 = vmatprep.subr.bf16.mxu1 %v3145_v56 }
 0x397   :  { %1271 = vmatprep.mubr.f32.mxu0 %v3025_v0  ;;  %1342 = vmatprep.mubr.f32.mxu1 %v3025_v0 }
 0x399   :  { %2422 = vmatpush1.bf16.msra.mxu0 %v3148_v60  ;;  %2454 = vmatpush1.bf16.msra.mxu1 %v3152_v63 }
 0x39a   :  { %2424 = vmatprep.subr.bf16.mxu0 %v3156_v3  ;;  %2456 = vmatprep.subr.bf16.mxu1 %v3159_v6 }
 0x39d   :  { %2426 = vmatpush1.bf16.msra.mxu0 %v3162_v10  ;;  %2458 = vmatpush1.bf16.msra.mxu1 %v3166_v13 }
 0x39e   :  { %2428 = vmatprep.subr.bf16.mxu0 %v3170_v16  ;;  %2460 = vmatprep.subr.bf16.mxu1 %v3173_v19 }
 0x3a1   :  { %2430 = vmatpush1.bf16.msra.mxu0 %v3176_v23  ;;  %2462 = vmatpush1.bf16.msra.mxu1 %v3180_v26 }
 0x3a2   :  { %2432 = vmatprep.subr.bf16.mxu0 %v3184_v29  ;;  %2464 = vmatprep.subr.bf16.mxu1 %v3187_v32 }
 0x3a5   :  { %2434 = vmatpush1.bf16.msra.mxu0 %v3190_v36  ;;  %2466 = vmatpush1.bf16.msra.mxu1 %v3194_v40 }
 0x3a6   :  { %2436 = vmatprep.subr.bf16.mxu0 %v3198_v44  ;;  %2468 = vmatprep.subr.bf16.mxu1 %v3201_v48 }
 0x3a9   :  { %2438 = vmatpush1.bf16.msra.mxu0 %v3204_v54  ;;  %2470 = vmatpush1.bf16.msra.mxu1 %v3208_v58 }
 0x3aa   :  { %2440 = vmatprep.subr.bf16.mxu0 %v3212_v62  ;;  %2472 = vmatprep.subr.bf16.mxu1 %v3215_v4 }
 0x3ad   :  { %2442 = vmatpush1.bf16.msra.mxu0 %v3218_v9  ;;  %2474 = vmatpush1.bf16.msra.mxu1 %v3222_v14 }
 0x3ae   :  { %2444 = vmatprep.subr.bf16.mxu0 %v3226_v18  ;;  %2476 = vmatprep.subr.bf16.mxu1 %v3229_v22 }
 0x3b1   :  { %2446 = vmatpush1.bf16.msra.mxu0 %v3232_v25  ;;  %2478 = vmatpush1.bf16.msra.mxu1 %v3236_v27 }
 0x3b2   :  { %2480 = vmatprep.subr.bf16.mxu0 %v3133_v38  ;;  %2512 = vmatprep.subr.bf16.mxu1 %v3135_v41 }
 0x467   :  { %v1098_v30 = vpop.f32.mrb[6].mxu0  ;;  %v1169_v31 = vpop.f32.mrb[6].mxu1 }
 0x468   :  { %v2701_v42 = vadd.f32 %v1098_v30, %v3286_v35  ;;  %v1100_v43 = vpop.f32.mrb[7].mxu0  ;;  %v1171_v45 = vpop.f32.mrb[7].mxu1  ;;  %v2717_v52 = vadd.f32 %v1169_v31, %v3292_v55 }
 0x469   :  { %v2702_v46 = vadd.f32 %v1100_v43, %v3288_v37  ;;  %v2718_v57 = vadd.f32 %v1171_v45, %v3295_v1 }
 0x46a   :  { %v2027_v49 = vmul.f32 -1.442695, %v2701_v42  ;;  %v2029_v59 = vmul.f32 -1.442695, %v2717_v52 }
 0x46b   :  { %v2028_v51 = vmul.f32 -1.442695, %v2702_v46 }
 0x46c   :  { %2819 = vpow2.f32 %v2027_v49 }
 0x46d   :  { %2821 = vpow2.f32 %v2028_v51 }
 0x46e   :  { %2823 = vtanh.f32 %v2718_v57 }
 0x46f   :  { %2825 = vpow2.f32 %v2029_v59 }
 0x476   :  { %v2820_v61 = vpop.eup %2819 }
 0x477   :  { %v1187_v2 = vadd.f32 1.0, %v2820_v61  ;;  %v2822_v5 = vpop.eup %2821 }
 0x478   :  { %v1188_v7 = vadd.f32 1.0, %v2822_v5  ;;  %v2824_v8 = vpop.eup %2823 }
 0x479   :  { %2827 = vrcp.f32 %v1187_v2  ;;  %v2826_v11 = vpop.eup %2825 }
 0x47a   :  { %2829 = vrcp.f32 %v1188_v7  ;;  %v1189_v20 = vadd.f32 1.0, %v2826_v11 }
 0x47c   :  { %2831 = vrcp.f32 %v1189_v20 }
 0x483   :  { %v2828_v12 = vpop.eup %2827 }
 0x484   :  { %v1198_v15 = vmul.f32 %v2828_v12, %v2824_v8  ;;  %v2830_v17 = vpop.eup %2829 }
 0x485   :  { %v1197_v21 = vmul.f32 %v2830_v17, %v3382_v28 }
 0x486   :  { %v2832_v33 = vpop.eup %2831 }
 0x487   :  { %v3424_v24 = vadd.f32 %v1198_v15, %v1197_v21 }
 0x489   :  { %2833 = vtanh.f32 %v3424_v24 }
 0x493   :  { %v2834_v34 = vpop.eup %2833 }
 0x494   :  { %v1201_v39 = vmul.f32 %v2834_v34, %v2832_v33 }
 0x496   :  { %1272 = vmatmul.mubr.f32.vlgmr.msra.gmra.mrb[8].mxu0 %v1201_v39  ;;  %1343 = vmatmul.mubr.f32.vlgmr.msra.gmra.mrb[8].mxu1 %v1201_v39 }
 0x497   :  { %2482 = vmatpush1.bf16.msra.mxu0 %v3137_v47  ;;  %2514 = vmatpush1.bf16.msra.mxu1 %v3140_v50 }
 0x498   :  { %2484 = vmatprep.subr.bf16.mxu0 %v3143_v53  ;;  %2516 = vmatprep.subr.bf16.mxu1 %v3145_v56 }
 0x499   :  { %1446 = vmatprep.mubr.f32.mxu0 %v3025_v0  ;;  %1517 = vmatprep.mubr.f32.mxu1 %v3025_v0 }
 0x49b   :  { %2486 = vmatpush1.bf16.msra.mxu0 %v3148_v60  ;;  %2518 = vmatpush1.bf16.msra.mxu1 %v3152_v63 }
 0x49c   :  { %2488 = vmatprep.subr.bf16.mxu0 %v3156_v3  ;;  %2520 = vmatprep.subr.bf16.mxu1 %v3159_v6 }
 0x49f   :  { %2490 = vmatpush1.bf16.msra.mxu0 %v3162_v10  ;;  %2522 = vmatpush1.bf16.msra.mxu1 %v3166_v13 }
 0x4a0   :  { %2492 = vmatprep.subr.bf16.mxu0 %v3170_v16  ;;  %2524 = vmatprep.subr.bf16.mxu1 %v3173_v19 }
 0x4a3   :  { %2494 = vmatpush1.bf16.msra.mxu0 %v3176_v23  ;;  %2526 = vmatpush1.bf16.msra.mxu1 %v3180_v26 }
 0x4a4   :  { %2496 = vmatprep.subr.bf16.mxu0 %v3184_v29  ;;  %2528 = vmatprep.subr.bf16.mxu1 %v3187_v32 }
 0x4a7   :  { %2498 = vmatpush1.bf16.msra.mxu0 %v3190_v36  ;;  %2530 = vmatpush1.bf16.msra.mxu1 %v3194_v40 }
 0x4a8   :  { %2500 = vmatprep.subr.bf16.mxu0 %v3198_v44  ;;  %2532 = vmatprep.subr.bf16.mxu1 %v3201_v48 }
 0x4ab   :  { %2502 = vmatpush1.bf16.msra.mxu0 %v3204_v54  ;;  %2534 = vmatpush1.bf16.msra.mxu1 %v3208_v58 }
 0x4ac   :  { %2504 = vmatprep.subr.bf16.mxu0 %v3212_v62  ;;  %2536 = vmatprep.subr.bf16.mxu1 %v3215_v4 }
 0x4af   :  { %2506 = vmatpush1.bf16.msra.mxu0 %v3218_v9  ;;  %2538 = vmatpush1.bf16.msra.mxu1 %v3222_v14 }
 0x4b0   :  { %2508 = vmatprep.subr.bf16.mxu0 %v3226_v18  ;;  %2540 = vmatprep.subr.bf16.mxu1 %v3229_v22 }
 0x4b3   :  { %2510 = vmatpush1.bf16.msra.mxu0 %v3232_v25  ;;  %2542 = vmatpush1.bf16.msra.mxu1 %v3236_v27 }
 0x4b4   :  { %2544 = vmatprep.subr.bf16.mxu0 %v3133_v38  ;;  %2576 = vmatprep.subr.bf16.mxu1 %v3135_v41 }
 0x569   :  { %v1273_v28 = vpop.f32.mrb[8].mxu0  ;;  %v1344_v30 = vpop.f32.mrb[8].mxu1 }
 0x56a   :  { %v2703_v31 = vadd.f32 %v1273_v28, %v3286_v35  ;;  %v1275_v42 = vpop.f32.mrb[9].mxu0  ;;  %v1346_v43 = vpop.f32.mrb[9].mxu1  ;;  %v2719_v51 = vadd.f32 %v1344_v30, %v3292_v55 }
 0x56b   :  { %v2704_v45 = vadd.f32 %v1275_v42, %v3288_v37  ;;  %v2720_v52 = vadd.f32 %v1346_v43, %v3295_v1 }
 0x56c   :  { %v2030_v46 = vmul.f32 -1.442695, %v2703_v31  ;;  %v2032_v57 = vmul.f32 -1.442695, %v2719_v51 }
 0x56d   :  { %v2031_v49 = vmul.f32 -1.442695, %v2704_v45 }
 0x56e   :  { %2835 = vpow2.f32 %v2030_v46 }
 0x56f   :  { %2837 = vpow2.f32 %v2031_v49 }
 0x570   :  { %2839 = vtanh.f32 %v2720_v52 }
 0x571   :  { %2841 = vpow2.f32 %v2032_v57 }
 0x578   :  { %v2836_v59 = vpop.eup %2835 }
 0x579   :  { %v1362_v61 = vadd.f32 1.0, %v2836_v59  ;;  %v2838_v2 = vpop.eup %2837 }
 0x57a   :  { %v1363_v5 = vadd.f32 1.0, %v2838_v2  ;;  %v2840_v7 = vpop.eup %2839 }
 0x57b   :  { %2843 = vrcp.f32 %v1362_v61  ;;  %v2842_v8 = vpop.eup %2841 }
 0x57c   :  { %2845 = vrcp.f32 %v1363_v5  ;;  %v1364_v17 = vadd.f32 1.0, %v2842_v8 }
 0x57e   :  { %2847 = vrcp.f32 %v1364_v17 }
 0x585   :  { %v2844_v11 = vpop.eup %2843 }
 0x586   :  { %v1373_v12 = vmul.f32 %v2844_v11, %v2840_v7  ;;  %v2846_v15 = vpop.eup %2845 }
 0x587   :  { %v1372_v20 = vmul.f32 %v2846_v15, %v3424_v24 }
 0x588   :  { %v2848_v33 = vpop.eup %2847 }
 0x589   :  { %v3466_v21 = vadd.f32 %v1373_v12, %v1372_v20 }
 0x58b   :  { %2849 = vtanh.f32 %v3466_v21 }
 0x595   :  { %v2850_v34 = vpop.eup %2849 }
 0x596   :  { %v1376_v39 = vmul.f32 %v2850_v34, %v2848_v33  ;;  %v1910_v34 = vld [vmem:[#allocation11 + $0x18] sm:$0xff] }
 0x598   :  { %1447 = vmatmul.mubr.f32.vlgmr.msra.gmra.mrb[10].mxu0 %v1376_v39  ;;  %1518 = vmatmul.mubr.f32.vlgmr.msra.gmra.mrb[10].mxu1 %v1376_v39 }
 0x599   :  { %2546 = vmatpush1.bf16.msra.mxu0 %v3137_v47  ;;  %2578 = vmatpush1.bf16.msra.mxu1 %v3140_v50 }
 0x59a   :  { %2548 = vmatprep.subr.bf16.mxu0 %v3143_v53  ;;  %2580 = vmatprep.subr.bf16.mxu1 %v3145_v56 }
 0x59b   :  { %1621 = vmatprep.mubr.f32.mxu0 %v3025_v0  ;;  %1692 = vmatprep.mubr.f32.mxu1 %v3025_v0 }
 0x59d   :  { %2550 = vmatpush1.bf16.msra.mxu0 %v3148_v60  ;;  %2582 = vmatpush1.bf16.msra.mxu1 %v3152_v63 }
 0x59e   :  { %2552 = vmatprep.subr.bf16.mxu0 %v3156_v3  ;;  %2584 = vmatprep.subr.bf16.mxu1 %v3159_v6 }
 0x5a1   :  { %2554 = vmatpush1.bf16.msra.mxu0 %v3162_v10  ;;  %2586 = vmatpush1.bf16.msra.mxu1 %v3166_v13 }
 0x5a2   :  { %2556 = vmatprep.subr.bf16.mxu0 %v3170_v16  ;;  %2588 = vmatprep.subr.bf16.mxu1 %v3173_v19 }
 0x5a5   :  { %2558 = vmatpush1.bf16.msra.mxu0 %v3176_v23  ;;  %2590 = vmatpush1.bf16.msra.mxu1 %v3180_v26 }
 0x5a6   :  { %2560 = vmatprep.subr.bf16.mxu0 %v3184_v29  ;;  %2592 = vmatprep.subr.bf16.mxu1 %v3187_v32 }
 0x5a9   :  { %2562 = vmatpush1.bf16.msra.mxu0 %v3190_v36  ;;  %2594 = vmatpush1.bf16.msra.mxu1 %v3194_v40 }
 0x5aa   :  { %2564 = vmatprep.subr.bf16.mxu0 %v3198_v44  ;;  %2596 = vmatprep.subr.bf16.mxu1 %v3201_v48 }
 0x5ad   :  { %2566 = vmatpush1.bf16.msra.mxu0 %v3204_v54  ;;  %2598 = vmatpush1.bf16.msra.mxu1 %v3208_v58 }
 0x5ae   :  { %2568 = vmatprep.subr.bf16.mxu0 %v3212_v62  ;;  %2600 = vmatprep.subr.bf16.mxu1 %v3215_v4 }
 0x5b1   :  { %2570 = vmatpush1.bf16.msra.mxu0 %v3218_v9  ;;  %2602 = vmatpush1.bf16.msra.mxu1 %v3222_v14 }
 0x5b2   :  { %2572 = vmatprep.subr.bf16.mxu0 %v3226_v18  ;;  %2604 = vmatprep.subr.bf16.mxu1 %v3229_v22 }
 0x5b5   :  { %2574 = vmatpush1.bf16.msra.mxu0 %v3232_v25  ;;  %2606 = vmatpush1.bf16.msra.mxu1 %v3236_v27 }
 0x5b6   :  { %2608 = vmatprep.subr.bf16.mxu0 %v3133_v38  ;;  %2640 = vmatprep.subr.bf16.mxu1 %v3135_v41 }
 0x66b   :  { %v1448_v24 = vpop.f32.mrb[10].mxu0  ;;  %v1519_v28 = vpop.f32.mrb[10].mxu1 }
 0x66c   :  { %v2705_v30 = vadd.f32 %v1448_v24, %v3286_v35  ;;  %v1450_v31 = vpop.f32.mrb[11].mxu0  ;;  %v1521_v42 = vpop.f32.mrb[11].mxu1  ;;  %v2721_v49 = vadd.f32 %v1519_v28, %v3292_v55  ;;  %v1911_v24 = vld [vmem:[#allocation11 + $0x20] sm:$0xff]  ;;  %v1912_v28 = vld [vmem:[#allocation11 + $0x28] sm:$0xff] }
 0x66d   :  { %v2706_v43 = vadd.f32 %v1450_v31, %v3288_v37  ;;  %v2722_v51 = vadd.f32 %v1521_v42, %v3295_v1  ;;  %v1913_v31 = vld [vmem:[#allocation11 + $0x30] sm:$0xff]  ;;  %v1914_v42 = vld [vmem:[#allocation11 + $0x38] sm:$0xff] }
 0x66e   :  { %v2033_v45 = vmul.f32 -1.442695, %v2705_v30  ;;  %v2035_v52 = vmul.f32 -1.442695, %v2721_v49  ;;  %v2678_v30 = vpack.c.bf16 %v1912_v28, %v1911_v24 }
 0x66f   :  { %v2034_v46 = vmul.f32 -1.442695, %v2706_v43  ;;  %v2681_v43 = vpack.c.bf16 %v1914_v42, %v1913_v31 }
 0x670   :  { %2851 = vpow2.f32 %v2033_v45  ;;  %v1915_v45 = vld [vmem:[#allocation11 + $0x40] sm:$0xff] }
 0x671   :  { %2853 = vpow2.f32 %v2034_v46  ;;  %v1916_v46 = vld [vmem:[#allocation11 + $0x48] sm:$0xff] }
 0x672   :  { %2855 = vtanh.f32 %v2722_v51  ;;  %v2684_v49 = vpack.c.bf16 %v1916_v46, %v1915_v45  ;;  %v1917_v51 = vld [vmem:[#allocation11 + $0x50] sm:$0xff] }
 0x673   :  { %2857 = vpow2.f32 %v2035_v52  ;;  %v1918_v52 = vld [vmem:[#allocation11 + $0x58] sm:$0xff] }
 0x67a   :  { %v2852_v38 = vpop.eup %2851 }
 0x67b   :  { %v1537_v57 = vadd.f32 1.0, %v2852_v38  ;;  %v2854_v41 = vpop.eup %2853  ;;  %v2687_v38 = vpack.c.bf16 %v1918_v52, %v1917_v51 }
 0x67c   :  { %v1538_v59 = vadd.f32 1.0, %v2854_v41  ;;  %v2856_v61 = vpop.eup %2855  ;;  %v1920_v41 = vld [vmem:[#allocation11 + $0x68] sm:$0xff] }
 0x67d   :  { %2859 = vrcp.f32 %v1537_v57  ;;  %v2858_v2 = vpop.eup %2857  ;;  %v1919_v57 = vld [vmem:[#allocation11 + $0x60] sm:$0xff] }
 0x67e   :  { %2861 = vrcp.f32 %v1538_v59  ;;  %v1539_v11 = vadd.f32 1.0, %v2858_v2  ;;  %v2690_v59 = vpack.c.bf16 %v1920_v41, %v1919_v57  ;;  %v1922_v2 = vld [vmem:[#allocation11 + $0x78] sm:$0xff] }
 0x680   :  { %2863 = vrcp.f32 %v1539_v11 }
 0x687   :  { %v2860_v5 = vpop.eup %2859 }
 0x688   :  { %v1548_v7 = vmul.f32 %v2860_v5, %v2856_v61  ;;  %v2862_v8 = vpop.eup %2861  ;;  %v1921_v61 = vld [vmem:[#allocation11 + $0x70] sm:$0xff] }
 0x689   :  { %v1547_v12 = vmul.f32 %v2862_v8, %v3466_v21  ;;  %v1909_v21 = vld [vmem:[#allocation11 + $0x10] sm:$0xff]  ;;  %v2693_v5 = vpack.c.bf16 %v1922_v2, %v1921_v61 }
 0x68a   :  { %v2864_v17 = vpop.eup %2863  ;;  %v2675_v39 = vpack.c.bf16 %v1910_v34, %v1909_v21 }
 0x68b   :  { %v3508_v15 = vadd.f32 %v1548_v7, %v1547_v12 }
 0x68d   :  { %2865 = vtanh.f32 %v3508_v15 }
 0x697   :  { %v2866_v20 = vpop.eup %2865 }
 0x698   :  { %v1551_v33 = vmul.f32 %v2866_v20, %v2864_v17 }
 0x69a   :  { %1622 = vmatmul.mubr.f32.vlgmr.msra.gmra.mrb[12].mxu0 %v1551_v33  ;;  %1693 = vmatmul.mubr.f32.vlgmr.msra.gmra.mrb[12].mxu1 %v1551_v33 }
 0x69b   :  { %2610 = vmatpush1.bf16.msra.mxu0 %v3137_v47  ;;  %2642 = vmatpush1.bf16.msra.mxu1 %v3140_v50 }
 0x69c   :  { %2612 = vmatprep.subr.bf16.mxu0 %v3143_v53  ;;  %2644 = vmatprep.subr.bf16.mxu1 %v3145_v56 }
 0x69d   :  { %1796 = vmatprep.mubr.f32.mxu0 %v3025_v0  ;;  %1867 = vmatprep.mubr.f32.mxu1 %v3025_v0 }
 0x69f   :  { %2614 = vmatpush1.bf16.msra.mxu0 %v3148_v60  ;;  %2646 = vmatpush1.bf16.msra.mxu1 %v3152_v63 }
 0x6a0   :  { %2616 = vmatprep.subr.bf16.mxu0 %v3156_v3  ;;  %2648 = vmatprep.subr.bf16.mxu1 %v3159_v6 }
 0x6a3   :  { %2618 = vmatpush1.bf16.msra.mxu0 %v3162_v10  ;;  %2650 = vmatpush1.bf16.msra.mxu1 %v3166_v13 }
 0x6a4   :  { %2620 = vmatprep.subr.bf16.mxu0 %v3170_v16  ;;  %2652 = vmatprep.subr.bf16.mxu1 %v3173_v19 }
 0x6a7   :  { %2622 = vmatpush1.bf16.msra.mxu0 %v3176_v23  ;;  %2654 = vmatpush1.bf16.msra.mxu1 %v3180_v26 }
 0x6a8   :  { %2624 = vmatprep.subr.bf16.mxu0 %v3184_v29  ;;  %2656 = vmatprep.subr.bf16.mxu1 %v3187_v32 }
 0x6ab   :  { %2626 = vmatpush1.bf16.msra.mxu0 %v3190_v36  ;;  %2658 = vmatpush1.bf16.msra.mxu1 %v3194_v40 }
 0x6ac   :  { %2628 = vmatprep.subr.bf16.mxu0 %v3198_v44  ;;  %2660 = vmatprep.subr.bf16.mxu1 %v3201_v48 }
 0x6af   :  { %2630 = vmatpush1.bf16.msra.mxu0 %v3204_v54  ;;  %2662 = vmatpush1.bf16.msra.mxu1 %v3208_v58 }
 0x6b0   :  { %2632 = vmatprep.subr.bf16.mxu0 %v3212_v62  ;;  %2664 = vmatprep.subr.bf16.mxu1 %v3215_v4 }
 0x6b3   :  { %2634 = vmatpush1.bf16.msra.mxu0 %v3218_v9  ;;  %2666 = vmatpush1.bf16.msra.mxu1 %v3222_v14 }
 0x6b4   :  { %2636 = vmatprep.subr.bf16.mxu0 %v3226_v18  ;;  %2668 = vmatprep.subr.bf16.mxu1 %v3229_v22  ;;  %v1907_v18 = vld [vmem:[#allocation11] sm:$0xff]  ;;  %v1908_v22 = vld [vmem:[#allocation11 + $0x8] sm:$0xff] }
 0x6b7   :  { %2638 = vmatpush1.bf16.msra.mxu0 %v3232_v25  ;;  %2670 = vmatpush1.bf16.msra.mxu1 %v3236_v27  ;;  %v2672_v25 = vpack.c.bf16 %v1908_v22, %v1907_v18  ;;  %v3026_v27 = vmov 0.0|0.0  }
 0x6b8   :  { %2671 = vmatprep.subr.bf16.mxu0 %v3026_v27 }
 0x76d   :  { %v1623_v47 = vpop.f32.mrb[12].mxu0  ;;  %v1694_v50 = vpop.f32.mrb[12].mxu1 }
 0x76e   :  { %v2707_v53 = vadd.f32 %v1623_v47, %v3286_v35  ;;  %v1625_v56 = vpop.f32.mrb[13].mxu0  ;;  %v1696_v60 = vpop.f32.mrb[13].mxu1  ;;  %v2723_v10 = vadd.f32 %v1694_v50, %v3292_v55 }
 0x76f   :  { %v2708_v63 = vadd.f32 %v1625_v56, %v3288_v37  ;;  %v2724_v13 = vadd.f32 %v1696_v60, %v3295_v1 }
 0x770   :  { %v2036_v3 = vmul.f32 -1.442695, %v2707_v53  ;;  %v2038_v16 = vmul.f32 -1.442695, %v2723_v10 }
 0x771   :  { %v2037_v6 = vmul.f32 -1.442695, %v2708_v63 }
 0x772   :  { %2867 = vpow2.f32 %v2036_v3 }
 0x773   :  { %2869 = vpow2.f32 %v2037_v6 }
 0x774   :  { %2871 = vtanh.f32 %v2724_v13 }
 0x775   :  { %2873 = vpow2.f32 %v2038_v16 }
 0x77c   :  { %v2868_v19 = vpop.eup %2867 }
 0x77d   :  { %v1712_v23 = vadd.f32 1.0, %v2868_v19  ;;  %v2870_v26 = vpop.eup %2869 }
 0x77e   :  { %v1713_v29 = vadd.f32 1.0, %v2870_v26  ;;  %v2872_v32 = vpop.eup %2871  ;;  %v2042_v26 = vld [vmem:[%s3577_s5] ss:$0 sm:$0xff] }
 0x77f   :  { %2875 = vrcp.f32 %v1712_v23  ;;  %v2874_v36 = vpop.eup %2873 }
 0x780   :  { %2877 = vrcp.f32 %v1713_v29  ;;  %v1714_v54 = vadd.f32 1.0, %v2874_v36 }
 0x782   :  { %2879 = vrcp.f32 %v1714_v54 }
 0x789   :  { %v2876_v40 = vpop.eup %2875 }
 0x78a   :  { %v1723_v44 = vmul.f32 %v2876_v40, %v2872_v32  ;;  %v2878_v48 = vpop.eup %2877 }
 0x78b   :  { %v1722_v58 = vmul.f32 %v2878_v48, %v3508_v15 }
 0x78c   :  { %v2880_v4 = vpop.eup %2879 }
 0x78d   :  { %v3548_v62 = vadd.f32 %v1723_v44, %v1722_v58 }
 0x78f   :  { %2881 = vtanh.f32 %v3548_v62 }
 0x799   :  { %v2882_v9 = vpop.eup %2881 }
 0x79a   :  { %v1726_v14 = vmul.f32 %v2882_v9, %v2880_v4 }
 0x79c   :  { %1797 = vmatmul.mubr.f32.vlgmr.msra.gmra.mrb[14].mxu0 %v1726_v14  ;;  %1868 = vmatmul.mubr.f32.vlgmr.msra.gmra.mrb[14].mxu1 %v1726_v14 }
 0x79d   :  { %2673 = vmatpush3.bf16.msra.mxu0 %v2672_v25  ;;  %2092 = vmatprep.mubr.msk.f32.mxu0 %vm3027_vm0, %v3025_v0 }
 0x79e   :  { %2674 = vmatprep.subr.bf16.mxu0 %v3026_v27 }
 0x7a1   :  { %2676 = vmatpush3.bf16.msra.mxu0 %v2675_v39 }
 0x7a2   :  { %2677 = vmatprep.subr.bf16.mxu0 %v3026_v27 }
 0x7a5   :  { %2679 = vmatpush3.bf16.msra.mxu0 %v2678_v30 }
 0x7a6   :  { %2680 = vmatprep.subr.bf16.mxu0 %v3026_v27 }
 0x7a9   :  { %2682 = vmatpush3.bf16.msra.mxu0 %v2681_v43 }
 0x7aa   :  { %2683 = vmatprep.subr.bf16.mxu0 %v3026_v27 }
 0x7ad   :  { %2685 = vmatpush3.bf16.msra.mxu0 %v2684_v49 }
 0x7ae   :  { %2686 = vmatprep.subr.bf16.mxu0 %v3026_v27 }
 0x7b1   :  { %2688 = vmatpush3.bf16.msra.mxu0 %v2687_v38 }
 0x7b2   :  { %2689 = vmatprep.subr.bf16.mxu0 %v3026_v27 }
 0x7b5   :  { %2691 = vmatpush3.bf16.msra.mxu0 %v2690_v59 }
 0x7b6   :  { %2692 = vmatprep.subr.bf16.mxu0 %v3026_v27 }
 0x7b9   :  { %2694 = vmatpush3.bf16.msra.mxu0 %v2693_v5 }
 0x86f   :  { %v1798_v7 = vpop.f32.mrb[14].mxu0  ;;  %v1869_v8 = vpop.f32.mrb[14].mxu1 }
 0x870   :  { %v2709_v11 = vadd.f32 %v1798_v7, %v3286_v35  ;;  %v1800_v12 = vpop.f32.mrb[15].mxu0  ;;  %v1871_v15 = vpop.f32.mrb[15].mxu1  ;;  %v2725_v0 = vadd.f32 %v1869_v8, %v3292_v55 }
 0x871   :  { %v2710_v17 = vadd.f32 %v1800_v12, %v3288_v37  ;;  %v2726_v47 = vadd.f32 %v1871_v15, %v3295_v1 }
 0x872   :  { %v2039_v20 = vmul.f32 -1.442695, %v2709_v11  ;;  %v2041_v50 = vmul.f32 -1.442695, %v2725_v0 }
 0x873   :  { %v2040_v33 = vmul.f32 -1.442695, %v2710_v17 }
 0x874   :  { %2883 = vpow2.f32 %v2039_v20 }
 0x875   :  { %2885 = vpow2.f32 %v2040_v33 }
 0x876   :  { %2887 = vtanh.f32 %v2726_v47 }
 0x877   :  { %2889 = vpow2.f32 %v2041_v50 }
 0x87e   :  { %v2884_v53 = vpop.eup %2883 }
 0x87f   :  { %v1887_v56 = vadd.f32 1.0, %v2884_v53  ;;  %v2886_v60 = vpop.eup %2885 }
 0x880   :  { %v1888_v35 = vadd.f32 1.0, %v2886_v60  ;;  %v2888_v63 = vpop.eup %2887 }
 0x881   :  { %2891 = vrcp.f32 %v1887_v56  ;;  %v2890_v3 = vpop.eup %2889 }
 0x882   :  { %2893 = vrcp.f32 %v1888_v35  ;;  %v1889_v13 = vadd.f32 1.0, %v2890_v3 }
 0x884   :  { %2895 = vrcp.f32 %v1889_v13 }
 0x88b   :  { %v2892_v37 = vpop.eup %2891 }
 0x88c   :  { %v1898_v6 = vmul.f32 %v2892_v37, %v2888_v63  ;;  %v2894_v10 = vpop.eup %2893 }
 0x88d   :  { %v1897_v16 = vmul.f32 %v2894_v10, %v3548_v62 }
 0x88e   :  { %v2896_v1 = vpop.eup %2895 }
 0x88f   :  { %v1899_v55 = vadd.f32 %v1898_v6, %v1897_v16 }
 0x891   :  { %2897 = vtanh.f32 %v1899_v55 }
 0x89b   :  { %v2898_v19 = vpop.eup %2897 }
 0x89c   :  { %v1901_v23 = vmul.f32 %v2898_v19, %v2896_v1 }
 0x89e   :  { %2093 = vmatmul.mubr.f32.vlgmr.msra.gmra.mrb[16].mxu0 %v1901_v23 }
 0x971   :  { %v1996_v29 = vpop.f32.mrb[16].mxu0 }
 0x972   :  { %v1997_v32 = vadd.f32 %v2042_v26, %v1996_v29  ;;  %v2094_v36 = vpop.f32.mrb[17].mxu0 }
 0x974   :  { %2000 = vst [vmem:[#allocation13] sm:$0xff] %v1997_v32 }
 0x975   :  { %2998 = shalt.err (!%p2995_p8)
}
 0x976   :  { %s2999_s28 = scalar_lea.hbm %s3578_s6, 128 }
 0x977   :  { %p3000_p9 = scmp.ne.s32.totalorder %s3578_s6, %s2999_s28  ;;  %p3003_p10 = scmp.lt.u32.totalorder %s2999_s28, %s3578_s6 }
 0x979   :  { %p3005_p11 = pnand %p3003_p10, %p3000_p9 }
 0x97b   :  { %3008 = shalt.err (!%p3005_p11)
}
 0x97c   :  { %2010 = dma.vmem_to_hbm [thread:$0]  %s2008_s24, 128, %s3578_s6, [#allocation7]  }
 0x97d   :  { %3015 = dma.done.wait [#allocation7], 128  }
 0x97e   :  { %3016 = vsyncadd [#allocation7], 4294967168 }
 0x97f   :  { %2014 = vsyncpa [#allocation6], 1 }
 0x980   :  { %2015 = vsyncpa [#allocation9], 1 }
 0x981   :  { %2016 = vsyncpa [#allocation12], 1 }
 0x982   :  { %2017 = vsyncpa [#allocation7], 1 }

</bundles_post_ra>
